<compile_context>
chip_gen: v7x
topology: tpu7x:2x2x1
jax: 0.10.0
libtpu: 0.0.40
codegen_flags: <defaults>
</compile_context>

<pallas_src>
import jax
import jax.numpy as jnp
from jax.experimental import pallas as pl
from jax.experimental.pallas import tpu as pltpu

LANE = 128                 # TPU lane width: final 10-wide output padded to 128
IN_FEATURES = 3 * 32 * 32  # 3072
OUT_FEATURES = 10


def mlp3_kernel(x_ref, w1_ref, w2_ref, w3_ref, w4_ref, w5_ref, o_ref):
    """Fused forward: 5x (bf16 matmul on MXU with f32 accumulation -> ReLU)."""
    # Input arrives f32 straight from HBM; cast to bf16 in-register so the
    # wrapper doesn't pay a separate read-f32/write-bf16 cast pass.
    h = x_ref[...].astype(jnp.bfloat16)
    for w_ref in (w1_ref, w2_ref, w3_ref, w4_ref):
        h = jnp.maximum(
            jnp.dot(h, w_ref[...], preferred_element_type=jnp.float32), 0.0
        ).astype(jnp.bfloat16)
    out = jnp.maximum(
        jnp.dot(h, w5_ref[...], preferred_element_type=jnp.float32), 0.0
    )
    o_ref[...] = out.astype(o_ref.dtype)  # lane-dense [tile_m, 128] bf16 store


def prepare_weights(w1, w2, w3, w4, w5, dtype=jnp.bfloat16):
    """One-time weight prep (call once at init, NOT per forward):
    transpose PyTorch [out,in] -> [in,out], cast to bf16, and zero-pad the last
    layer's output dim 10 -> 128 so the kernel's final store is lane-dense."""
    # TODO(synk): generation-dispatched W1 quantization (int8 on v5e/v6e, fp8 on
    # v7x) would cut the dominant small-batch weight fetch ~40%; kept bf16 here
    # for portability/accuracy.
    wts = [jnp.asarray(w, jnp.float32).T.astype(dtype) for w in (w1, w2, w3, w4, w5)]
    w5t = wts[-1]
    wts[-1] = jnp.pad(w5t, ((0, 0), (0, LANE - w5t.shape[1])))
    return tuple(wts)


@jax.jit
def mlp3_forward(x, wts):
    """x: [B, 3, 32, 32] f32 (NCHW). wts: output of prepare_weights()."""
    B = x.shape[0]
    x_flat = x.reshape(B, -1)          # stays f32; bf16 cast happens in-kernel
    K = x_flat.shape[1]

    # Batch tiling: 512-row tiles for big batches (amortize grid-step overhead,
    # fits 32 MiB scoped VMEM even with the f32 input block double-buffered),
    # 128-row tiles for mid batches (grid >= 2 so v7x's 2 TensorCores both
    # engage via the "parallel" axis), and a single full-array tile for small
    # batches (block == full dims, so no (8,128) constraint and no padding).
    if B >= 512:
        tile_m = 512
    elif B >= 256:
        tile_m = 128
    else:
        tile_m = B
    Bp = pl.cdiv(B, tile_m) * tile_m
    grid = (Bp // tile_m,)

    if Bp != B:
        # Padded rows are zero and stay zero through bias-free matmul + ReLU.
        x_in = jnp.zeros((Bp, K), x_flat.dtype).at[:B].set(x_flat)
    else:
        x_in = x_flat                   # no pad / no extra HBM pass

    flops = 2 * Bp * sum(w.shape[0] * w.shape[1] for w in wts)
    bytes_accessed = (
        sum(w.size * w.dtype.itemsize for w in wts)      # ~3.9 MiB bf16 weights
        + x_in.size * x_in.dtype.itemsize                # f32 input, read once
        + Bp * LANE * 2                                  # bf16 output
    )

    # Weights: constant index_map -> resident across the grid; single-buffered
    # so Pallas doesn't allocate a useless second VMEM copy (~3.8 MiB saved).
    weight_specs = [
        pl.BlockSpec(w.shape, lambda i: (0, 0), pipeline_mode=pl.Buffered(1))
        for w in wts
    ]

    out = pl.pallas_call(
        mlp3_kernel,
        out_shape=jax.ShapeDtypeStruct((Bp, LANE), jnp.bfloat16),
        grid=grid,
        in_specs=[pl.BlockSpec((tile_m, K), lambda i: (i, 0))] + weight_specs,
        out_specs=pl.BlockSpec((tile_m, LANE), lambda i: (i, 0)),
        compiler_params=pltpu.CompilerParams(
            dimension_semantics=("parallel",),
            vmem_limit_bytes=32 << 20,   # fits v7x's 64 MiB physical with headroom
        ),
        cost_estimate=pl.CostEstimate(
            flops=flops, transcendentals=0, bytes_accessed=bytes_accessed
        ),
    )(x_in, *wts)

    # TODO(synk): for latency-critical tiny batches, persist the 3.8 MiB of
    # weights in VMEM across calls (pl.get_global / cross-call prefetch, P10)
    # to remove the per-inference weight-DMA floor.
    return out[:B, :OUT_FEATURES].astype(jnp.float32)


def kaiming_normal(key, out_f, in_f):
    """nn.init.kaiming_normal_ default (fan_in, gain=sqrt(2)) -> std=sqrt(2/fan_in).
    PyTorch Linear weight layout: [out_features, in_features]."""
    std = (2.0 / in_f) ** 0.5
    return std * jax.random.normal(key, (out_f, in_f), dtype=jnp.float32)


def make_params(key):
    dims = [(512, IN_FEATURES), (512, 512), (256, 512), (128, 256), (OUT_FEATURES, 128)]
    keys = jax.random.split(key, len(dims))
    return [kaiming_normal(k, o, i) for k, (o, i) in zip(keys, dims)]


def reference_forward(x, weights):
    """Pure f32 reference matching the PyTorch module."""
    h = x.reshape(x.shape[0], -1)
    for w in weights:
        h = jnp.maximum(h @ w.T, 0.0)
    return h


if __name__ == "__main__":
    key = jax.random.PRNGKey(0)
    k_x, k_w = jax.random.split(key)

    B = 2
    x = jax.random.normal(k_x, (B, 3, 32, 32), dtype=jnp.float32)
    w1, w2, w3, w4, w5 = make_params(k_w)

    # One-time weight prep (transpose + bf16 cast + output-pad), outside the hot path.
    wts = prepare_weights(w1, w2, w3, w4, w5)

    out = mlp3_forward(x, wts)
    out = jax.block_until_ready(out)

    assert out.shape == (B, OUT_FEATURES), out.shape

    ref = reference_forward(x, [w1, w2, w3, w4, w5])
    # bf16 weights/activations/output vs f32 reference -> loosened tolerance.
    assert jnp.allclose(out, ref, atol=5e-2, rtol=5e-2), (
        float(jnp.max(jnp.abs(out - ref)))
    )

    print("KERNEL_OK")
</pallas_src>

<mosaic_0001>
module attributes {stable_mosaic.version = 11 : i64} {
  func.func @mlp3_kernel(%arg0: i32, %arg1: memref<2x3072xf32, #tpu.memory_space<vmem>>, %arg2: memref<3072x512xbf16, #tpu.memory_space<vmem>>, %arg3: memref<512x512xbf16, #tpu.memory_space<vmem>>, %arg4: memref<512x256xbf16, #tpu.memory_space<vmem>>, %arg5: memref<256x128xbf16, #tpu.memory_space<vmem>>, %arg6: memref<128x128xbf16, #tpu.memory_space<vmem>>, %arg7: memref<2x128xbf16, #tpu.memory_space<vmem>>) attributes {dimension_semantics = [#tpu.dimension_semantics<parallel>], iteration_bounds = array<i64: 1>, scalar_prefetch = 0 : i64, scratch_operands = 0 : i64, tpu.core_type = #tpu.core_type<tc>, window_params = [{transform_indices = @transform_0, window_bounds = array<i64: 2, 3072>}, {pipeline_mode = #tpu.pipeline_mode<synchronous>, transform_indices = @transform_1, window_bounds = array<i64: 3072, 512>}, {pipeline_mode = #tpu.pipeline_mode<synchronous>, transform_indices = @transform_2, window_bounds = array<i64: 512, 512>}, {pipeline_mode = #tpu.pipeline_mode<synchronous>, transform_indices = @transform_3, window_bounds = array<i64: 512, 256>}, {pipeline_mode = #tpu.pipeline_mode<synchronous>, transform_indices = @transform_4, window_bounds = array<i64: 256, 128>}, {pipeline_mode = #tpu.pipeline_mode<synchronous>, transform_indices = @transform_5, window_bounds = array<i64: 128, 128>}, {transform_indices = @transform_6, window_bounds = array<i64: 2, 128>}]} {
    %c0 = arith.constant 0 : index
    %c0_0 = arith.constant 0 : index
    %0 = vector.load %arg1[%c0, %c0_0] : memref<2x3072xf32, #tpu.memory_space<vmem>>, vector<2x3072xf32>
    %1 = arith.truncf %0 : vector<2x3072xf32> to vector<2x3072xbf16>
    %c0_1 = arith.constant 0 : index
    %c0_2 = arith.constant 0 : index
    %2 = vector.load %arg2[%c0_1, %c0_2] : memref<3072x512xbf16, #tpu.memory_space<vmem>>, vector<3072x512xbf16>
    %cst = arith.constant dense<0.000000e+00> : vector<2x512xf32>
    %3 = tpu.matmul %1, %2, %cst {dimension_numbers = #tpu.dot_dimension_numbers<[1], [0], [0], [1], [0, 0, 1, 1], [], []>} : vector<2x3072xbf16>, vector<3072x512xbf16>, vector<2x512xf32> -> vector<2x512xf32>
    %cst_3 = arith.constant 0.000000e+00 : f32
    %4 = vector.broadcast %cst_3 : f32 to vector<2x512xf32>
    %5 = arith.maximumf %3, %4 : vector<2x512xf32>
    %6 = arith.truncf %5 : vector<2x512xf32> to vector<2x512xbf16>
    %c0_4 = arith.constant 0 : index
    %c0_5 = arith.constant 0 : index
    %7 = vector.load %arg3[%c0_4, %c0_5] : memref<512x512xbf16, #tpu.memory_space<vmem>>, vector<512x512xbf16>
    %cst_6 = arith.constant dense<0.000000e+00> : vector<2x512xf32>
    %8 = tpu.matmul %6, %7, %cst_6 {dimension_numbers = #tpu.dot_dimension_numbers<[1], [0], [0], [1], [0, 0, 1, 1], [], []>} : vector<2x512xbf16>, vector<512x512xbf16>, vector<2x512xf32> -> vector<2x512xf32>
    %cst_7 = arith.constant 0.000000e+00 : f32
    %9 = vector.broadcast %cst_7 : f32 to vector<2x512xf32>
    %10 = arith.maximumf %8, %9 : vector<2x512xf32>
    %11 = arith.truncf %10 : vector<2x512xf32> to vector<2x512xbf16>
    %c0_8 = arith.constant 0 : index
    %c0_9 = arith.constant 0 : index
    %12 = vector.load %arg4[%c0_8, %c0_9] : memref<512x256xbf16, #tpu.memory_space<vmem>>, vector<512x256xbf16>
    %cst_10 = arith.constant dense<0.000000e+00> : vector<2x256xf32>
    %13 = tpu.matmul %11, %12, %cst_10 {dimension_numbers = #tpu.dot_dimension_numbers<[1], [0], [0], [1], [0, 0, 1, 1], [], []>} : vector<2x512xbf16>, vector<512x256xbf16>, vector<2x256xf32> -> vector<2x256xf32>
    %cst_11 = arith.constant 0.000000e+00 : f32
    %14 = vector.broadcast %cst_11 : f32 to vector<2x256xf32>
    %15 = arith.maximumf %13, %14 : vector<2x256xf32>
    %16 = arith.truncf %15 : vector<2x256xf32> to vector<2x256xbf16>
    %c0_12 = arith.constant 0 : index
    %c0_13 = arith.constant 0 : index
    %17 = vector.load %arg5[%c0_12, %c0_13] : memref<256x128xbf16, #tpu.memory_space<vmem>>, vector<256x128xbf16>
    %cst_14 = arith.constant dense<0.000000e+00> : vector<2x128xf32>
    %18 = tpu.matmul %16, %17, %cst_14 {dimension_numbers = #tpu.dot_dimension_numbers<[1], [0], [0], [1], [0, 0, 1, 1], [], []>} : vector<2x256xbf16>, vector<256x128xbf16>, vector<2x128xf32> -> vector<2x128xf32>
    %cst_15 = arith.constant 0.000000e+00 : f32
    %19 = vector.broadcast %cst_15 : f32 to vector<2x128xf32>
    %20 = arith.maximumf %18, %19 : vector<2x128xf32>
    %21 = arith.truncf %20 : vector<2x128xf32> to vector<2x128xbf16>
    %c0_16 = arith.constant 0 : index
    %c0_17 = arith.constant 0 : index
    %22 = vector.load %arg6[%c0_16, %c0_17] : memref<128x128xbf16, #tpu.memory_space<vmem>>, vector<128x128xbf16>
    %cst_18 = arith.constant dense<0.000000e+00> : vector<2x128xf32>
    %23 = tpu.matmul %21, %22, %cst_18 {dimension_numbers = #tpu.dot_dimension_numbers<[1], [0], [0], [1], [0, 0, 1, 1], [], []>} : vector<2x128xbf16>, vector<128x128xbf16>, vector<2x128xf32> -> vector<2x128xf32>
    %cst_19 = arith.constant 0.000000e+00 : f32
    %24 = vector.broadcast %cst_19 : f32 to vector<2x128xf32>
    %25 = arith.maximumf %23, %24 : vector<2x128xf32>
    %26 = arith.truncf %25 : vector<2x128xf32> to vector<2x128xbf16>
    %c0_20 = arith.constant 0 : index
    %c0_21 = arith.constant 0 : index
    %27 = vector.load %arg7[%c0_20, %c0_21] : memref<2x128xbf16, #tpu.memory_space<vmem>>, vector<2x128xbf16>
    tpu.vector_store %arg7[%c0_20, %c0_21], %26 {strides = array<i32>} : memref<2x128xbf16, #tpu.memory_space<vmem>>, vector<2x128xbf16>,
    return
  }
  func.func @transform_0(%arg0: i32) -> (i32, i32) {
    %c0_i32 = arith.constant 0 : i32
    %c0_i32_0 = arith.constant 0 : i32
    return %arg0, %c0_i32 : i32, i32
  }
  func.func @transform_1(%arg0: i32) -> (i32, i32) {
    %c0_i32 = arith.constant 0 : i32
    %c0_i32_0 = arith.constant 0 : i32
    %c0_i32_1 = arith.constant 0 : i32
    return %c0_i32, %c0_i32_0 : i32, i32
  }
  func.func @transform_2(%arg0: i32) -> (i32, i32) {
    %c0_i32 = arith.constant 0 : i32
    %c0_i32_0 = arith.constant 0 : i32
    %c0_i32_1 = arith.constant 0 : i32
    return %c0_i32, %c0_i32_0 : i32, i32
  }
  func.func @transform_3(%arg0: i32) -> (i32, i32) {
    %c0_i32 = arith.constant 0 : i32
    %c0_i32_0 = arith.constant 0 : i32
    %c0_i32_1 = arith.constant 0 : i32
    return %c0_i32, %c0_i32_0 : i32, i32
  }
  func.func @transform_4(%arg0: i32) -> (i32, i32) {
    %c0_i32 = arith.constant 0 : i32
    %c0_i32_0 = arith.constant 0 : i32
    %c0_i32_1 = arith.constant 0 : i32
    return %c0_i32, %c0_i32_0 : i32, i32
  }
  func.func @transform_5(%arg0: i32) -> (i32, i32) {
    %c0_i32 = arith.constant 0 : i32
    %c0_i32_0 = arith.constant 0 : i32
    %c0_i32_1 = arith.constant 0 : i32
    return %c0_i32, %c0_i32_0 : i32, i32
  }
  func.func @transform_6(%arg0: i32) -> (i32, i32) {
    %c0_i32 = arith.constant 0 : i32
    %c0_i32_0 = arith.constant 0 : i32
    return %arg0, %c0_i32 : i32, i32
  }
}

</mosaic_0001>

<bundles_post_ra>
// kernel: mlp3_forward.1
= control target key start
LH: loop header
LB: loop body
LE: loop exit
PB: predicated region body
PF: predicated region fallthrough
CT: control target
= control target key end

     0   :  { %11 = vsyncpa [#allocation3], 0  ;;  %s10550_s0 = inlined_call_operand.vmem [shape: f32[2,3072], index: 0, kind: input, shape index: {}]   ;;  %s10551_s1 = inlined_call_operand.hbm [shape: bf16[3072,512], index: 1, kind: input, shape index: {}]   ;;  %s10552_s2 = inlined_call_operand.hbm [shape: bf16[512,512], index: 2, kind: input, shape index: {}]   ;;  %s10553_s3 = inlined_call_operand.hbm [shape: bf16[512,256], index: 3, kind: input, shape index: {}]   ;;  %s10554_s4 = inlined_call_operand.hbm [shape: bf16[256,128], index: 4, kind: input, shape index: {}]   ;;  %s10555_s5 = inlined_call_operand.hbm [shape: bf16[128,128], index: 5, kind: input, shape index: {}]   ;;  %s10556_s6 = inlined_call_operand.vmem [shape: bf16[2,128], index: 6, kind: output, shape index: {}]  }
   0x1   :  { %12 = vsyncpa [#allocation5], 0 }
   0x2   :  { %13 = vsyncpa [#allocation8], 0  ;;  %s10283_s21 = smov [#allocation4]   ;;  %s10284_s23 = smov [#allocation7]  }
   0x3   :  { %s33_s22 = sshll.u32 %s10283_s21, 4  ;;  %s57_s24 = sshll.u32 %s10284_s23, 4  ;;  %s34_s22 = int_to_ptr.vmem [resolvable:$true] %s33_s22  ;;  %s10332_s24 = int_to_ptr.vmem [resolvable:$true] %s57_s24 }
   0x4   :  { %s10167_s27 = scalar_lea.hbm %s10552_s2, 16384 }
   0x5   :  { %p10168_p0 = scmp.ne.s32.totalorder %s10552_s2, %s10167_s27  ;;  %p10171_p1 = scmp.lt.u32.totalorder %s10167_s27, %s10552_s2 }
   0x7   :  { %p10173_p2 = pnand %p10171_p1, %p10168_p0 }
   0x9   :  { %10176 = shalt.err (!%p10173_p2)
}
   0xa   :  { %s10177_s8 = scalar_lea.vmem %s34_s22, 16384  ;;  %p10182_p4 = scmp.lt.s32.totalorder %s34_s22, %s34_s22 }
   0xb   :  { %p10178_p3 = scmp.ne.s32.totalorder %s34_s22, %s10177_s8  ;;  %p10183_p5 = scmp.lt.s32.totalorder %s10177_s8, %s10177_s8 }
   0xd   :  { %p10184_p6 = por %p10183_p5, %p10182_p4 }
   0xf   :  { %p10185_p7 = pnand %p10184_p6, %p10178_p3 }
  0x11   :  { %10188 = shalt.err (!%p10185_p7)
}
  0x12   :  { %s10285_s9 = smov 256   ;;  %s10286_s10 = smov 16  }
  0x13   :  { %39 = dma.hbm_to_vmem [thread:$0]  %s10552_s2, 16384, %s34_s22, [#allocation5], %s10285_s9, %s10285_s9, %s10286_s10  }
  0x14   :  { %s10189_s15 = scalar_lea.hbm %s10554_s4, 2048 }
  0x15   :  { %p10190_p8 = scmp.ne.s32.totalorder %s10554_s4, %s10189_s15  ;;  %p10193_p9 = scmp.lt.u32.totalorder %s10189_s15, %s10554_s4 }
  0x17   :  { %p10195_p10 = pnand %p10193_p9, %p10190_p8 }
  0x19   :  { %10198 = shalt.err (!%p10195_p10)
}
  0x1a   :  { %s10199_s20 = scalar_lea.vmem %s10332_s24, 2048  ;;  %p10204_p12 = scmp.lt.s32.totalorder %s10332_s24, %s10332_s24 }
  0x1b   :  { %p10200_p11 = scmp.ne.s32.totalorder %s10332_s24, %s10199_s20  ;;  %p10205_p13 = scmp.lt.s32.totalorder %s10199_s20, %s10199_s20 }
  0x1d   :  { %p10206_p0 = por %p10205_p13, %p10204_p12 }
  0x1f   :  { %p10207_p1 = pnand %p10206_p0, %p10200_p11 }
  0x21   :  { %10210 = shalt.err (!%p10207_p1)
}
  0x22   :  { %s10287_s2 = smov 64   ;;  %s10288_s21 = smov 4  }
  0x23   :  { %63 = dma.hbm_to_vmem [thread:$0]  %s10554_s4, 2048, %s10332_s24, [#allocation8], %s10287_s2, %s10287_s2, %s10288_s21  }
  0x24   :  { %s10289_s25 = smov [#allocation2]   ;;  %s10290_s27 = smov [#allocation6]  }
  0x25   :  { %s21_s26 = sshll.u32 %s10289_s25, 4  ;;  %s45_s28 = sshll.u32 %s10290_s27, 4  ;;  %s22_s26 = int_to_ptr.vmem [resolvable:$true] %s21_s26  ;;  %s10369_s28 = int_to_ptr.vmem [resolvable:$true] %s45_s28 }
  0x26   :  { %s10211_s7 = scalar_lea.hbm %s10551_s1, 98304 }
  0x27   :  { %p10212_p2 = scmp.ne.s32.totalorder %s10551_s1, %s10211_s7  ;;  %p10215_p3 = scmp.lt.u32.totalorder %s10211_s7, %s10551_s1 }
  0x29   :  { %p10217_p4 = pnand %p10215_p3, %p10212_p2 }
  0x2b   :  { %10220 = shalt.err (!%p10217_p4)
}
  0x2c   :  { %s10221_s4 = scalar_lea.vmem %s22_s26, 98304  ;;  %p10226_p6 = scmp.lt.s32.totalorder %s22_s26, %s22_s26 }
  0x2d   :  { %p10222_p5 = scmp.ne.s32.totalorder %s22_s26, %s10221_s4  ;;  %p10227_p7 = scmp.lt.s32.totalorder %s10221_s4, %s10221_s4 }
  0x2f   :  { %p10228_p8 = por %p10227_p7, %p10226_p6 }
  0x31   :  { %p10229_p9 = pnand %p10228_p8, %p10222_p5 }
  0x33   :  { %10232 = shalt.err (!%p10229_p9)
}
  0x34   :  { %27 = dma.hbm_to_vmem [thread:$0]  %s10551_s1, 98304, %s22_s26, [#allocation3], %s10285_s9, %s10285_s9, %s10286_s10  }
  0x35   :  { %s10233_s17 = scalar_lea.hbm %s10553_s3, 8192 }
  0x36   :  { %p10234_p10 = scmp.ne.s32.totalorder %s10553_s3, %s10233_s17  ;;  %p10237_p11 = scmp.lt.u32.totalorder %s10233_s17, %s10553_s3 }
  0x38   :  { %p10239_p12 = pnand %p10237_p11, %p10234_p10 }
  0x3a   :  { %10242 = shalt.err (!%p10239_p12)
}
  0x3b   :  { %s10243_s23 = scalar_lea.vmem %s10369_s28, 8192  ;;  %p10248_p0 = scmp.lt.s32.totalorder %s10369_s28, %s10369_s28 }
  0x3c   :  { %p10244_p13 = scmp.ne.s32.totalorder %s10369_s28, %s10243_s23  ;;  %p10249_p1 = scmp.lt.s32.totalorder %s10243_s23, %s10243_s23 }
  0x3e   :  { %p10250_p2 = por %p10249_p1, %p10248_p0 }
  0x40   :  { %p10251_p3 = pnand %p10250_p2, %p10244_p13 }
  0x42   :  { %10254 = shalt.err (!%p10251_p3)
}
  0x43   :  { %s10291_s1 = smov 128   ;;  %s10292_s9 = smov 8  }
  0x44   :  { %51 = dma.hbm_to_vmem [thread:$0]  %s10553_s3, 8192, %s10369_s28, [#allocation5], %s10291_s1, %s10291_s1, %s10292_s9  }
  0x45   :  { %s10293_s26 = smov [#allocation9]   ;;  %s10255_s7 = scalar_lea.hbm %s10555_s5, 1024 }
  0x46   :  { %s69_s27 = sshll.u32 %s10293_s26, 4  ;;  %p10256_p4 = scmp.ne.s32.totalorder %s10555_s5, %s10255_s7  ;;  %s70_s27 = int_to_ptr.vmem [resolvable:$true] %s69_s27 }
  0x47   :  { %p10259_p5 = scmp.lt.u32.totalorder %s10255_s7, %s10555_s5 }
  0x49   :  { %p10261_p6 = pnand %p10259_p5, %p10256_p4 }
  0x4b   :  { %10264 = shalt.err (!%p10261_p6)
}
  0x4c   :  { %s10265_s4 = scalar_lea.vmem %s70_s27, 1024  ;;  %p10270_p8 = scmp.lt.s32.totalorder %s70_s27, %s70_s27 }
  0x4d   :  { %p10266_p7 = scmp.ne.s32.totalorder %s70_s27, %s10265_s4  ;;  %p10271_p9 = scmp.lt.s32.totalorder %s10265_s4, %s10265_s4 }
  0x4f   :  { %p10272_p10 = por %p10271_p9, %p10270_p8 }
  0x51   :  { %p10273_p11 = pnand %p10272_p10, %p10266_p7 }
  0x53   :  { %10276 = shalt.err (!%p10273_p11)
}
  0x54   :  { %75 = dma.hbm_to_vmem [thread:$0]  %s10555_s5, 1024, %s70_s27, [#allocation8], %s10287_s2, %s10287_s2, %s10288_s21  }
  0x55   :  { %10277 = dma.done.wait [#allocation3], 98304  }
  0x56   :  { %10278 = vsyncadd [#allocation3], 4294868992 }
  0x57   :  { %10279 = dma.done.wait [#allocation5], 24576  }
  0x58   :  { %10280 = vsyncadd [#allocation5], 4294942720 }
  0x59   :  { %10281 = dma.done.wait [#allocation8], 3072  }
  0x5a   :  { %10282 = vsyncadd [#allocation8], 4294964224  ;;  %v8697_v0 = vld [vmem:[#allocation2 + $0x4] ss:$16 sps:$4 sm:$0xff]   ;;  %v8699_v1 = vld [vmem:[#allocation2 + $0xc] ss:$16 sps:$4 sm:$0xff]   ;;  %v108_v38 = vlaneseq }
  0x5b   :  { %4862 = vmatprep.subr.bf16.mxu0 %v8697_v0  ;;  %v8701_v2 = vld [vmem:[#allocation2] ss:$16 sps:$4 sm:$0xff]   ;;  %v8702_v3 = vld [vmem:[#allocation2 + $0x8] ss:$16 sps:$4 sm:$0xff]   ;;  %5354 = vmatprep.subr.bf16.mxu1 %v8699_v1  ;;  %v8703_v4 = vld [vmem:[#allocation2 + $0x24] ss:$16 sps:$4 sm:$0xff]  }
  0x5c   :  { %4863 = vmatpush1.bf16.msra.mxu0 %v8701_v2  ;;  %5355 = vmatpush1.bf16.msra.mxu1 %v8702_v3  ;;  %v8705_v5 = vld [vmem:[#allocation2 + $0x2c] ss:$16 sps:$4 sm:$0xff]   ;;  %v8707_v6 = vld [vmem:[#allocation2 + $0x20] ss:$16 sps:$4 sm:$0xff]   ;;  %v8708_v7 = vld [vmem:[#allocation2 + $0x28] ss:$16 sps:$4 sm:$0xff]  }
  0x5d   :  { %4864 = vmatprep.subr.bf16.mxu0 %v8703_v4  ;;  %5356 = vmatprep.subr.bf16.mxu1 %v8705_v5  ;;  %v8709_v8 = vld [vmem:[#allocation2 + $0x44] ss:$16 sps:$4 sm:$0xff]   ;;  %v8711_v9 = vld [vmem:[#allocation2 + $0x4c] ss:$16 sps:$4 sm:$0xff]   ;;  %v8713_v10 = vld [vmem:[#allocation2 + $0x40] ss:$16 sps:$4 sm:$0xff]  }
  0x5e   :  { %v8714_v11 = vld [vmem:[#allocation2 + $0x48] ss:$16 sps:$4 sm:$0xff]   ;;  %v8715_v12 = vld [vmem:[#allocation2 + $0x64] ss:$16 sps:$4 sm:$0xff]   ;;  %v8717_v13 = vld [vmem:[#allocation2 + $0x6c] ss:$16 sps:$4 sm:$0xff]  }
  0x5f   :  { %v8719_v14 = vld [vmem:[#allocation2 + $0x60] ss:$16 sps:$4 sm:$0xff]   ;;  %v8720_v15 = vld [vmem:[#allocation2 + $0x68] ss:$16 sps:$4 sm:$0xff]   ;;  %v8721_v16 = vld [vmem:[#allocation2 + $0x84] ss:$16 sps:$4 sm:$0xff]  }
  0x60   :  { %4865 = vmatpush1.bf16.msra.mxu0 %v8707_v6  ;;  %5357 = vmatpush1.bf16.msra.mxu1 %v8708_v7  ;;  %v8723_v17 = vld [vmem:[#allocation2 + $0x8c] ss:$16 sps:$4 sm:$0xff]   ;;  %v8725_v18 = vld [vmem:[#allocation2 + $0x80] ss:$16 sps:$4 sm:$0xff]   ;;  %v8726_v19 = vld [vmem:[#allocation2 + $0x88] ss:$16 sps:$4 sm:$0xff]  }
  0x61   :  { %4866 = vmatprep.subr.bf16.mxu0 %v8709_v8  ;;  %5358 = vmatprep.subr.bf16.mxu1 %v8711_v9  ;;  %v8727_v20 = vld [vmem:[#allocation2 + $0xa4] ss:$16 sps:$4 sm:$0xff]   ;;  %v8729_v21 = vld [vmem:[#allocation2 + $0xac] ss:$16 sps:$4 sm:$0xff]   ;;  %v8731_v22 = vld [vmem:[#allocation2 + $0xa0] ss:$16 sps:$4 sm:$0xff]  }
  0x62   :  { %v8732_v23 = vld [vmem:[#allocation2 + $0xa8] ss:$16 sps:$4 sm:$0xff]   ;;  %v8733_v24 = vld [vmem:[#allocation2 + $0xc4] ss:$16 sps:$4 sm:$0xff]   ;;  %v8735_v25 = vld [vmem:[#allocation2 + $0xcc] ss:$16 sps:$4 sm:$0xff]  }
  0x63   :  { %v8737_v26 = vld [vmem:[#allocation2 + $0xc0] ss:$16 sps:$4 sm:$0xff]   ;;  %v8738_v27 = vld [vmem:[#allocation2 + $0xc8] ss:$16 sps:$4 sm:$0xff]   ;;  %v8739_v28 = vld [vmem:[#allocation2 + $0xe4] ss:$16 sps:$4 sm:$0xff]  }
  0x64   :  { %4867 = vmatpush1.bf16.msra.mxu0 %v8713_v10  ;;  %5359 = vmatpush1.bf16.msra.mxu1 %v8714_v11  ;;  %v8741_v29 = vld [vmem:[#allocation2 + $0xec] ss:$16 sps:$4 sm:$0xff]   ;;  %v8743_v30 = vld [vmem:[#allocation2 + $0xe0] ss:$16 sps:$4 sm:$0xff]   ;;  %v8744_v31 = vld [vmem:[#allocation2 + $0xe8] ss:$16 sps:$4 sm:$0xff]  }
  0x65   :  { %4868 = vmatprep.subr.bf16.mxu0 %v8715_v12  ;;  %5360 = vmatprep.subr.bf16.mxu1 %v8717_v13  ;;  %v8745_v32 = vld [vmem:[#allocation2 + $0x104] ss:$16 sps:$4 sm:$0xff]   ;;  %v8747_v33 = vld [vmem:[#allocation2 + $0x10c] ss:$16 sps:$4 sm:$0xff]   ;;  %v8749_v34 = vld [vmem:[#allocation2 + $0x100] ss:$16 sps:$4 sm:$0xff]  }
  0x66   :  { %v8750_v35 = vld [vmem:[#allocation2 + $0x108] ss:$16 sps:$4 sm:$0xff]   ;;  %v10294_v36 = vmov 1983009808   ;;  %v8751_v39 = vld [vmem:[#allocation2 + $0x124] ss:$16 sps:$4 sm:$0xff]  }
  0x67   :  { %v106_v37 = vunpack.c.l.s4 %v10294_v36  ;;  %v8753_v40 = vld [vmem:[#allocation2 + $0x12c] ss:$16 sps:$4 sm:$0xff]   ;;  %v8755_v41 = vld [vmem:[#allocation2 + $0x120] ss:$16 sps:$4 sm:$0xff]   ;;  %v109_v43 = vshrl.u32 %v108_v38, 7  ;;  %vm10296_vm0 = vmmov 0  }
  0x68   :  { %4869 = vmatpush1.bf16.msra.mxu0 %v8719_v14  ;;  %5361 = vmatpush1.bf16.msra.mxu1 %v8720_v15  ;;  %v8756_v44 = vld [vmem:[#allocation2 + $0x128] ss:$16 sps:$4 sm:$0xff]   ;;  %v8757_v45 = vld [vmem:[#allocation2 + $0x144] ss:$16 sps:$4 sm:$0xff]   ;;  %v8759_v46 = vld [vmem:[#allocation2 + $0x14c] ss:$16 sps:$4 sm:$0xff]  }
  0x69   :  { %4870 = vmatprep.subr.bf16.mxu0 %v8721_v16  ;;  %5362 = vmatprep.subr.bf16.mxu1 %v8723_v17  ;;  %v107_v42 = vunpack.c.0.s8 %v106_v37  ;;  %v8761_v47 = vld [vmem:[#allocation2 + $0x140] ss:$16 sps:$4 sm:$0xff]   ;;  %v8762_v48 = vld [vmem:[#allocation2 + $0x148] ss:$16 sps:$4 sm:$0xff]   ;;  %v8763_v50 = vld [vmem:[#allocation2 + $0x164] ss:$16 sps:$4 sm:$0xff]  }
  0x6a   :  { %v8765_v51 = vld [vmem:[#allocation2 + $0x16c] ss:$16 sps:$4 sm:$0xff]   ;;  %v92_v52 = vld [vmem:[%s10550_s0] sm:$0xff]  ;;  %v8768_v55 = vld [vmem:[#allocation2 + $0x168] ss:$16 sps:$4 sm:$0xff]  }
  0x6b   :  { %v10418_v49 = vsub.s32 %v107_v42, %v109_v43  ;;  %v8767_v53 = vld [vmem:[#allocation2 + $0x160] ss:$16 sps:$4 sm:$0xff]   ;;  %v8769_v56 = vld [vmem:[#allocation2 + $0x184] ss:$16 sps:$4 sm:$0xff]   ;;  %v8771_v57 = vld [vmem:[#allocation2 + $0x18c] ss:$16 sps:$4 sm:$0xff]   ;;  %v104_v4 = vcombine.high %v92_v52, %v92_v52 }
  0x6c   :  { %4871 = vmatpush1.bf16.msra.mxu0 %v8725_v18  ;;  %5363 = vmatpush1.bf16.msra.mxu1 %v8726_v19  ;;  %v8773_v59 = vld [vmem:[#allocation2 + $0x180] ss:$16 sps:$4 sm:$0xff]   ;;  %v8774_v61 = vld [vmem:[#allocation2 + $0x188] ss:$16 sps:$4 sm:$0xff]   ;;  %v8775_v62 = vld [vmem:[#allocation2 + $0x1a4] ss:$16 sps:$4 sm:$0xff]  }
  0x6d   :  { %4872 = vmatprep.subr.bf16.mxu0 %v8727_v20  ;;  %5364 = vmatprep.subr.bf16.mxu1 %v8729_v21  ;;  %v111_v54 = vrot.slane %v92_v52, %v10418_v49  ;;  %v8777_v63 = vld [vmem:[#allocation2 + $0x1ac] ss:$16 sps:$4 sm:$0xff]   ;;  %v8779_v0 = vld [vmem:[#allocation2 + $0x1a0] ss:$16 sps:$4 sm:$0xff]   ;;  %v8780_v1 = vld [vmem:[#allocation2 + $0x1a8] ss:$16 sps:$4 sm:$0xff]   ;;  %v10425_v9 = vrot.slane %v104_v4, %v10418_v49 }
  0x6e   :  { %v8781_v2 = vld [vmem:[#allocation2 + $0x1c4] ss:$16 sps:$4 sm:$0xff]   ;;  %v8783_v3 = vld [vmem:[#allocation2 + $0x1cc] ss:$16 sps:$4 sm:$0xff]   ;;  %v8785_v5 = vld [vmem:[#allocation2 + $0x1c0] ss:$16 sps:$4 sm:$0xff]  }
  0x6f   :  { %v119_v58 = vcombine.high %v111_v54, %v111_v54  ;;  %v8786_v6 = vld [vmem:[#allocation2 + $0x1c8] ss:$16 sps:$4 sm:$0xff]   ;;  %v8787_v7 = vld [vmem:[#allocation2 + $0x1e4] ss:$16 sps:$4 sm:$0xff]   ;;  %v8789_v8 = vld [vmem:[#allocation2 + $0x1ec] ss:$16 sps:$4 sm:$0xff]   ;;  %v120_v14 = vcombine.high %v10425_v9, %v10425_v9  ;;  %v230_v16 = vpack.c.bf16 %v111_v54, %v111_v54 }
  0x70   :  { %4873 = vmatpush1.bf16.msra.mxu0 %v8731_v22  ;;  %5365 = vmatpush1.bf16.msra.mxu1 %v8732_v23  ;;  %v8791_v10 = vld [vmem:[#allocation2 + $0x1e0] ss:$16 sps:$4 sm:$0xff]   ;;  %v8792_v11 = vld [vmem:[#allocation2 + $0x1e8] ss:$16 sps:$4 sm:$0xff]   ;;  %v8796_v12 = vld [vmem:[#allocation2 + $0x204] ss:$16 sps:$4 sm:$0xff]  }
  0x71   :  { %4874 = vmatprep.subr.bf16.mxu0 %v8733_v24  ;;  %5366 = vmatprep.subr.bf16.mxu1 %v8735_v25  ;;  %v231_v60 = vpack.c.bf16 %v119_v58, %v119_v58  ;;  %v8799_v13 = vld [vmem:[#allocation2 + $0x20c] ss:$16 sps:$4 sm:$0xff]   ;;  %v8794_v15 = vld [vmem:[#allocation2 + $0x200] ss:$16 sps:$4 sm:$0xff]   ;;  %v8797_v17 = vld [vmem:[#allocation2 + $0x208] ss:$16 sps:$4 sm:$0xff]   ;;  %v233_v20 = vpack.c.bf16 %v120_v14, %v120_v14 }
  0x72   :  { %v8802_v18 = vld [vmem:[#allocation2 + $0x224] ss:$16 sps:$4 sm:$0xff]   ;;  %v8805_v19 = vld [vmem:[#allocation2 + $0x22c] ss:$16 sps:$4 sm:$0xff]   ;;  %v8800_v21 = vld [vmem:[#allocation2 + $0x220] ss:$16 sps:$4 sm:$0xff]  }
  0x73   :  { %4894 = vmatprep.mubr.bf16.mxu0 %v231_v60  ;;  %5386 = vmatprep.mubr.bf16.mxu1 %v231_v60  ;;  %v8803_v22 = vld [vmem:[#allocation2 + $0x228] ss:$16 sps:$4 sm:$0xff]   ;;  %v8808_v23 = vld [vmem:[#allocation2 + $0x244] ss:$16 sps:$4 sm:$0xff]   ;;  %v8811_v24 = vld [vmem:[#allocation2 + $0x24c] ss:$16 sps:$4 sm:$0xff]  }
  0x74   :  { %4875 = vmatpush1.bf16.msra.mxu0 %v8737_v26  ;;  %5367 = vmatpush1.bf16.msra.mxu1 %v8738_v27  ;;  %v8806_v25 = vld [vmem:[#allocation2 + $0x240] ss:$16 sps:$4 sm:$0xff]   ;;  %v8809_v26 = vld [vmem:[#allocation2 + $0x248] ss:$16 sps:$4 sm:$0xff]   ;;  %v8814_v27 = vld [vmem:[#allocation2 + $0x264] ss:$16 sps:$4 sm:$0xff]  }
  0x75   :  { %4876 = vmatprep.subr.bf16.mxu0 %v8739_v28  ;;  %5368 = vmatprep.subr.bf16.mxu1 %v8741_v29  ;;  %v8817_v28 = vld [vmem:[#allocation2 + $0x26c] ss:$16 sps:$4 sm:$0xff]   ;;  %v8812_v29 = vld [vmem:[#allocation2 + $0x260] ss:$16 sps:$4 sm:$0xff]   ;;  %v8827_v38 = vld [vmem:[#allocation2 + $0x2a8] ss:$16 sps:$4 sm:$0xff]  }
  0x76   :  { %v8829_v36 = vld [vmem:[#allocation2 + $0x2ac] ss:$16 sps:$4 sm:$0xff]   ;;  %v8824_v37 = vld [vmem:[#allocation2 + $0x2a0] ss:$16 sps:$4 sm:$0xff]   ;;  %v8833_v42 = vld [vmem:[#allocation2 + $0x2c8] ss:$16 sps:$4 sm:$0xff]  }
  0x77   :  { %v8838_v43 = vld [vmem:[#allocation2 + $0x2e4] ss:$16 sps:$4 sm:$0xff]   ;;  %v8848_v54 = vld [vmem:[#allocation2 + $0x320] ss:$16 sps:$4 sm:$0xff]   ;;  %v8889_v14 = vld [vmem:[#allocation2 + $0x3ec] ss:$16 sps:$4 sm:$0xff]  }
  0x78   :  { %4877 = vmatpush1.bf16.msra.mxu0 %v8743_v30  ;;  %5369 = vmatpush1.bf16.msra.mxu1 %v8744_v31  ;;  %v8815_v30 = vld [vmem:[#allocation2 + $0x268] ss:$16 sps:$4 sm:$0xff]   ;;  %v8820_v31 = vld [vmem:[#allocation2 + $0x284] ss:$16 sps:$4 sm:$0xff]   ;;  %v8854_v58 = vld [vmem:[#allocation2 + $0x340] ss:$16 sps:$4 sm:$0xff]  }
  0x79   :  { %4878 = vmatprep.subr.bf16.mxu0 %v8745_v32  ;;  %5370 = vmatprep.subr.bf16.mxu1 %v8747_v33  ;;  %v8823_v32 = vld [vmem:[#allocation2 + $0x28c] ss:$16 sps:$4 sm:$0xff]   ;;  %v8818_v33 = vld [vmem:[#allocation2 + $0x280] ss:$16 sps:$4 sm:$0xff]   ;;  %v8850_v52 = vld [vmem:[#allocation2 + $0x324] ss:$16 sps:$4 sm:$0xff]  }
  0x7a   :  { %v8862_v60 = vld [vmem:[#allocation2 + $0x364] ss:$16 sps:$4 sm:$0xff]  }
  0x7b   :  { %v8874_v4 = vld [vmem:[#allocation2 + $0x3a4] ss:$16 sps:$4 sm:$0xff]  }
  0x7c   :  { %4879 = vmatpush1.bf16.msra.mxu0 %v8749_v34  ;;  %5371 = vmatpush1.bf16.msra.mxu1 %v8750_v35  ;;  %v8821_v34 = vld [vmem:[#allocation2 + $0x288] ss:$16 sps:$4 sm:$0xff]   ;;  %v8826_v35 = vld [vmem:[#allocation2 + $0x2a4] ss:$16 sps:$4 sm:$0xff]  }
  0x7d   :  { %4880 = vmatprep.subr.bf16.mxu0 %v8751_v39  ;;  %5372 = vmatprep.subr.bf16.mxu1 %v8753_v40  ;;  %v8832_v39 = vld [vmem:[#allocation2 + $0x2c4] ss:$16 sps:$4 sm:$0xff]   ;;  %v8835_v40 = vld [vmem:[#allocation2 + $0x2cc] ss:$16 sps:$4 sm:$0xff]  }
  0x80   :  { %4881 = vmatpush1.bf16.msra.mxu0 %v8755_v41  ;;  %5373 = vmatpush1.bf16.msra.mxu1 %v8756_v44  ;;  %v8830_v41 = vld [vmem:[#allocation2 + $0x2c0] ss:$16 sps:$4 sm:$0xff]   ;;  %v8841_v44 = vld [vmem:[#allocation2 + $0x2ec] ss:$16 sps:$4 sm:$0xff]  }
  0x81   :  { %4882 = vmatprep.subr.bf16.mxu0 %v8757_v45  ;;  %5374 = vmatprep.subr.bf16.mxu1 %v8759_v46  ;;  %v8836_v45 = vld [vmem:[#allocation2 + $0x2e0] ss:$16 sps:$4 sm:$0xff]   ;;  %v8839_v46 = vld [vmem:[#allocation2 + $0x2e8] ss:$16 sps:$4 sm:$0xff]  }
  0x84   :  { %4883 = vmatpush1.bf16.msra.mxu0 %v8761_v47  ;;  %5375 = vmatpush1.bf16.msra.mxu1 %v8762_v48  ;;  %v8844_v47 = vld [vmem:[#allocation2 + $0x304] ss:$16 sps:$4 sm:$0xff]   ;;  %v8847_v48 = vld [vmem:[#allocation2 + $0x30c] ss:$16 sps:$4 sm:$0xff]  }
  0x85   :  { %4884 = vmatprep.subr.bf16.mxu0 %v8763_v50  ;;  %5376 = vmatprep.subr.bf16.mxu1 %v8765_v51  ;;  %v8842_v50 = vld [vmem:[#allocation2 + $0x300] ss:$16 sps:$4 sm:$0xff]   ;;  %v8845_v51 = vld [vmem:[#allocation2 + $0x308] ss:$16 sps:$4 sm:$0xff]  }
  0x88   :  { %4885 = vmatpush1.bf16.msra.mxu0 %v8767_v53  ;;  %5377 = vmatpush1.bf16.msra.mxu1 %v8768_v55  ;;  %v8853_v53 = vld [vmem:[#allocation2 + $0x32c] ss:$16 sps:$4 sm:$0xff]   ;;  %v8851_v55 = vld [vmem:[#allocation2 + $0x328] ss:$16 sps:$4 sm:$0xff]  }
  0x89   :  { %4886 = vmatprep.subr.bf16.mxu0 %v8769_v56  ;;  %5378 = vmatprep.subr.bf16.mxu1 %v8771_v57  ;;  %v8856_v56 = vld [vmem:[#allocation2 + $0x344] ss:$16 sps:$4 sm:$0xff]   ;;  %v8859_v57 = vld [vmem:[#allocation2 + $0x34c] ss:$16 sps:$4 sm:$0xff]  }
  0x8c   :  { %4887 = vmatpush1.bf16.msra.mxu0 %v8773_v59  ;;  %5379 = vmatpush1.bf16.msra.mxu1 %v8774_v61  ;;  %v8857_v59 = vld [vmem:[#allocation2 + $0x348] ss:$16 sps:$4 sm:$0xff]   ;;  %v8865_v61 = vld [vmem:[#allocation2 + $0x36c] ss:$16 sps:$4 sm:$0xff]  }
  0x8d   :  { %4888 = vmatprep.subr.bf16.mxu0 %v8775_v62  ;;  %5380 = vmatprep.subr.bf16.mxu1 %v8777_v63  ;;  %v8860_v62 = vld [vmem:[#allocation2 + $0x360] ss:$16 sps:$4 sm:$0xff]   ;;  %v8863_v63 = vld [vmem:[#allocation2 + $0x368] ss:$16 sps:$4 sm:$0xff]  }
  0x90   :  { %4889 = vmatpush1.bf16.msra.mxu0 %v8779_v0  ;;  %5381 = vmatpush1.bf16.msra.mxu1 %v8780_v1  ;;  %v8868_v0 = vld [vmem:[#allocation2 + $0x384] ss:$16 sps:$4 sm:$0xff]   ;;  %v8871_v1 = vld [vmem:[#allocation2 + $0x38c] ss:$16 sps:$4 sm:$0xff]  }
  0x91   :  { %4890 = vmatprep.subr.bf16.mxu0 %v8781_v2  ;;  %5382 = vmatprep.subr.bf16.mxu1 %v8783_v3  ;;  %v8866_v2 = vld [vmem:[#allocation2 + $0x380] ss:$16 sps:$4 sm:$0xff]   ;;  %v8869_v3 = vld [vmem:[#allocation2 + $0x388] ss:$16 sps:$4 sm:$0xff]  }
  0x94   :  { %4891 = vmatpush1.bf16.msra.mxu0 %v8785_v5  ;;  %5383 = vmatpush1.bf16.msra.mxu1 %v8786_v6  ;;  %v8877_v5 = vld [vmem:[#allocation2 + $0x3ac] ss:$16 sps:$4 sm:$0xff]   ;;  %v8872_v6 = vld [vmem:[#allocation2 + $0x3a0] ss:$16 sps:$4 sm:$0xff]  }
  0x95   :  { %4892 = vmatprep.subr.bf16.mxu0 %v8787_v7  ;;  %5384 = vmatprep.subr.bf16.mxu1 %v8789_v8  ;;  %v8875_v7 = vld [vmem:[#allocation2 + $0x3a8] ss:$16 sps:$4 sm:$0xff]   ;;  %v8880_v8 = vld [vmem:[#allocation2 + $0x3c4] ss:$16 sps:$4 sm:$0xff]  }
  0x98   :  { %4893 = vmatpush1.bf16.msra.mxu0 %v8791_v10  ;;  %5385 = vmatpush1.bf16.msra.mxu1 %v8792_v11  ;;  %v8883_v10 = vld [vmem:[#allocation2 + $0x3cc] ss:$16 sps:$4 sm:$0xff]   ;;  %v8878_v11 = vld [vmem:[#allocation2 + $0x3c0] ss:$16 sps:$4 sm:$0xff]  }
  0x99   :  { %4903 = vmatprep.subr.bf16.mxu0 %v8796_v12  ;;  %5395 = vmatprep.subr.bf16.mxu1 %v8799_v13  ;;  %v8881_v12 = vld [vmem:[#allocation2 + $0x3c8] ss:$16 sps:$4 sm:$0xff]   ;;  %v8886_v13 = vld [vmem:[#allocation2 + $0x3e4] ss:$16 sps:$4 sm:$0xff]  }
  0x9b   :  { %4895 = vmatmul.mubr.bf16.vlgmr.msra.gmra.mrb[0].mxu0 %v230_v16  ;;  %5387 = vmatmul.mubr.bf16.vlgmr.msra.gmra.mrb[0].mxu1 %v230_v16  ;;  %v8887_v16 = vld [vmem:[#allocation2 + $0x3e8] ss:$16 sps:$4 sm:$0xff]  }
  0x9c   :  { %4904 = vmatpush1.bf16.msra.mxu0 %v8794_v15  ;;  %5396 = vmatpush1.bf16.msra.mxu1 %v8797_v17  ;;  %v8884_v15 = vld [vmem:[#allocation2 + $0x3e0] ss:$16 sps:$4 sm:$0xff]   ;;  %v8892_v17 = vld [vmem:[#allocation2 + $0x404] ss:$16 sps:$4 sm:$0xff]  }
  0x9d   :  { %4905 = vmatprep.subr.bf16.mxu0 %v8802_v18  ;;  %5397 = vmatprep.subr.bf16.mxu1 %v8805_v19  ;;  %v8895_v18 = vld [vmem:[#allocation2 + $0x40c] ss:$16 sps:$4 sm:$0xff]   ;;  %v8890_v19 = vld [vmem:[#allocation2 + $0x400] ss:$16 sps:$4 sm:$0xff]  }
  0x9e   :  { %4935 = vmatprep.mubr.bf16.mxu0 %v233_v20  ;;  %5427 = vmatprep.mubr.bf16.mxu1 %v233_v20  ;;  %v232_v20 = vpack.c.bf16 %v10425_v9, %v10425_v9 }
  0xa0   :  { %4906 = vmatpush1.bf16.msra.mxu0 %v8800_v21  ;;  %5398 = vmatpush1.bf16.msra.mxu1 %v8803_v22  ;;  %v8893_v21 = vld [vmem:[#allocation2 + $0x408] ss:$16 sps:$4 sm:$0xff]  }
  0xa1   :  { %4907 = vmatprep.subr.bf16.mxu0 %v8808_v23  ;;  %5399 = vmatprep.subr.bf16.mxu1 %v8811_v24  ;;  %v10434_v22 = vld [vmem:[%s10550_s0 + $0x8] sm:$0xff]  ;;  %v8898_v23 = vld [vmem:[#allocation2 + $0x424] ss:$16 sps:$4 sm:$0xff]  }
  0xa2   :  { %v8901_v24 = vld [vmem:[#allocation2 + $0x42c] ss:$16 sps:$4 sm:$0xff]  }
  0xa4   :  { %4908 = vmatpush1.bf16.msra.mxu0 %v8806_v25  ;;  %5400 = vmatpush1.bf16.msra.mxu1 %v8809_v26  ;;  %v10438_v25 = vrot.slane %v10434_v22, %v10418_v49  ;;  %v8896_v26 = vld [vmem:[#allocation2 + $0x420] ss:$16 sps:$4 sm:$0xff]  }
  0xa5   :  { %4909 = vmatprep.subr.bf16.mxu0 %v8814_v27  ;;  %5401 = vmatprep.subr.bf16.mxu1 %v8817_v28  ;;  %v8899_v27 = vld [vmem:[#allocation2 + $0x428] ss:$16 sps:$4 sm:$0xff]   ;;  %v8904_v28 = vld [vmem:[#allocation2 + $0x444] ss:$16 sps:$4 sm:$0xff]  }
  0xa6   :  { %v136_v9 = vcombine.high %v10438_v25, %v10438_v25 }
  0xa8   :  { %4910 = vmatpush1.bf16.msra.mxu0 %v8812_v29  ;;  %5402 = vmatpush1.bf16.msra.mxu1 %v8815_v30  ;;  %v8907_v29 = vld [vmem:[#allocation2 + $0x44c] ss:$16 sps:$4 sm:$0xff]   ;;  %v235_v30 = vpack.c.bf16 %v136_v9, %v136_v9  ;;  %v8983_v9 = vld [vmem:[#allocation2 + $0x5e8] ss:$16 sps:$4 sm:$0xff]  }
  0xa9   :  { %4911 = vmatprep.subr.bf16.mxu0 %v8820_v31  ;;  %5403 = vmatprep.subr.bf16.mxu1 %v8823_v32  ;;  %v8902_v31 = vld [vmem:[#allocation2 + $0x440] ss:$16 sps:$4 sm:$0xff]   ;;  %v8905_v32 = vld [vmem:[#allocation2 + $0x448] ss:$16 sps:$4 sm:$0xff]  }
  0xac   :  { %4912 = vmatpush1.bf16.msra.mxu0 %v8818_v33  ;;  %5404 = vmatpush1.bf16.msra.mxu1 %v8821_v34  ;;  %v8910_v33 = vld [vmem:[#allocation2 + $0x464] ss:$16 sps:$4 sm:$0xff]   ;;  %v8913_v34 = vld [vmem:[#allocation2 + $0x46c] ss:$16 sps:$4 sm:$0xff]  }
  0xad   :  { %4913 = vmatprep.subr.bf16.mxu0 %v8826_v35  ;;  %5405 = vmatprep.subr.bf16.mxu1 %v8829_v36  ;;  %v8908_v35 = vld [vmem:[#allocation2 + $0x460] ss:$16 sps:$4 sm:$0xff]   ;;  %v8911_v36 = vld [vmem:[#allocation2 + $0x468] ss:$16 sps:$4 sm:$0xff]  }
  0xb0   :  { %4914 = vmatpush1.bf16.msra.mxu0 %v8824_v37  ;;  %5406 = vmatpush1.bf16.msra.mxu1 %v8827_v38  ;;  %v8916_v37 = vld [vmem:[#allocation2 + $0x484] ss:$16 sps:$4 sm:$0xff]   ;;  %v8919_v38 = vld [vmem:[#allocation2 + $0x48c] ss:$16 sps:$4 sm:$0xff]  }
  0xb1   :  { %4915 = vmatprep.subr.bf16.mxu0 %v8832_v39  ;;  %5407 = vmatprep.subr.bf16.mxu1 %v8835_v40  ;;  %v8914_v39 = vld [vmem:[#allocation2 + $0x480] ss:$16 sps:$4 sm:$0xff]   ;;  %v8917_v40 = vld [vmem:[#allocation2 + $0x488] ss:$16 sps:$4 sm:$0xff]  }
  0xb4   :  { %4916 = vmatpush1.bf16.msra.mxu0 %v8830_v41  ;;  %5408 = vmatpush1.bf16.msra.mxu1 %v8833_v42  ;;  %v8922_v41 = vld [vmem:[#allocation2 + $0x4a4] ss:$16 sps:$4 sm:$0xff]   ;;  %v8925_v42 = vld [vmem:[#allocation2 + $0x4ac] ss:$16 sps:$4 sm:$0xff]  }
  0xb5   :  { %4917 = vmatprep.subr.bf16.mxu0 %v8838_v43  ;;  %5409 = vmatprep.subr.bf16.mxu1 %v8841_v44  ;;  %v8920_v43 = vld [vmem:[#allocation2 + $0x4a0] ss:$16 sps:$4 sm:$0xff]   ;;  %v8923_v44 = vld [vmem:[#allocation2 + $0x4a8] ss:$16 sps:$4 sm:$0xff]  }
  0xb8   :  { %4918 = vmatpush1.bf16.msra.mxu0 %v8836_v45  ;;  %5410 = vmatpush1.bf16.msra.mxu1 %v8839_v46  ;;  %v8928_v45 = vld [vmem:[#allocation2 + $0x4c4] ss:$16 sps:$4 sm:$0xff]   ;;  %v8931_v46 = vld [vmem:[#allocation2 + $0x4cc] ss:$16 sps:$4 sm:$0xff]  }
  0xb9   :  { %4919 = vmatprep.subr.bf16.mxu0 %v8844_v47  ;;  %5411 = vmatprep.subr.bf16.mxu1 %v8847_v48  ;;  %v8926_v47 = vld [vmem:[#allocation2 + $0x4c0] ss:$16 sps:$4 sm:$0xff]   ;;  %v8929_v48 = vld [vmem:[#allocation2 + $0x4c8] ss:$16 sps:$4 sm:$0xff]  }
  0xbc   :  { %4920 = vmatpush1.bf16.msra.mxu0 %v8842_v50  ;;  %5412 = vmatpush1.bf16.msra.mxu1 %v8845_v51  ;;  %v8934_v50 = vld [vmem:[#allocation2 + $0x4e4] ss:$16 sps:$4 sm:$0xff]   ;;  %v8937_v51 = vld [vmem:[#allocation2 + $0x4ec] ss:$16 sps:$4 sm:$0xff]  }
  0xbd   :  { %4921 = vmatprep.subr.bf16.mxu0 %v8850_v52  ;;  %5413 = vmatprep.subr.bf16.mxu1 %v8853_v53  ;;  %v8932_v52 = vld [vmem:[#allocation2 + $0x4e0] ss:$16 sps:$4 sm:$0xff]   ;;  %v8935_v53 = vld [vmem:[#allocation2 + $0x4e8] ss:$16 sps:$4 sm:$0xff]  }
  0xc0   :  { %4922 = vmatpush1.bf16.msra.mxu0 %v8848_v54  ;;  %5414 = vmatpush1.bf16.msra.mxu1 %v8851_v55  ;;  %v8940_v54 = vld [vmem:[#allocation2 + $0x504] ss:$16 sps:$4 sm:$0xff]   ;;  %v8943_v55 = vld [vmem:[#allocation2 + $0x50c] ss:$16 sps:$4 sm:$0xff]  }
  0xc1   :  { %4923 = vmatprep.subr.bf16.mxu0 %v8856_v56  ;;  %5415 = vmatprep.subr.bf16.mxu1 %v8859_v57  ;;  %v8938_v56 = vld [vmem:[#allocation2 + $0x500] ss:$16 sps:$4 sm:$0xff]   ;;  %v8941_v57 = vld [vmem:[#allocation2 + $0x508] ss:$16 sps:$4 sm:$0xff]  }
  0xc4   :  { %4924 = vmatpush1.bf16.msra.mxu0 %v8854_v58  ;;  %5416 = vmatpush1.bf16.msra.mxu1 %v8857_v59  ;;  %v8946_v58 = vld [vmem:[#allocation2 + $0x524] ss:$16 sps:$4 sm:$0xff]   ;;  %v8949_v59 = vld [vmem:[#allocation2 + $0x52c] ss:$16 sps:$4 sm:$0xff]  }
  0xc5   :  { %4925 = vmatprep.subr.bf16.mxu0 %v8862_v60  ;;  %5417 = vmatprep.subr.bf16.mxu1 %v8865_v61  ;;  %v8944_v60 = vld [vmem:[#allocation2 + $0x520] ss:$16 sps:$4 sm:$0xff]   ;;  %v8947_v61 = vld [vmem:[#allocation2 + $0x528] ss:$16 sps:$4 sm:$0xff]  }
  0xc8   :  { %4926 = vmatpush1.bf16.msra.mxu0 %v8860_v62  ;;  %5418 = vmatpush1.bf16.msra.mxu1 %v8863_v63  ;;  %v8952_v62 = vld [vmem:[#allocation2 + $0x544] ss:$16 sps:$4 sm:$0xff]   ;;  %v8955_v63 = vld [vmem:[#allocation2 + $0x54c] ss:$16 sps:$4 sm:$0xff]  }
  0xc9   :  { %4927 = vmatprep.subr.bf16.mxu0 %v8868_v0  ;;  %5419 = vmatprep.subr.bf16.mxu1 %v8871_v1  ;;  %v8950_v0 = vld [vmem:[#allocation2 + $0x540] ss:$16 sps:$4 sm:$0xff]   ;;  %v8953_v1 = vld [vmem:[#allocation2 + $0x548] ss:$16 sps:$4 sm:$0xff]  }
  0xcc   :  { %4928 = vmatpush1.bf16.msra.mxu0 %v8866_v2  ;;  %5420 = vmatpush1.bf16.msra.mxu1 %v8869_v3  ;;  %v8958_v2 = vld [vmem:[#allocation2 + $0x564] ss:$16 sps:$4 sm:$0xff]   ;;  %v8961_v3 = vld [vmem:[#allocation2 + $0x56c] ss:$16 sps:$4 sm:$0xff]  }
  0xcd   :  { %4929 = vmatprep.subr.bf16.mxu0 %v8874_v4  ;;  %5421 = vmatprep.subr.bf16.mxu1 %v8877_v5  ;;  %v8956_v4 = vld [vmem:[#allocation2 + $0x560] ss:$16 sps:$4 sm:$0xff]   ;;  %v8959_v5 = vld [vmem:[#allocation2 + $0x568] ss:$16 sps:$4 sm:$0xff]  }
  0xd0   :  { %4930 = vmatpush1.bf16.msra.mxu0 %v8872_v6  ;;  %5422 = vmatpush1.bf16.msra.mxu1 %v8875_v7  ;;  %v8964_v6 = vld [vmem:[#allocation2 + $0x584] ss:$16 sps:$4 sm:$0xff]   ;;  %v8967_v7 = vld [vmem:[#allocation2 + $0x58c] ss:$16 sps:$4 sm:$0xff]  }
  0xd1   :  { %4931 = vmatprep.subr.bf16.mxu0 %v8880_v8  ;;  %5423 = vmatprep.subr.bf16.mxu1 %v8883_v10  ;;  %v8962_v8 = vld [vmem:[#allocation2 + $0x580] ss:$16 sps:$4 sm:$0xff]   ;;  %v8965_v10 = vld [vmem:[#allocation2 + $0x588] ss:$16 sps:$4 sm:$0xff]  }
  0xd4   :  { %4932 = vmatpush1.bf16.msra.mxu0 %v8878_v11  ;;  %5424 = vmatpush1.bf16.msra.mxu1 %v8881_v12  ;;  %v8970_v11 = vld [vmem:[#allocation2 + $0x5a4] ss:$16 sps:$4 sm:$0xff]   ;;  %v8973_v12 = vld [vmem:[#allocation2 + $0x5ac] ss:$16 sps:$4 sm:$0xff]  }
  0xd5   :  { %4933 = vmatprep.subr.bf16.mxu0 %v8886_v13  ;;  %5425 = vmatprep.subr.bf16.mxu1 %v8889_v14  ;;  %v8968_v13 = vld [vmem:[#allocation2 + $0x5a0] ss:$16 sps:$4 sm:$0xff]   ;;  %v8971_v14 = vld [vmem:[#allocation2 + $0x5a8] ss:$16 sps:$4 sm:$0xff]  }
  0xd8   :  { %4934 = vmatpush1.bf16.msra.mxu0 %v8884_v15  ;;  %5426 = vmatpush1.bf16.msra.mxu1 %v8887_v16  ;;  %v8976_v15 = vld [vmem:[#allocation2 + $0x5c4] ss:$16 sps:$4 sm:$0xff]   ;;  %v8979_v16 = vld [vmem:[#allocation2 + $0x5cc] ss:$16 sps:$4 sm:$0xff]  }
  0xd9   :  { %4944 = vmatprep.subr.bf16.mxu0 %v8892_v17  ;;  %5436 = vmatprep.subr.bf16.mxu1 %v8895_v18  ;;  %v121_v17 = vcombine.high %v10434_v22, %v10434_v22  ;;  %v8974_v18 = vld [vmem:[#allocation2 + $0x5c0] ss:$16 sps:$4 sm:$0xff]  }
  0xdb   :  { %4936 = vmatmul.mubr.bf16.vlgmr.msra.gmra.mrb[0].mxu0 %v232_v20  ;;  %5428 = vmatmul.mubr.bf16.vlgmr.msra.gmra.mrb[0].mxu1 %v232_v20  ;;  %v8982_v20 = vld [vmem:[#allocation2 + $0x5e4] ss:$16 sps:$4 sm:$0xff]  }
  0xdc   :  { %4945 = vmatpush1.bf16.msra.mxu0 %v8890_v19  ;;  %5437 = vmatpush1.bf16.msra.mxu1 %v8893_v21  ;;  %v8977_v19 = vld [vmem:[#allocation2 + $0x5c8] ss:$16 sps:$4 sm:$0xff]   ;;  %v8985_v21 = vld [vmem:[#allocation2 + $0x5ec] ss:$16 sps:$4 sm:$0xff]  }
  0xdd   :  { %4946 = vmatprep.subr.bf16.mxu0 %v8898_v23  ;;  %5438 = vmatprep.subr.bf16.mxu1 %v8901_v24  ;;  %v10445_v23 = vrot.slane %v121_v17, %v10418_v49  ;;  %v8980_v24 = vld [vmem:[#allocation2 + $0x5e0] ss:$16 sps:$4 sm:$0xff]   ;;  %v9066_v17 = vld [vmem:[#allocation2 + $0x7a4] ss:$16 sps:$4 sm:$0xff]  }
  0xde   :  { %4976 = vmatprep.mubr.bf16.mxu0 %v235_v30  ;;  %5468 = vmatprep.mubr.bf16.mxu1 %v235_v30  ;;  %v8989_v30 = vld [vmem:[#allocation2 + $0x608] ss:$16 sps:$4 sm:$0xff]  }
  0xdf   :  { %v137_v22 = vcombine.high %v10445_v23, %v10445_v23 }
  0xe0   :  { %4947 = vmatpush1.bf16.msra.mxu0 %v8896_v26  ;;  %5439 = vmatpush1.bf16.msra.mxu1 %v8899_v27  ;;  %v8988_v26 = vld [vmem:[#allocation2 + $0x604] ss:$16 sps:$4 sm:$0xff]   ;;  %v8991_v27 = vld [vmem:[#allocation2 + $0x60c] ss:$16 sps:$4 sm:$0xff]  }
  0xe1   :  { %4948 = vmatprep.subr.bf16.mxu0 %v8904_v28  ;;  %5440 = vmatprep.subr.bf16.mxu1 %v8907_v29  ;;  %v234_v28 = vpack.c.bf16 %v10438_v25, %v10438_v25  ;;  %v8986_v29 = vld [vmem:[#allocation2 + $0x600] ss:$16 sps:$4 sm:$0xff]  }
  0xe2   :  { %v8998_v25 = vld [vmem:[#allocation2 + $0x640] ss:$16 sps:$4 sm:$0xff]  }
  0xe4   :  { %4949 = vmatpush1.bf16.msra.mxu0 %v8902_v31  ;;  %5441 = vmatpush1.bf16.msra.mxu1 %v8905_v32  ;;  %v8994_v31 = vld [vmem:[#allocation2 + $0x624] ss:$16 sps:$4 sm:$0xff]   ;;  %v8997_v32 = vld [vmem:[#allocation2 + $0x62c] ss:$16 sps:$4 sm:$0xff]  }
  0xe5   :  { %4950 = vmatprep.subr.bf16.mxu0 %v8910_v33  ;;  %5442 = vmatprep.subr.bf16.mxu1 %v8913_v34  ;;  %v237_v33 = vpack.c.bf16 %v137_v22, %v137_v22  ;;  %v8992_v34 = vld [vmem:[#allocation2 + $0x620] ss:$16 sps:$4 sm:$0xff]   ;;  %v9078_v22 = vld [vmem:[#allocation2 + $0x7e4] ss:$16 sps:$4 sm:$0xff]  }
  0xe8   :  { %4951 = vmatpush1.bf16.msra.mxu0 %v8908_v35  ;;  %5443 = vmatpush1.bf16.msra.mxu1 %v8911_v36  ;;  %v8995_v35 = vld [vmem:[#allocation2 + $0x628] ss:$16 sps:$4 sm:$0xff]   ;;  %v9000_v36 = vld [vmem:[#allocation2 + $0x644] ss:$16 sps:$4 sm:$0xff]  }
  0xe9   :  { %4952 = vmatprep.subr.bf16.mxu0 %v8916_v37  ;;  %5444 = vmatprep.subr.bf16.mxu1 %v8919_v38  ;;  %v9003_v37 = vld [vmem:[#allocation2 + $0x64c] ss:$16 sps:$4 sm:$0xff]   ;;  %v9001_v38 = vld [vmem:[#allocation2 + $0x648] ss:$16 sps:$4 sm:$0xff]  }
  0xec   :  { %4953 = vmatpush1.bf16.msra.mxu0 %v8914_v39  ;;  %5445 = vmatpush1.bf16.msra.mxu1 %v8917_v40  ;;  %v9006_v39 = vld [vmem:[#allocation2 + $0x664] ss:$16 sps:$4 sm:$0xff]   ;;  %v9009_v40 = vld [vmem:[#allocation2 + $0x66c] ss:$16 sps:$4 sm:$0xff]  }
  0xed   :  { %4954 = vmatprep.subr.bf16.mxu0 %v8922_v41  ;;  %5446 = vmatprep.subr.bf16.mxu1 %v8925_v42  ;;  %v9004_v41 = vld [vmem:[#allocation2 + $0x660] ss:$16 sps:$4 sm:$0xff]   ;;  %v9007_v42 = vld [vmem:[#allocation2 + $0x668] ss:$16 sps:$4 sm:$0xff]  }
  0xf0   :  { %4955 = vmatpush1.bf16.msra.mxu0 %v8920_v43  ;;  %5447 = vmatpush1.bf16.msra.mxu1 %v8923_v44  ;;  %v9012_v43 = vld [vmem:[#allocation2 + $0x684] ss:$16 sps:$4 sm:$0xff]   ;;  %v9015_v44 = vld [vmem:[#allocation2 + $0x68c] ss:$16 sps:$4 sm:$0xff]  }
  0xf1   :  { %4956 = vmatprep.subr.bf16.mxu0 %v8928_v45  ;;  %5448 = vmatprep.subr.bf16.mxu1 %v8931_v46  ;;  %v9010_v45 = vld [vmem:[#allocation2 + $0x680] ss:$16 sps:$4 sm:$0xff]   ;;  %v9013_v46 = vld [vmem:[#allocation2 + $0x688] ss:$16 sps:$4 sm:$0xff]  }
  0xf4   :  { %4957 = vmatpush1.bf16.msra.mxu0 %v8926_v47  ;;  %5449 = vmatpush1.bf16.msra.mxu1 %v8929_v48  ;;  %v9018_v47 = vld [vmem:[#allocation2 + $0x6a4] ss:$16 sps:$4 sm:$0xff]   ;;  %v9021_v48 = vld [vmem:[#allocation2 + $0x6ac] ss:$16 sps:$4 sm:$0xff]  }
  0xf5   :  { %4958 = vmatprep.subr.bf16.mxu0 %v8934_v50  ;;  %5450 = vmatprep.subr.bf16.mxu1 %v8937_v51  ;;  %v9016_v50 = vld [vmem:[#allocation2 + $0x6a0] ss:$16 sps:$4 sm:$0xff]   ;;  %v9019_v51 = vld [vmem:[#allocation2 + $0x6a8] ss:$16 sps:$4 sm:$0xff]  }
  0xf8   :  { %4959 = vmatpush1.bf16.msra.mxu0 %v8932_v52  ;;  %5451 = vmatpush1.bf16.msra.mxu1 %v8935_v53  ;;  %v9024_v52 = vld [vmem:[#allocation2 + $0x6c4] ss:$16 sps:$4 sm:$0xff]   ;;  %v9027_v53 = vld [vmem:[#allocation2 + $0x6cc] ss:$16 sps:$4 sm:$0xff]  }
  0xf9   :  { %4960 = vmatprep.subr.bf16.mxu0 %v8940_v54  ;;  %5452 = vmatprep.subr.bf16.mxu1 %v8943_v55  ;;  %v9022_v54 = vld [vmem:[#allocation2 + $0x6c0] ss:$16 sps:$4 sm:$0xff]   ;;  %v9025_v55 = vld [vmem:[#allocation2 + $0x6c8] ss:$16 sps:$4 sm:$0xff]  }
  0xfc   :  { %4961 = vmatpush1.bf16.msra.mxu0 %v8938_v56  ;;  %5453 = vmatpush1.bf16.msra.mxu1 %v8941_v57  ;;  %v9030_v56 = vld [vmem:[#allocation2 + $0x6e4] ss:$16 sps:$4 sm:$0xff]   ;;  %v9033_v57 = vld [vmem:[#allocation2 + $0x6ec] ss:$16 sps:$4 sm:$0xff]  }
  0xfd   :  { %4962 = vmatprep.subr.bf16.mxu0 %v8946_v58  ;;  %5454 = vmatprep.subr.bf16.mxu1 %v8949_v59  ;;  %v9028_v58 = vld [vmem:[#allocation2 + $0x6e0] ss:$16 sps:$4 sm:$0xff]   ;;  %v9031_v59 = vld [vmem:[#allocation2 + $0x6e8] ss:$16 sps:$4 sm:$0xff]  }
 0x100   :  { %4963 = vmatpush1.bf16.msra.mxu0 %v8944_v60  ;;  %5455 = vmatpush1.bf16.msra.mxu1 %v8947_v61  ;;  %v9036_v60 = vld [vmem:[#allocation2 + $0x704] ss:$16 sps:$4 sm:$0xff]   ;;  %v9039_v61 = vld [vmem:[#allocation2 + $0x70c] ss:$16 sps:$4 sm:$0xff]  }
 0x101   :  { %4964 = vmatprep.subr.bf16.mxu0 %v8952_v62  ;;  %5456 = vmatprep.subr.bf16.mxu1 %v8955_v63  ;;  %v9034_v62 = vld [vmem:[#allocation2 + $0x700] ss:$16 sps:$4 sm:$0xff]   ;;  %v9037_v63 = vld [vmem:[#allocation2 + $0x708] ss:$16 sps:$4 sm:$0xff]  }
 0x104   :  { %4965 = vmatpush1.bf16.msra.mxu0 %v8950_v0  ;;  %5457 = vmatpush1.bf16.msra.mxu1 %v8953_v1  ;;  %v9042_v0 = vld [vmem:[#allocation2 + $0x724] ss:$16 sps:$4 sm:$0xff]   ;;  %v9045_v1 = vld [vmem:[#allocation2 + $0x72c] ss:$16 sps:$4 sm:$0xff]  }
 0x105   :  { %4966 = vmatprep.subr.bf16.mxu0 %v8958_v2  ;;  %5458 = vmatprep.subr.bf16.mxu1 %v8961_v3  ;;  %v9040_v2 = vld [vmem:[#allocation2 + $0x720] ss:$16 sps:$4 sm:$0xff]   ;;  %v9043_v3 = vld [vmem:[#allocation2 + $0x728] ss:$16 sps:$4 sm:$0xff]  }
 0x108   :  { %4967 = vmatpush1.bf16.msra.mxu0 %v8956_v4  ;;  %5459 = vmatpush1.bf16.msra.mxu1 %v8959_v5  ;;  %v9048_v4 = vld [vmem:[#allocation2 + $0x744] ss:$16 sps:$4 sm:$0xff]   ;;  %v9051_v5 = vld [vmem:[#allocation2 + $0x74c] ss:$16 sps:$4 sm:$0xff]  }
 0x109   :  { %4968 = vmatprep.subr.bf16.mxu0 %v8964_v6  ;;  %5460 = vmatprep.subr.bf16.mxu1 %v8967_v7  ;;  %v9046_v6 = vld [vmem:[#allocation2 + $0x740] ss:$16 sps:$4 sm:$0xff]   ;;  %v9049_v7 = vld [vmem:[#allocation2 + $0x748] ss:$16 sps:$4 sm:$0xff]  }
 0x10c   :  { %4969 = vmatpush1.bf16.msra.mxu0 %v8962_v8  ;;  %5461 = vmatpush1.bf16.msra.mxu1 %v8965_v10  ;;  %v9054_v8 = vld [vmem:[#allocation2 + $0x764] ss:$16 sps:$4 sm:$0xff]   ;;  %v9057_v10 = vld [vmem:[#allocation2 + $0x76c] ss:$16 sps:$4 sm:$0xff]  }
 0x10d   :  { %4970 = vmatprep.subr.bf16.mxu0 %v8970_v11  ;;  %5462 = vmatprep.subr.bf16.mxu1 %v8973_v12  ;;  %v9052_v11 = vld [vmem:[#allocation2 + $0x760] ss:$16 sps:$4 sm:$0xff]   ;;  %v9055_v12 = vld [vmem:[#allocation2 + $0x768] ss:$16 sps:$4 sm:$0xff]  }
 0x110   :  { %4971 = vmatpush1.bf16.msra.mxu0 %v8968_v13  ;;  %5463 = vmatpush1.bf16.msra.mxu1 %v8971_v14  ;;  %v9060_v13 = vld [vmem:[#allocation2 + $0x784] ss:$16 sps:$4 sm:$0xff]   ;;  %v9063_v14 = vld [vmem:[#allocation2 + $0x78c] ss:$16 sps:$4 sm:$0xff]  }
 0x111   :  { %4972 = vmatprep.subr.bf16.mxu0 %v8976_v15  ;;  %5464 = vmatprep.subr.bf16.mxu1 %v8979_v16  ;;  %v9058_v15 = vld [vmem:[#allocation2 + $0x780] ss:$16 sps:$4 sm:$0xff]   ;;  %v9061_v16 = vld [vmem:[#allocation2 + $0x788] ss:$16 sps:$4 sm:$0xff]  }
 0x114   :  { %4973 = vmatpush1.bf16.msra.mxu0 %v8974_v18  ;;  %5465 = vmatpush1.bf16.msra.mxu1 %v8977_v19  ;;  %v9069_v18 = vld [vmem:[#allocation2 + $0x7ac] ss:$16 sps:$4 sm:$0xff]   ;;  %v9064_v19 = vld [vmem:[#allocation2 + $0x7a0] ss:$16 sps:$4 sm:$0xff]  }
 0x115   :  { %4974 = vmatprep.subr.bf16.mxu0 %v8982_v20  ;;  %5466 = vmatprep.subr.bf16.mxu1 %v8985_v21  ;;  %v9067_v20 = vld [vmem:[#allocation2 + $0x7a8] ss:$16 sps:$4 sm:$0xff]   ;;  %v9072_v21 = vld [vmem:[#allocation2 + $0x7c4] ss:$16 sps:$4 sm:$0xff]  }
 0x118   :  { %4975 = vmatpush1.bf16.msra.mxu0 %v8980_v24  ;;  %5467 = vmatpush1.bf16.msra.mxu1 %v8983_v9  ;;  %v9075_v24 = vld [vmem:[#allocation2 + $0x7cc] ss:$16 sps:$4 sm:$0xff]   ;;  %v9070_v9 = vld [vmem:[#allocation2 + $0x7c0] ss:$16 sps:$4 sm:$0xff]  }
 0x119   :  { %4985 = vmatprep.subr.bf16.mxu0 %v8988_v26  ;;  %5477 = vmatprep.subr.bf16.mxu1 %v8991_v27  ;;  %v10454_v26 = vld [vmem:[%s10550_s0 + $0x10] sm:$0xff]  ;;  %v9073_v27 = vld [vmem:[#allocation2 + $0x7c8] ss:$16 sps:$4 sm:$0xff]  }
 0x11b   :  { %4977 = vmatmul.mubr.bf16.vlgmr.msra.gmra.mrb[0].mxu0 %v234_v28  ;;  %5469 = vmatmul.mubr.bf16.vlgmr.msra.gmra.mrb[0].mxu1 %v234_v28  ;;  %v9081_v28 = vld [vmem:[#allocation2 + $0x7ec] ss:$16 sps:$4 sm:$0xff]  }
 0x11c   :  { %4986 = vmatpush1.bf16.msra.mxu0 %v8986_v29  ;;  %5478 = vmatpush1.bf16.msra.mxu1 %v8989_v30  ;;  %v10458_v29 = vrot.slane %v10454_v26, %v10418_v49  ;;  %v9076_v30 = vld [vmem:[#allocation2 + $0x7e0] ss:$16 sps:$4 sm:$0xff]  }
 0x11d   :  { %4987 = vmatprep.subr.bf16.mxu0 %v8994_v31  ;;  %5479 = vmatprep.subr.bf16.mxu1 %v8997_v32  ;;  %v9079_v31 = vld [vmem:[#allocation2 + $0x7e8] ss:$16 sps:$4 sm:$0xff]   ;;  %v9085_v32 = vld [vmem:[#allocation2 + $0x804] ss:$16 sps:$4 sm:$0xff]  }
 0x11e   :  { %5017 = vmatprep.mubr.bf16.mxu0 %v237_v33  ;;  %5509 = vmatprep.mubr.bf16.mxu1 %v237_v33  ;;  %v9088_v33 = vld [vmem:[#allocation2 + $0x80c] ss:$16 sps:$4 sm:$0xff]  }
 0x120   :  { %4988 = vmatpush1.bf16.msra.mxu0 %v8992_v34  ;;  %5480 = vmatpush1.bf16.msra.mxu1 %v8995_v35  ;;  %v153_v34 = vcombine.high %v10458_v29, %v10458_v29  ;;  %v9083_v35 = vld [vmem:[#allocation2 + $0x800] ss:$16 sps:$4 sm:$0xff]  }
 0x121   :  { %4989 = vmatprep.subr.bf16.mxu0 %v9000_v36  ;;  %5481 = vmatprep.subr.bf16.mxu1 %v9003_v37  ;;  %v236_v36 = vpack.c.bf16 %v10445_v23, %v10445_v23  ;;  %v9086_v37 = vld [vmem:[#allocation2 + $0x808] ss:$16 sps:$4 sm:$0xff]   ;;  %v9095_v23 = vld [vmem:[#allocation2 + $0x840] ss:$16 sps:$4 sm:$0xff]  }
 0x124   :  { %4990 = vmatpush1.bf16.msra.mxu0 %v8998_v25  ;;  %5482 = vmatpush1.bf16.msra.mxu1 %v9001_v38  ;;  %v9091_v25 = vld [vmem:[#allocation2 + $0x824] ss:$16 sps:$4 sm:$0xff]   ;;  %v9094_v38 = vld [vmem:[#allocation2 + $0x82c] ss:$16 sps:$4 sm:$0xff]  }
 0x125   :  { %4991 = vmatprep.subr.bf16.mxu0 %v9006_v39  ;;  %5483 = vmatprep.subr.bf16.mxu1 %v9009_v40  ;;  %v239_v39 = vpack.c.bf16 %v153_v34, %v153_v34  ;;  %v9089_v40 = vld [vmem:[#allocation2 + $0x820] ss:$16 sps:$4 sm:$0xff]   ;;  %v9170_v34 = vld [vmem:[#allocation2 + $0x9c8] ss:$16 sps:$4 sm:$0xff]  }
 0x128   :  { %4992 = vmatpush1.bf16.msra.mxu0 %v9004_v41  ;;  %5484 = vmatpush1.bf16.msra.mxu1 %v9007_v42  ;;  %v9092_v41 = vld [vmem:[#allocation2 + $0x828] ss:$16 sps:$4 sm:$0xff]   ;;  %v9097_v42 = vld [vmem:[#allocation2 + $0x844] ss:$16 sps:$4 sm:$0xff]  }
 0x129   :  { %4993 = vmatprep.subr.bf16.mxu0 %v9012_v43  ;;  %5485 = vmatprep.subr.bf16.mxu1 %v9015_v44  ;;  %v9100_v43 = vld [vmem:[#allocation2 + $0x84c] ss:$16 sps:$4 sm:$0xff]   ;;  %v9098_v44 = vld [vmem:[#allocation2 + $0x848] ss:$16 sps:$4 sm:$0xff]  }
 0x12c   :  { %4994 = vmatpush1.bf16.msra.mxu0 %v9010_v45  ;;  %5486 = vmatpush1.bf16.msra.mxu1 %v9013_v46  ;;  %v9103_v45 = vld [vmem:[#allocation2 + $0x864] ss:$16 sps:$4 sm:$0xff]   ;;  %v9106_v46 = vld [vmem:[#allocation2 + $0x86c] ss:$16 sps:$4 sm:$0xff]  }
 0x12d   :  { %4995 = vmatprep.subr.bf16.mxu0 %v9018_v47  ;;  %5487 = vmatprep.subr.bf16.mxu1 %v9021_v48  ;;  %v9101_v47 = vld [vmem:[#allocation2 + $0x860] ss:$16 sps:$4 sm:$0xff]   ;;  %v9104_v48 = vld [vmem:[#allocation2 + $0x868] ss:$16 sps:$4 sm:$0xff]  }
 0x130   :  { %4996 = vmatpush1.bf16.msra.mxu0 %v9016_v50  ;;  %5488 = vmatpush1.bf16.msra.mxu1 %v9019_v51  ;;  %v9109_v50 = vld [vmem:[#allocation2 + $0x884] ss:$16 sps:$4 sm:$0xff]   ;;  %v9112_v51 = vld [vmem:[#allocation2 + $0x88c] ss:$16 sps:$4 sm:$0xff]  }
 0x131   :  { %4997 = vmatprep.subr.bf16.mxu0 %v9024_v52  ;;  %5489 = vmatprep.subr.bf16.mxu1 %v9027_v53  ;;  %v9107_v52 = vld [vmem:[#allocation2 + $0x880] ss:$16 sps:$4 sm:$0xff]   ;;  %v9110_v53 = vld [vmem:[#allocation2 + $0x888] ss:$16 sps:$4 sm:$0xff]  }
 0x134   :  { %4998 = vmatpush1.bf16.msra.mxu0 %v9022_v54  ;;  %5490 = vmatpush1.bf16.msra.mxu1 %v9025_v55  ;;  %v9115_v54 = vld [vmem:[#allocation2 + $0x8a4] ss:$16 sps:$4 sm:$0xff]   ;;  %v9118_v55 = vld [vmem:[#allocation2 + $0x8ac] ss:$16 sps:$4 sm:$0xff]  }
 0x135   :  { %4999 = vmatprep.subr.bf16.mxu0 %v9030_v56  ;;  %5491 = vmatprep.subr.bf16.mxu1 %v9033_v57  ;;  %v9113_v56 = vld [vmem:[#allocation2 + $0x8a0] ss:$16 sps:$4 sm:$0xff]   ;;  %v9116_v57 = vld [vmem:[#allocation2 + $0x8a8] ss:$16 sps:$4 sm:$0xff]  }
 0x138   :  { %5000 = vmatpush1.bf16.msra.mxu0 %v9028_v58  ;;  %5492 = vmatpush1.bf16.msra.mxu1 %v9031_v59  ;;  %v9121_v58 = vld [vmem:[#allocation2 + $0x8c4] ss:$16 sps:$4 sm:$0xff]   ;;  %v9124_v59 = vld [vmem:[#allocation2 + $0x8cc] ss:$16 sps:$4 sm:$0xff]  }
 0x139   :  { %5001 = vmatprep.subr.bf16.mxu0 %v9036_v60  ;;  %5493 = vmatprep.subr.bf16.mxu1 %v9039_v61  ;;  %v9119_v60 = vld [vmem:[#allocation2 + $0x8c0] ss:$16 sps:$4 sm:$0xff]   ;;  %v9122_v61 = vld [vmem:[#allocation2 + $0x8c8] ss:$16 sps:$4 sm:$0xff]  }
 0x13c   :  { %5002 = vmatpush1.bf16.msra.mxu0 %v9034_v62  ;;  %5494 = vmatpush1.bf16.msra.mxu1 %v9037_v63  ;;  %v9127_v62 = vld [vmem:[#allocation2 + $0x8e4] ss:$16 sps:$4 sm:$0xff]   ;;  %v9130_v63 = vld [vmem:[#allocation2 + $0x8ec] ss:$16 sps:$4 sm:$0xff]  }
 0x13d   :  { %5003 = vmatprep.subr.bf16.mxu0 %v9042_v0  ;;  %5495 = vmatprep.subr.bf16.mxu1 %v9045_v1  ;;  %v9125_v0 = vld [vmem:[#allocation2 + $0x8e0] ss:$16 sps:$4 sm:$0xff]   ;;  %v9128_v1 = vld [vmem:[#allocation2 + $0x8e8] ss:$16 sps:$4 sm:$0xff]  }
 0x140   :  { %5004 = vmatpush1.bf16.msra.mxu0 %v9040_v2  ;;  %5496 = vmatpush1.bf16.msra.mxu1 %v9043_v3  ;;  %v9133_v2 = vld [vmem:[#allocation2 + $0x904] ss:$16 sps:$4 sm:$0xff]   ;;  %v9136_v3 = vld [vmem:[#allocation2 + $0x90c] ss:$16 sps:$4 sm:$0xff]  }
 0x141   :  { %5005 = vmatprep.subr.bf16.mxu0 %v9048_v4  ;;  %5497 = vmatprep.subr.bf16.mxu1 %v9051_v5  ;;  %v9131_v4 = vld [vmem:[#allocation2 + $0x900] ss:$16 sps:$4 sm:$0xff]   ;;  %v9134_v5 = vld [vmem:[#allocation2 + $0x908] ss:$16 sps:$4 sm:$0xff]  }
 0x144   :  { %5006 = vmatpush1.bf16.msra.mxu0 %v9046_v6  ;;  %5498 = vmatpush1.bf16.msra.mxu1 %v9049_v7  ;;  %v9139_v6 = vld [vmem:[#allocation2 + $0x924] ss:$16 sps:$4 sm:$0xff]   ;;  %v9142_v7 = vld [vmem:[#allocation2 + $0x92c] ss:$16 sps:$4 sm:$0xff]  }
 0x145   :  { %5007 = vmatprep.subr.bf16.mxu0 %v9054_v8  ;;  %5499 = vmatprep.subr.bf16.mxu1 %v9057_v10  ;;  %v9137_v8 = vld [vmem:[#allocation2 + $0x920] ss:$16 sps:$4 sm:$0xff]   ;;  %v9140_v10 = vld [vmem:[#allocation2 + $0x928] ss:$16 sps:$4 sm:$0xff]  }
 0x148   :  { %5008 = vmatpush1.bf16.msra.mxu0 %v9052_v11  ;;  %5500 = vmatpush1.bf16.msra.mxu1 %v9055_v12  ;;  %v9145_v11 = vld [vmem:[#allocation2 + $0x944] ss:$16 sps:$4 sm:$0xff]   ;;  %v9148_v12 = vld [vmem:[#allocation2 + $0x94c] ss:$16 sps:$4 sm:$0xff]  }
 0x149   :  { %5009 = vmatprep.subr.bf16.mxu0 %v9060_v13  ;;  %5501 = vmatprep.subr.bf16.mxu1 %v9063_v14  ;;  %v9143_v13 = vld [vmem:[#allocation2 + $0x940] ss:$16 sps:$4 sm:$0xff]   ;;  %v9146_v14 = vld [vmem:[#allocation2 + $0x948] ss:$16 sps:$4 sm:$0xff]  }
 0x14c   :  { %5010 = vmatpush1.bf16.msra.mxu0 %v9058_v15  ;;  %5502 = vmatpush1.bf16.msra.mxu1 %v9061_v16  ;;  %v9151_v15 = vld [vmem:[#allocation2 + $0x964] ss:$16 sps:$4 sm:$0xff]   ;;  %v9154_v16 = vld [vmem:[#allocation2 + $0x96c] ss:$16 sps:$4 sm:$0xff]  }
 0x14d   :  { %5011 = vmatprep.subr.bf16.mxu0 %v9066_v17  ;;  %5503 = vmatprep.subr.bf16.mxu1 %v9069_v18  ;;  %v9149_v17 = vld [vmem:[#allocation2 + $0x960] ss:$16 sps:$4 sm:$0xff]   ;;  %v9152_v18 = vld [vmem:[#allocation2 + $0x968] ss:$16 sps:$4 sm:$0xff]  }
 0x150   :  { %5012 = vmatpush1.bf16.msra.mxu0 %v9064_v19  ;;  %5504 = vmatpush1.bf16.msra.mxu1 %v9067_v20  ;;  %v9157_v19 = vld [vmem:[#allocation2 + $0x984] ss:$16 sps:$4 sm:$0xff]   ;;  %v9160_v20 = vld [vmem:[#allocation2 + $0x98c] ss:$16 sps:$4 sm:$0xff]  }
 0x151   :  { %5013 = vmatprep.subr.bf16.mxu0 %v9072_v21  ;;  %5505 = vmatprep.subr.bf16.mxu1 %v9075_v24  ;;  %v9155_v21 = vld [vmem:[#allocation2 + $0x980] ss:$16 sps:$4 sm:$0xff]   ;;  %v9158_v24 = vld [vmem:[#allocation2 + $0x988] ss:$16 sps:$4 sm:$0xff]  }
 0x154   :  { %5014 = vmatpush1.bf16.msra.mxu0 %v9070_v9  ;;  %5506 = vmatpush1.bf16.msra.mxu1 %v9073_v27  ;;  %v9163_v9 = vld [vmem:[#allocation2 + $0x9a4] ss:$16 sps:$4 sm:$0xff]   ;;  %v9166_v27 = vld [vmem:[#allocation2 + $0x9ac] ss:$16 sps:$4 sm:$0xff]  }
 0x155   :  { %5015 = vmatprep.subr.bf16.mxu0 %v9078_v22  ;;  %5507 = vmatprep.subr.bf16.mxu1 %v9081_v28  ;;  %v9161_v22 = vld [vmem:[#allocation2 + $0x9a0] ss:$16 sps:$4 sm:$0xff]   ;;  %v9164_v28 = vld [vmem:[#allocation2 + $0x9a8] ss:$16 sps:$4 sm:$0xff]  }
 0x158   :  { %5016 = vmatpush1.bf16.msra.mxu0 %v9076_v30  ;;  %5508 = vmatpush1.bf16.msra.mxu1 %v9079_v31  ;;  %v9169_v30 = vld [vmem:[#allocation2 + $0x9c4] ss:$16 sps:$4 sm:$0xff]   ;;  %v9172_v31 = vld [vmem:[#allocation2 + $0x9cc] ss:$16 sps:$4 sm:$0xff]  }
 0x159   :  { %5026 = vmatprep.subr.bf16.mxu0 %v9085_v32  ;;  %5518 = vmatprep.subr.bf16.mxu1 %v9088_v33  ;;  %v138_v32 = vcombine.high %v10454_v26, %v10454_v26  ;;  %v9167_v33 = vld [vmem:[#allocation2 + $0x9c0] ss:$16 sps:$4 sm:$0xff]  }
 0x15b   :  { %5018 = vmatmul.mubr.bf16.vlgmr.msra.gmra.mrb[0].mxu0 %v236_v36  ;;  %5510 = vmatmul.mubr.bf16.vlgmr.msra.gmra.mrb[0].mxu1 %v236_v36  ;;  %v9178_v36 = vld [vmem:[#allocation2 + $0x9ec] ss:$16 sps:$4 sm:$0xff]  }
 0x15c   :  { %5027 = vmatpush1.bf16.msra.mxu0 %v9083_v35  ;;  %5519 = vmatpush1.bf16.msra.mxu1 %v9086_v37  ;;  %v9175_v35 = vld [vmem:[#allocation2 + $0x9e4] ss:$16 sps:$4 sm:$0xff]   ;;  %v10467_v37 = vrot.slane %v138_v32, %v10418_v49 }
 0x15d   :  { %5028 = vmatprep.subr.bf16.mxu0 %v9091_v25  ;;  %5520 = vmatprep.subr.bf16.mxu1 %v9094_v38  ;;  %v9173_v25 = vld [vmem:[#allocation2 + $0x9e0] ss:$16 sps:$4 sm:$0xff]   ;;  %v9176_v38 = vld [vmem:[#allocation2 + $0x9e8] ss:$16 sps:$4 sm:$0xff]   ;;  %v9259_v32 = vld [vmem:[#allocation2 + $0xba4] ss:$16 sps:$4 sm:$0xff]  }
 0x15e   :  { %5058 = vmatprep.mubr.bf16.mxu0 %v239_v39  ;;  %5550 = vmatprep.mubr.bf16.mxu1 %v239_v39  ;;  %v9181_v39 = vld [vmem:[#allocation2 + $0xa04] ss:$16 sps:$4 sm:$0xff]   ;;  %v154_v26 = vcombine.high %v10467_v37, %v10467_v37 }
 0x160   :  { %5029 = vmatpush1.bf16.msra.mxu0 %v9089_v40  ;;  %5521 = vmatpush1.bf16.msra.mxu1 %v9092_v41  ;;  %v9184_v40 = vld [vmem:[#allocation2 + $0xa0c] ss:$16 sps:$4 sm:$0xff]   ;;  %v238_v41 = vpack.c.bf16 %v10458_v29, %v10458_v29  ;;  %v9191_v29 = vld [vmem:[#allocation2 + $0xa40] ss:$16 sps:$4 sm:$0xff]  }
 0x161   :  { %5030 = vmatprep.subr.bf16.mxu0 %v9097_v42  ;;  %5522 = vmatprep.subr.bf16.mxu1 %v9100_v43  ;;  %v9179_v42 = vld [vmem:[#allocation2 + $0xa00] ss:$16 sps:$4 sm:$0xff]   ;;  %v9182_v43 = vld [vmem:[#allocation2 + $0xa08] ss:$16 sps:$4 sm:$0xff]  }
 0x164   :  { %5031 = vmatpush1.bf16.msra.mxu0 %v9095_v23  ;;  %5523 = vmatpush1.bf16.msra.mxu1 %v9098_v44  ;;  %v9187_v23 = vld [vmem:[#allocation2 + $0xa24] ss:$16 sps:$4 sm:$0xff]   ;;  %v9190_v44 = vld [vmem:[#allocation2 + $0xa2c] ss:$16 sps:$4 sm:$0xff]  }
 0x165   :  { %5032 = vmatprep.subr.bf16.mxu0 %v9103_v45  ;;  %5524 = vmatprep.subr.bf16.mxu1 %v9106_v46  ;;  %v241_v45 = vpack.c.bf16 %v154_v26, %v154_v26  ;;  %v9185_v46 = vld [vmem:[#allocation2 + $0xa20] ss:$16 sps:$4 sm:$0xff]   ;;  %v9271_v26 = vld [vmem:[#allocation2 + $0xbe4] ss:$16 sps:$4 sm:$0xff]  }
 0x168   :  { %5033 = vmatpush1.bf16.msra.mxu0 %v9101_v47  ;;  %5525 = vmatpush1.bf16.msra.mxu1 %v9104_v48  ;;  %v9188_v47 = vld [vmem:[#allocation2 + $0xa28] ss:$16 sps:$4 sm:$0xff]   ;;  %v9193_v48 = vld [vmem:[#allocation2 + $0xa44] ss:$16 sps:$4 sm:$0xff]  }
 0x169   :  { %5034 = vmatprep.subr.bf16.mxu0 %v9109_v50  ;;  %5526 = vmatprep.subr.bf16.mxu1 %v9112_v51  ;;  %v9196_v50 = vld [vmem:[#allocation2 + $0xa4c] ss:$16 sps:$4 sm:$0xff]   ;;  %v9194_v51 = vld [vmem:[#allocation2 + $0xa48] ss:$16 sps:$4 sm:$0xff]  }
 0x16c   :  { %5035 = vmatpush1.bf16.msra.mxu0 %v9107_v52  ;;  %5527 = vmatpush1.bf16.msra.mxu1 %v9110_v53  ;;  %v9199_v52 = vld [vmem:[#allocation2 + $0xa64] ss:$16 sps:$4 sm:$0xff]   ;;  %v9202_v53 = vld [vmem:[#allocation2 + $0xa6c] ss:$16 sps:$4 sm:$0xff]  }
 0x16d   :  { %5036 = vmatprep.subr.bf16.mxu0 %v9115_v54  ;;  %5528 = vmatprep.subr.bf16.mxu1 %v9118_v55  ;;  %v9197_v54 = vld [vmem:[#allocation2 + $0xa60] ss:$16 sps:$4 sm:$0xff]   ;;  %v9200_v55 = vld [vmem:[#allocation2 + $0xa68] ss:$16 sps:$4 sm:$0xff]  }
 0x170   :  { %5037 = vmatpush1.bf16.msra.mxu0 %v9113_v56  ;;  %5529 = vmatpush1.bf16.msra.mxu1 %v9116_v57  ;;  %v9205_v56 = vld [vmem:[#allocation2 + $0xa84] ss:$16 sps:$4 sm:$0xff]   ;;  %v9208_v57 = vld [vmem:[#allocation2 + $0xa8c] ss:$16 sps:$4 sm:$0xff]  }
 0x171   :  { %5038 = vmatprep.subr.bf16.mxu0 %v9121_v58  ;;  %5530 = vmatprep.subr.bf16.mxu1 %v9124_v59  ;;  %v9203_v58 = vld [vmem:[#allocation2 + $0xa80] ss:$16 sps:$4 sm:$0xff]   ;;  %v9206_v59 = vld [vmem:[#allocation2 + $0xa88] ss:$16 sps:$4 sm:$0xff]  }
 0x174   :  { %5039 = vmatpush1.bf16.msra.mxu0 %v9119_v60  ;;  %5531 = vmatpush1.bf16.msra.mxu1 %v9122_v61  ;;  %v9211_v60 = vld [vmem:[#allocation2 + $0xaa4] ss:$16 sps:$4 sm:$0xff]   ;;  %v9214_v61 = vld [vmem:[#allocation2 + $0xaac] ss:$16 sps:$4 sm:$0xff]  }
 0x175   :  { %5040 = vmatprep.subr.bf16.mxu0 %v9127_v62  ;;  %5532 = vmatprep.subr.bf16.mxu1 %v9130_v63  ;;  %v9209_v62 = vld [vmem:[#allocation2 + $0xaa0] ss:$16 sps:$4 sm:$0xff]   ;;  %v9212_v63 = vld [vmem:[#allocation2 + $0xaa8] ss:$16 sps:$4 sm:$0xff]  }
 0x178   :  { %5041 = vmatpush1.bf16.msra.mxu0 %v9125_v0  ;;  %5533 = vmatpush1.bf16.msra.mxu1 %v9128_v1  ;;  %v9217_v0 = vld [vmem:[#allocation2 + $0xac4] ss:$16 sps:$4 sm:$0xff]   ;;  %v9220_v1 = vld [vmem:[#allocation2 + $0xacc] ss:$16 sps:$4 sm:$0xff]  }
 0x179   :  { %5042 = vmatprep.subr.bf16.mxu0 %v9133_v2  ;;  %5534 = vmatprep.subr.bf16.mxu1 %v9136_v3  ;;  %v9215_v2 = vld [vmem:[#allocation2 + $0xac0] ss:$16 sps:$4 sm:$0xff]   ;;  %v9218_v3 = vld [vmem:[#allocation2 + $0xac8] ss:$16 sps:$4 sm:$0xff]  }
 0x17c   :  { %5043 = vmatpush1.bf16.msra.mxu0 %v9131_v4  ;;  %5535 = vmatpush1.bf16.msra.mxu1 %v9134_v5  ;;  %v9223_v4 = vld [vmem:[#allocation2 + $0xae4] ss:$16 sps:$4 sm:$0xff]   ;;  %v9226_v5 = vld [vmem:[#allocation2 + $0xaec] ss:$16 sps:$4 sm:$0xff]  }
 0x17d   :  { %5044 = vmatprep.subr.bf16.mxu0 %v9139_v6  ;;  %5536 = vmatprep.subr.bf16.mxu1 %v9142_v7  ;;  %v9221_v6 = vld [vmem:[#allocation2 + $0xae0] ss:$16 sps:$4 sm:$0xff]   ;;  %v9224_v7 = vld [vmem:[#allocation2 + $0xae8] ss:$16 sps:$4 sm:$0xff]  }
 0x180   :  { %5045 = vmatpush1.bf16.msra.mxu0 %v9137_v8  ;;  %5537 = vmatpush1.bf16.msra.mxu1 %v9140_v10  ;;  %v9229_v8 = vld [vmem:[#allocation2 + $0xb04] ss:$16 sps:$4 sm:$0xff]   ;;  %v9232_v10 = vld [vmem:[#allocation2 + $0xb0c] ss:$16 sps:$4 sm:$0xff]  }
 0x181   :  { %5046 = vmatprep.subr.bf16.mxu0 %v9145_v11  ;;  %5538 = vmatprep.subr.bf16.mxu1 %v9148_v12  ;;  %v9227_v11 = vld [vmem:[#allocation2 + $0xb00] ss:$16 sps:$4 sm:$0xff]   ;;  %v9230_v12 = vld [vmem:[#allocation2 + $0xb08] ss:$16 sps:$4 sm:$0xff]  }
 0x184   :  { %5047 = vmatpush1.bf16.msra.mxu0 %v9143_v13  ;;  %5539 = vmatpush1.bf16.msra.mxu1 %v9146_v14  ;;  %v9235_v13 = vld [vmem:[#allocation2 + $0xb24] ss:$16 sps:$4 sm:$0xff]   ;;  %v9238_v14 = vld [vmem:[#allocation2 + $0xb2c] ss:$16 sps:$4 sm:$0xff]  }
 0x185   :  { %5048 = vmatprep.subr.bf16.mxu0 %v9151_v15  ;;  %5540 = vmatprep.subr.bf16.mxu1 %v9154_v16  ;;  %v9233_v15 = vld [vmem:[#allocation2 + $0xb20] ss:$16 sps:$4 sm:$0xff]   ;;  %v9236_v16 = vld [vmem:[#allocation2 + $0xb28] ss:$16 sps:$4 sm:$0xff]  }
 0x188   :  { %5049 = vmatpush1.bf16.msra.mxu0 %v9149_v17  ;;  %5541 = vmatpush1.bf16.msra.mxu1 %v9152_v18  ;;  %v9241_v17 = vld [vmem:[#allocation2 + $0xb44] ss:$16 sps:$4 sm:$0xff]   ;;  %v9244_v18 = vld [vmem:[#allocation2 + $0xb4c] ss:$16 sps:$4 sm:$0xff]  }
 0x189   :  { %5050 = vmatprep.subr.bf16.mxu0 %v9157_v19  ;;  %5542 = vmatprep.subr.bf16.mxu1 %v9160_v20  ;;  %v9239_v19 = vld [vmem:[#allocation2 + $0xb40] ss:$16 sps:$4 sm:$0xff]   ;;  %v9242_v20 = vld [vmem:[#allocation2 + $0xb48] ss:$16 sps:$4 sm:$0xff]  }
 0x18c   :  { %5051 = vmatpush1.bf16.msra.mxu0 %v9155_v21  ;;  %5543 = vmatpush1.bf16.msra.mxu1 %v9158_v24  ;;  %v9247_v21 = vld [vmem:[#allocation2 + $0xb64] ss:$16 sps:$4 sm:$0xff]   ;;  %v9250_v24 = vld [vmem:[#allocation2 + $0xb6c] ss:$16 sps:$4 sm:$0xff]  }
 0x18d   :  { %5052 = vmatprep.subr.bf16.mxu0 %v9163_v9  ;;  %5544 = vmatprep.subr.bf16.mxu1 %v9166_v27  ;;  %v9245_v9 = vld [vmem:[#allocation2 + $0xb60] ss:$16 sps:$4 sm:$0xff]   ;;  %v9248_v27 = vld [vmem:[#allocation2 + $0xb68] ss:$16 sps:$4 sm:$0xff]  }
 0x190   :  { %5053 = vmatpush1.bf16.msra.mxu0 %v9161_v22  ;;  %5545 = vmatpush1.bf16.msra.mxu1 %v9164_v28  ;;  %v9253_v22 = vld [vmem:[#allocation2 + $0xb84] ss:$16 sps:$4 sm:$0xff]   ;;  %v9256_v28 = vld [vmem:[#allocation2 + $0xb8c] ss:$16 sps:$4 sm:$0xff]  }
 0x191   :  { %5054 = vmatprep.subr.bf16.mxu0 %v9169_v30  ;;  %5546 = vmatprep.subr.bf16.mxu1 %v9172_v31  ;;  %v9251_v30 = vld [vmem:[#allocation2 + $0xb80] ss:$16 sps:$4 sm:$0xff]   ;;  %v9254_v31 = vld [vmem:[#allocation2 + $0xb88] ss:$16 sps:$4 sm:$0xff]  }
 0x194   :  { %5055 = vmatpush1.bf16.msra.mxu0 %v9167_v33  ;;  %5547 = vmatpush1.bf16.msra.mxu1 %v9170_v34  ;;  %v9262_v33 = vld [vmem:[#allocation2 + $0xbac] ss:$16 sps:$4 sm:$0xff]   ;;  %v9257_v34 = vld [vmem:[#allocation2 + $0xba0] ss:$16 sps:$4 sm:$0xff]  }
 0x195   :  { %5056 = vmatprep.subr.bf16.mxu0 %v9175_v35  ;;  %5548 = vmatprep.subr.bf16.mxu1 %v9178_v36  ;;  %v9260_v35 = vld [vmem:[#allocation2 + $0xba8] ss:$16 sps:$4 sm:$0xff]   ;;  %v9265_v36 = vld [vmem:[#allocation2 + $0xbc4] ss:$16 sps:$4 sm:$0xff]  }
 0x198   :  { %5057 = vmatpush1.bf16.msra.mxu0 %v9173_v25  ;;  %5549 = vmatpush1.bf16.msra.mxu1 %v9176_v38  ;;  %v9268_v25 = vld [vmem:[#allocation2 + $0xbcc] ss:$16 sps:$4 sm:$0xff]  }
 0x199   :  { %5067 = vmatprep.subr.bf16.mxu0 %v9181_v39  ;;  %5559 = vmatprep.subr.bf16.mxu1 %v9184_v40  ;;  %v10476_v38 = vld [vmem:[%s10550_s0 + $0x18] sm:$0xff]  ;;  %v9263_v39 = vld [vmem:[#allocation2 + $0xbc0] ss:$16 sps:$4 sm:$0xff]  }
 0x19a   :  { %v9266_v40 = vld [vmem:[#allocation2 + $0xbc8] ss:$16 sps:$4 sm:$0xff]  }
 0x19b   :  { %5059 = vmatmul.mubr.bf16.vlgmr.msra.gmra.mrb[0].mxu0 %v238_v41  ;;  %5551 = vmatmul.mubr.bf16.vlgmr.msra.gmra.mrb[0].mxu1 %v238_v41  ;;  %v9274_v41 = vld [vmem:[#allocation2 + $0xbec] ss:$16 sps:$4 sm:$0xff]  }
 0x19c   :  { %5068 = vmatpush1.bf16.msra.mxu0 %v9179_v42  ;;  %5560 = vmatpush1.bf16.msra.mxu1 %v9182_v43  ;;  %v10480_v42 = vrot.slane %v10476_v38, %v10418_v49  ;;  %v9269_v43 = vld [vmem:[#allocation2 + $0xbe0] ss:$16 sps:$4 sm:$0xff]  }
 0x19d   :  { %5069 = vmatprep.subr.bf16.mxu0 %v9187_v23  ;;  %5561 = vmatprep.subr.bf16.mxu1 %v9190_v44  ;;  %v9272_v23 = vld [vmem:[#allocation2 + $0xbe8] ss:$16 sps:$4 sm:$0xff]   ;;  %v9278_v44 = vld [vmem:[#allocation2 + $0xc04] ss:$16 sps:$4 sm:$0xff]  }
 0x19e   :  { %5099 = vmatprep.mubr.bf16.mxu0 %v241_v45  ;;  %5591 = vmatprep.mubr.bf16.mxu1 %v241_v45  ;;  %v9281_v45 = vld [vmem:[#allocation2 + $0xc0c] ss:$16 sps:$4 sm:$0xff]  }
 0x1a0   :  { %5070 = vmatpush1.bf16.msra.mxu0 %v9185_v46  ;;  %5562 = vmatpush1.bf16.msra.mxu1 %v9188_v47  ;;  %v170_v46 = vcombine.high %v10480_v42, %v10480_v42  ;;  %v240_v47 = vpack.c.bf16 %v10467_v37, %v10467_v37  ;;  %v9288_v37 = vld [vmem:[#allocation2 + $0xc40] ss:$16 sps:$4 sm:$0xff]  }
 0x1a1   :  { %5071 = vmatprep.subr.bf16.mxu0 %v9193_v48  ;;  %5563 = vmatprep.subr.bf16.mxu1 %v9196_v50  ;;  %v9276_v48 = vld [vmem:[#allocation2 + $0xc00] ss:$16 sps:$4 sm:$0xff]   ;;  %v9279_v50 = vld [vmem:[#allocation2 + $0xc08] ss:$16 sps:$4 sm:$0xff]  }
 0x1a4   :  { %5072 = vmatpush1.bf16.msra.mxu0 %v9191_v29  ;;  %5564 = vmatpush1.bf16.msra.mxu1 %v9194_v51  ;;  %v9284_v29 = vld [vmem:[#allocation2 + $0xc24] ss:$16 sps:$4 sm:$0xff]   ;;  %v9287_v51 = vld [vmem:[#allocation2 + $0xc2c] ss:$16 sps:$4 sm:$0xff]  }
 0x1a5   :  { %5073 = vmatprep.subr.bf16.mxu0 %v9199_v52  ;;  %5565 = vmatprep.subr.bf16.mxu1 %v9202_v53  ;;  %v243_v52 = vpack.c.bf16 %v170_v46, %v170_v46  ;;  %v9282_v53 = vld [vmem:[#allocation2 + $0xc20] ss:$16 sps:$4 sm:$0xff]   ;;  %v9363_v46 = vld [vmem:[#allocation2 + $0xdc8] ss:$16 sps:$4 sm:$0xff]  }
 0x1a8   :  { %5074 = vmatpush1.bf16.msra.mxu0 %v9197_v54  ;;  %5566 = vmatpush1.bf16.msra.mxu1 %v9200_v55  ;;  %v9285_v54 = vld [vmem:[#allocation2 + $0xc28] ss:$16 sps:$4 sm:$0xff]   ;;  %v9290_v55 = vld [vmem:[#allocation2 + $0xc44] ss:$16 sps:$4 sm:$0xff]  }
 0x1a9   :  { %5075 = vmatprep.subr.bf16.mxu0 %v9205_v56  ;;  %5567 = vmatprep.subr.bf16.mxu1 %v9208_v57  ;;  %v9293_v56 = vld [vmem:[#allocation2 + $0xc4c] ss:$16 sps:$4 sm:$0xff]   ;;  %v9291_v57 = vld [vmem:[#allocation2 + $0xc48] ss:$16 sps:$4 sm:$0xff]  }
 0x1ac   :  { %5076 = vmatpush1.bf16.msra.mxu0 %v9203_v58  ;;  %5568 = vmatpush1.bf16.msra.mxu1 %v9206_v59  ;;  %v9296_v58 = vld [vmem:[#allocation2 + $0xc64] ss:$16 sps:$4 sm:$0xff]   ;;  %v9299_v59 = vld [vmem:[#allocation2 + $0xc6c] ss:$16 sps:$4 sm:$0xff]  }
 0x1ad   :  { %5077 = vmatprep.subr.bf16.mxu0 %v9211_v60  ;;  %5569 = vmatprep.subr.bf16.mxu1 %v9214_v61  ;;  %v9294_v60 = vld [vmem:[#allocation2 + $0xc60] ss:$16 sps:$4 sm:$0xff]   ;;  %v9297_v61 = vld [vmem:[#allocation2 + $0xc68] ss:$16 sps:$4 sm:$0xff]  }
 0x1b0   :  { %5078 = vmatpush1.bf16.msra.mxu0 %v9209_v62  ;;  %5570 = vmatpush1.bf16.msra.mxu1 %v9212_v63  ;;  %v9302_v62 = vld [vmem:[#allocation2 + $0xc84] ss:$16 sps:$4 sm:$0xff]   ;;  %v9305_v63 = vld [vmem:[#allocation2 + $0xc8c] ss:$16 sps:$4 sm:$0xff]  }
 0x1b1   :  { %5079 = vmatprep.subr.bf16.mxu0 %v9217_v0  ;;  %5571 = vmatprep.subr.bf16.mxu1 %v9220_v1  ;;  %v9300_v0 = vld [vmem:[#allocation2 + $0xc80] ss:$16 sps:$4 sm:$0xff]   ;;  %v9303_v1 = vld [vmem:[#allocation2 + $0xc88] ss:$16 sps:$4 sm:$0xff]  }
 0x1b4   :  { %5080 = vmatpush1.bf16.msra.mxu0 %v9215_v2  ;;  %5572 = vmatpush1.bf16.msra.mxu1 %v9218_v3  ;;  %v9308_v2 = vld [vmem:[#allocation2 + $0xca4] ss:$16 sps:$4 sm:$0xff]   ;;  %v9311_v3 = vld [vmem:[#allocation2 + $0xcac] ss:$16 sps:$4 sm:$0xff]  }
 0x1b5   :  { %5081 = vmatprep.subr.bf16.mxu0 %v9223_v4  ;;  %5573 = vmatprep.subr.bf16.mxu1 %v9226_v5  ;;  %v9306_v4 = vld [vmem:[#allocation2 + $0xca0] ss:$16 sps:$4 sm:$0xff]   ;;  %v9309_v5 = vld [vmem:[#allocation2 + $0xca8] ss:$16 sps:$4 sm:$0xff]  }
 0x1b8   :  { %5082 = vmatpush1.bf16.msra.mxu0 %v9221_v6  ;;  %5574 = vmatpush1.bf16.msra.mxu1 %v9224_v7  ;;  %v9314_v6 = vld [vmem:[#allocation2 + $0xcc4] ss:$16 sps:$4 sm:$0xff]   ;;  %v9317_v7 = vld [vmem:[#allocation2 + $0xccc] ss:$16 sps:$4 sm:$0xff]  }
 0x1b9   :  { %5083 = vmatprep.subr.bf16.mxu0 %v9229_v8  ;;  %5575 = vmatprep.subr.bf16.mxu1 %v9232_v10  ;;  %v9312_v8 = vld [vmem:[#allocation2 + $0xcc0] ss:$16 sps:$4 sm:$0xff]   ;;  %v9315_v10 = vld [vmem:[#allocation2 + $0xcc8] ss:$16 sps:$4 sm:$0xff]  }
 0x1bc   :  { %5084 = vmatpush1.bf16.msra.mxu0 %v9227_v11  ;;  %5576 = vmatpush1.bf16.msra.mxu1 %v9230_v12  ;;  %v9320_v11 = vld [vmem:[#allocation2 + $0xce4] ss:$16 sps:$4 sm:$0xff]   ;;  %v9323_v12 = vld [vmem:[#allocation2 + $0xcec] ss:$16 sps:$4 sm:$0xff]  }
 0x1bd   :  { %5085 = vmatprep.subr.bf16.mxu0 %v9235_v13  ;;  %5577 = vmatprep.subr.bf16.mxu1 %v9238_v14  ;;  %v9318_v13 = vld [vmem:[#allocation2 + $0xce0] ss:$16 sps:$4 sm:$0xff]   ;;  %v9321_v14 = vld [vmem:[#allocation2 + $0xce8] ss:$16 sps:$4 sm:$0xff]  }
 0x1c0   :  { %5086 = vmatpush1.bf16.msra.mxu0 %v9233_v15  ;;  %5578 = vmatpush1.bf16.msra.mxu1 %v9236_v16  ;;  %v9326_v15 = vld [vmem:[#allocation2 + $0xd04] ss:$16 sps:$4 sm:$0xff]   ;;  %v9329_v16 = vld [vmem:[#allocation2 + $0xd0c] ss:$16 sps:$4 sm:$0xff]  }
 0x1c1   :  { %5087 = vmatprep.subr.bf16.mxu0 %v9241_v17  ;;  %5579 = vmatprep.subr.bf16.mxu1 %v9244_v18  ;;  %v9324_v17 = vld [vmem:[#allocation2 + $0xd00] ss:$16 sps:$4 sm:$0xff]   ;;  %v9327_v18 = vld [vmem:[#allocation2 + $0xd08] ss:$16 sps:$4 sm:$0xff]  }
 0x1c4   :  { %5088 = vmatpush1.bf16.msra.mxu0 %v9239_v19  ;;  %5580 = vmatpush1.bf16.msra.mxu1 %v9242_v20  ;;  %v9332_v19 = vld [vmem:[#allocation2 + $0xd24] ss:$16 sps:$4 sm:$0xff]   ;;  %v9335_v20 = vld [vmem:[#allocation2 + $0xd2c] ss:$16 sps:$4 sm:$0xff]  }
 0x1c5   :  { %5089 = vmatprep.subr.bf16.mxu0 %v9247_v21  ;;  %5581 = vmatprep.subr.bf16.mxu1 %v9250_v24  ;;  %v9330_v21 = vld [vmem:[#allocation2 + $0xd20] ss:$16 sps:$4 sm:$0xff]   ;;  %v9333_v24 = vld [vmem:[#allocation2 + $0xd28] ss:$16 sps:$4 sm:$0xff]  }
 0x1c8   :  { %5090 = vmatpush1.bf16.msra.mxu0 %v9245_v9  ;;  %5582 = vmatpush1.bf16.msra.mxu1 %v9248_v27  ;;  %v9338_v9 = vld [vmem:[#allocation2 + $0xd44] ss:$16 sps:$4 sm:$0xff]   ;;  %v9341_v27 = vld [vmem:[#allocation2 + $0xd4c] ss:$16 sps:$4 sm:$0xff]  }
 0x1c9   :  { %5091 = vmatprep.subr.bf16.mxu0 %v9253_v22  ;;  %5583 = vmatprep.subr.bf16.mxu1 %v9256_v28  ;;  %v9336_v22 = vld [vmem:[#allocation2 + $0xd40] ss:$16 sps:$4 sm:$0xff]   ;;  %v9339_v28 = vld [vmem:[#allocation2 + $0xd48] ss:$16 sps:$4 sm:$0xff]  }
 0x1cc   :  { %5092 = vmatpush1.bf16.msra.mxu0 %v9251_v30  ;;  %5584 = vmatpush1.bf16.msra.mxu1 %v9254_v31  ;;  %v9344_v30 = vld [vmem:[#allocation2 + $0xd64] ss:$16 sps:$4 sm:$0xff]   ;;  %v9347_v31 = vld [vmem:[#allocation2 + $0xd6c] ss:$16 sps:$4 sm:$0xff]  }
 0x1cd   :  { %5093 = vmatprep.subr.bf16.mxu0 %v9259_v32  ;;  %5585 = vmatprep.subr.bf16.mxu1 %v9262_v33  ;;  %v9342_v32 = vld [vmem:[#allocation2 + $0xd60] ss:$16 sps:$4 sm:$0xff]   ;;  %v9345_v33 = vld [vmem:[#allocation2 + $0xd68] ss:$16 sps:$4 sm:$0xff]  }
 0x1d0   :  { %5094 = vmatpush1.bf16.msra.mxu0 %v9257_v34  ;;  %5586 = vmatpush1.bf16.msra.mxu1 %v9260_v35  ;;  %v9350_v34 = vld [vmem:[#allocation2 + $0xd84] ss:$16 sps:$4 sm:$0xff]   ;;  %v9353_v35 = vld [vmem:[#allocation2 + $0xd8c] ss:$16 sps:$4 sm:$0xff]  }
 0x1d1   :  { %5095 = vmatprep.subr.bf16.mxu0 %v9265_v36  ;;  %5587 = vmatprep.subr.bf16.mxu1 %v9268_v25  ;;  %v9348_v36 = vld [vmem:[#allocation2 + $0xd80] ss:$16 sps:$4 sm:$0xff]   ;;  %v9351_v25 = vld [vmem:[#allocation2 + $0xd88] ss:$16 sps:$4 sm:$0xff]  }
 0x1d4   :  { %5096 = vmatpush1.bf16.msra.mxu0 %v9263_v39  ;;  %5588 = vmatpush1.bf16.msra.mxu1 %v9266_v40  ;;  %v9356_v39 = vld [vmem:[#allocation2 + $0xda4] ss:$16 sps:$4 sm:$0xff]   ;;  %v9359_v40 = vld [vmem:[#allocation2 + $0xdac] ss:$16 sps:$4 sm:$0xff]  }
 0x1d5   :  { %5097 = vmatprep.subr.bf16.mxu0 %v9271_v26  ;;  %5589 = vmatprep.subr.bf16.mxu1 %v9274_v41  ;;  %v9354_v26 = vld [vmem:[#allocation2 + $0xda0] ss:$16 sps:$4 sm:$0xff]   ;;  %v9357_v41 = vld [vmem:[#allocation2 + $0xda8] ss:$16 sps:$4 sm:$0xff]  }
 0x1d8   :  { %5098 = vmatpush1.bf16.msra.mxu0 %v9269_v43  ;;  %5590 = vmatpush1.bf16.msra.mxu1 %v9272_v23  ;;  %v9362_v43 = vld [vmem:[#allocation2 + $0xdc4] ss:$16 sps:$4 sm:$0xff]   ;;  %v9365_v23 = vld [vmem:[#allocation2 + $0xdcc] ss:$16 sps:$4 sm:$0xff]  }
 0x1d9   :  { %5108 = vmatprep.subr.bf16.mxu0 %v9278_v44  ;;  %5600 = vmatprep.subr.bf16.mxu1 %v9281_v45  ;;  %v155_v44 = vcombine.high %v10476_v38, %v10476_v38  ;;  %v9360_v45 = vld [vmem:[#allocation2 + $0xdc0] ss:$16 sps:$4 sm:$0xff]  }
 0x1db   :  { %5100 = vmatmul.mubr.bf16.vlgmr.msra.gmra.mrb[0].mxu0 %v240_v47  ;;  %5592 = vmatmul.mubr.bf16.vlgmr.msra.gmra.mrb[0].mxu1 %v240_v47  ;;  %v9368_v47 = vld [vmem:[#allocation2 + $0xde4] ss:$16 sps:$4 sm:$0xff]  }
 0x1dc   :  { %5109 = vmatpush1.bf16.msra.mxu0 %v9276_v48  ;;  %5601 = vmatpush1.bf16.msra.mxu1 %v9279_v50  ;;  %v9371_v48 = vld [vmem:[#allocation2 + $0xdec] ss:$16 sps:$4 sm:$0xff]   ;;  %v10489_v50 = vrot.slane %v155_v44, %v10418_v49  ;;  %v9452_v44 = vld [vmem:[#allocation2 + $0xfa4] ss:$16 sps:$4 sm:$0xff]  }
 0x1dd   :  { %5110 = vmatprep.subr.bf16.mxu0 %v9284_v29  ;;  %5602 = vmatprep.subr.bf16.mxu1 %v9287_v51  ;;  %v9366_v29 = vld [vmem:[#allocation2 + $0xde0] ss:$16 sps:$4 sm:$0xff]   ;;  %v9369_v51 = vld [vmem:[#allocation2 + $0xde8] ss:$16 sps:$4 sm:$0xff]  }
 0x1de   :  { %5140 = vmatprep.mubr.bf16.mxu0 %v243_v52  ;;  %5632 = vmatprep.mubr.bf16.mxu1 %v243_v52  ;;  %v9374_v52 = vld [vmem:[#allocation2 + $0xe04] ss:$16 sps:$4 sm:$0xff]   ;;  %v171_v38 = vcombine.high %v10489_v50, %v10489_v50 }
 0x1e0   :  { %5111 = vmatpush1.bf16.msra.mxu0 %v9282_v53  ;;  %5603 = vmatpush1.bf16.msra.mxu1 %v9285_v54  ;;  %v9377_v53 = vld [vmem:[#allocation2 + $0xe0c] ss:$16 sps:$4 sm:$0xff]   ;;  %v242_v54 = vpack.c.bf16 %v10480_v42, %v10480_v42  ;;  %v9384_v42 = vld [vmem:[#allocation2 + $0xe40] ss:$16 sps:$4 sm:$0xff]  }
 0x1e1   :  { %5112 = vmatprep.subr.bf16.mxu0 %v9290_v55  ;;  %5604 = vmatprep.subr.bf16.mxu1 %v9293_v56  ;;  %v9372_v55 = vld [vmem:[#allocation2 + $0xe00] ss:$16 sps:$4 sm:$0xff]   ;;  %v9375_v56 = vld [vmem:[#allocation2 + $0xe08] ss:$16 sps:$4 sm:$0xff]  }
 0x1e4   :  { %5113 = vmatpush1.bf16.msra.mxu0 %v9288_v37  ;;  %5605 = vmatpush1.bf16.msra.mxu1 %v9291_v57  ;;  %v9380_v37 = vld [vmem:[#allocation2 + $0xe24] ss:$16 sps:$4 sm:$0xff]   ;;  %v9383_v57 = vld [vmem:[#allocation2 + $0xe2c] ss:$16 sps:$4 sm:$0xff]  }
 0x1e5   :  { %5114 = vmatprep.subr.bf16.mxu0 %v9296_v58  ;;  %5606 = vmatprep.subr.bf16.mxu1 %v9299_v59  ;;  %v245_v58 = vpack.c.bf16 %v171_v38, %v171_v38  ;;  %v9378_v59 = vld [vmem:[#allocation2 + $0xe20] ss:$16 sps:$4 sm:$0xff]   ;;  %v9464_v38 = vld [vmem:[#allocation2 + $0xfe4] ss:$16 sps:$4 sm:$0xff]  }
 0x1e8   :  { %5115 = vmatpush1.bf16.msra.mxu0 %v9294_v60  ;;  %5607 = vmatpush1.bf16.msra.mxu1 %v9297_v61  ;;  %v9381_v60 = vld [vmem:[#allocation2 + $0xe28] ss:$16 sps:$4 sm:$0xff]   ;;  %v9386_v61 = vld [vmem:[#allocation2 + $0xe44] ss:$16 sps:$4 sm:$0xff]  }
 0x1e9   :  { %5116 = vmatprep.subr.bf16.mxu0 %v9302_v62  ;;  %5608 = vmatprep.subr.bf16.mxu1 %v9305_v63  ;;  %v9389_v62 = vld [vmem:[#allocation2 + $0xe4c] ss:$16 sps:$4 sm:$0xff]   ;;  %v9387_v63 = vld [vmem:[#allocation2 + $0xe48] ss:$16 sps:$4 sm:$0xff]  }
 0x1ec   :  { %5117 = vmatpush1.bf16.msra.mxu0 %v9300_v0  ;;  %5609 = vmatpush1.bf16.msra.mxu1 %v9303_v1  ;;  %v9392_v0 = vld [vmem:[#allocation2 + $0xe64] ss:$16 sps:$4 sm:$0xff]   ;;  %v9395_v1 = vld [vmem:[#allocation2 + $0xe6c] ss:$16 sps:$4 sm:$0xff]  }
 0x1ed   :  { %5118 = vmatprep.subr.bf16.mxu0 %v9308_v2  ;;  %5610 = vmatprep.subr.bf16.mxu1 %v9311_v3  ;;  %v9390_v2 = vld [vmem:[#allocation2 + $0xe60] ss:$16 sps:$4 sm:$0xff]   ;;  %v9393_v3 = vld [vmem:[#allocation2 + $0xe68] ss:$16 sps:$4 sm:$0xff]  }
 0x1f0   :  { %5119 = vmatpush1.bf16.msra.mxu0 %v9306_v4  ;;  %5611 = vmatpush1.bf16.msra.mxu1 %v9309_v5  ;;  %v9398_v4 = vld [vmem:[#allocation2 + $0xe84] ss:$16 sps:$4 sm:$0xff]   ;;  %v9401_v5 = vld [vmem:[#allocation2 + $0xe8c] ss:$16 sps:$4 sm:$0xff]  }
 0x1f1   :  { %5120 = vmatprep.subr.bf16.mxu0 %v9314_v6  ;;  %5612 = vmatprep.subr.bf16.mxu1 %v9317_v7  ;;  %v9396_v6 = vld [vmem:[#allocation2 + $0xe80] ss:$16 sps:$4 sm:$0xff]   ;;  %v9399_v7 = vld [vmem:[#allocation2 + $0xe88] ss:$16 sps:$4 sm:$0xff]  }
 0x1f4   :  { %5121 = vmatpush1.bf16.msra.mxu0 %v9312_v8  ;;  %5613 = vmatpush1.bf16.msra.mxu1 %v9315_v10  ;;  %v9404_v8 = vld [vmem:[#allocation2 + $0xea4] ss:$16 sps:$4 sm:$0xff]   ;;  %v9407_v10 = vld [vmem:[#allocation2 + $0xeac] ss:$16 sps:$4 sm:$0xff]  }
 0x1f5   :  { %5122 = vmatprep.subr.bf16.mxu0 %v9320_v11  ;;  %5614 = vmatprep.subr.bf16.mxu1 %v9323_v12  ;;  %v9402_v11 = vld [vmem:[#allocation2 + $0xea0] ss:$16 sps:$4 sm:$0xff]   ;;  %v9405_v12 = vld [vmem:[#allocation2 + $0xea8] ss:$16 sps:$4 sm:$0xff]  }
 0x1f8   :  { %5123 = vmatpush1.bf16.msra.mxu0 %v9318_v13  ;;  %5615 = vmatpush1.bf16.msra.mxu1 %v9321_v14  ;;  %v9410_v13 = vld [vmem:[#allocation2 + $0xec4] ss:$16 sps:$4 sm:$0xff]   ;;  %v9413_v14 = vld [vmem:[#allocation2 + $0xecc] ss:$16 sps:$4 sm:$0xff]  }
 0x1f9   :  { %5124 = vmatprep.subr.bf16.mxu0 %v9326_v15  ;;  %5616 = vmatprep.subr.bf16.mxu1 %v9329_v16  ;;  %v9408_v15 = vld [vmem:[#allocation2 + $0xec0] ss:$16 sps:$4 sm:$0xff]   ;;  %v9411_v16 = vld [vmem:[#allocation2 + $0xec8] ss:$16 sps:$4 sm:$0xff]  }
 0x1fc   :  { %5125 = vmatpush1.bf16.msra.mxu0 %v9324_v17  ;;  %5617 = vmatpush1.bf16.msra.mxu1 %v9327_v18  ;;  %v9416_v17 = vld [vmem:[#allocation2 + $0xee4] ss:$16 sps:$4 sm:$0xff]   ;;  %v9419_v18 = vld [vmem:[#allocation2 + $0xeec] ss:$16 sps:$4 sm:$0xff]  }
 0x1fd   :  { %5126 = vmatprep.subr.bf16.mxu0 %v9332_v19  ;;  %5618 = vmatprep.subr.bf16.mxu1 %v9335_v20  ;;  %v9414_v19 = vld [vmem:[#allocation2 + $0xee0] ss:$16 sps:$4 sm:$0xff]   ;;  %v9417_v20 = vld [vmem:[#allocation2 + $0xee8] ss:$16 sps:$4 sm:$0xff]  }
 0x200   :  { %5127 = vmatpush1.bf16.msra.mxu0 %v9330_v21  ;;  %5619 = vmatpush1.bf16.msra.mxu1 %v9333_v24  ;;  %v9422_v21 = vld [vmem:[#allocation2 + $0xf04] ss:$16 sps:$4 sm:$0xff]   ;;  %v9425_v24 = vld [vmem:[#allocation2 + $0xf0c] ss:$16 sps:$4 sm:$0xff]  }
 0x201   :  { %5128 = vmatprep.subr.bf16.mxu0 %v9338_v9  ;;  %5620 = vmatprep.subr.bf16.mxu1 %v9341_v27  ;;  %v9420_v9 = vld [vmem:[#allocation2 + $0xf00] ss:$16 sps:$4 sm:$0xff]   ;;  %v9423_v27 = vld [vmem:[#allocation2 + $0xf08] ss:$16 sps:$4 sm:$0xff]  }
 0x204   :  { %5129 = vmatpush1.bf16.msra.mxu0 %v9336_v22  ;;  %5621 = vmatpush1.bf16.msra.mxu1 %v9339_v28  ;;  %v9428_v22 = vld [vmem:[#allocation2 + $0xf24] ss:$16 sps:$4 sm:$0xff]   ;;  %v9431_v28 = vld [vmem:[#allocation2 + $0xf2c] ss:$16 sps:$4 sm:$0xff]  }
 0x205   :  { %5130 = vmatprep.subr.bf16.mxu0 %v9344_v30  ;;  %5622 = vmatprep.subr.bf16.mxu1 %v9347_v31  ;;  %v9426_v30 = vld [vmem:[#allocation2 + $0xf20] ss:$16 sps:$4 sm:$0xff]   ;;  %v9429_v31 = vld [vmem:[#allocation2 + $0xf28] ss:$16 sps:$4 sm:$0xff]  }
 0x208   :  { %5131 = vmatpush1.bf16.msra.mxu0 %v9342_v32  ;;  %5623 = vmatpush1.bf16.msra.mxu1 %v9345_v33  ;;  %v9434_v32 = vld [vmem:[#allocation2 + $0xf44] ss:$16 sps:$4 sm:$0xff]   ;;  %v9437_v33 = vld [vmem:[#allocation2 + $0xf4c] ss:$16 sps:$4 sm:$0xff]  }
 0x209   :  { %5132 = vmatprep.subr.bf16.mxu0 %v9350_v34  ;;  %5624 = vmatprep.subr.bf16.mxu1 %v9353_v35  ;;  %v9432_v34 = vld [vmem:[#allocation2 + $0xf40] ss:$16 sps:$4 sm:$0xff]   ;;  %v9435_v35 = vld [vmem:[#allocation2 + $0xf48] ss:$16 sps:$4 sm:$0xff]  }
 0x20c   :  { %5133 = vmatpush1.bf16.msra.mxu0 %v9348_v36  ;;  %5625 = vmatpush1.bf16.msra.mxu1 %v9351_v25  ;;  %v9440_v36 = vld [vmem:[#allocation2 + $0xf64] ss:$16 sps:$4 sm:$0xff]   ;;  %v9443_v25 = vld [vmem:[#allocation2 + $0xf6c] ss:$16 sps:$4 sm:$0xff]  }
 0x20d   :  { %5134 = vmatprep.subr.bf16.mxu0 %v9356_v39  ;;  %5626 = vmatprep.subr.bf16.mxu1 %v9359_v40  ;;  %v9438_v39 = vld [vmem:[#allocation2 + $0xf60] ss:$16 sps:$4 sm:$0xff]   ;;  %v9441_v40 = vld [vmem:[#allocation2 + $0xf68] ss:$16 sps:$4 sm:$0xff]  }
 0x210   :  { %5135 = vmatpush1.bf16.msra.mxu0 %v9354_v26  ;;  %5627 = vmatpush1.bf16.msra.mxu1 %v9357_v41  ;;  %v9446_v26 = vld [vmem:[#allocation2 + $0xf84] ss:$16 sps:$4 sm:$0xff]   ;;  %v9449_v41 = vld [vmem:[#allocation2 + $0xf8c] ss:$16 sps:$4 sm:$0xff]  }
 0x211   :  { %5136 = vmatprep.subr.bf16.mxu0 %v9362_v43  ;;  %5628 = vmatprep.subr.bf16.mxu1 %v9365_v23  ;;  %v9444_v43 = vld [vmem:[#allocation2 + $0xf80] ss:$16 sps:$4 sm:$0xff]   ;;  %v9447_v23 = vld [vmem:[#allocation2 + $0xf88] ss:$16 sps:$4 sm:$0xff]  }
 0x214   :  { %5137 = vmatpush1.bf16.msra.mxu0 %v9360_v45  ;;  %5629 = vmatpush1.bf16.msra.mxu1 %v9363_v46  ;;  %v9455_v45 = vld [vmem:[#allocation2 + $0xfac] ss:$16 sps:$4 sm:$0xff]   ;;  %v9450_v46 = vld [vmem:[#allocation2 + $0xfa0] ss:$16 sps:$4 sm:$0xff]  }
 0x215   :  { %5138 = vmatprep.subr.bf16.mxu0 %v9368_v47  ;;  %5630 = vmatprep.subr.bf16.mxu1 %v9371_v48  ;;  %v9453_v47 = vld [vmem:[#allocation2 + $0xfa8] ss:$16 sps:$4 sm:$0xff]   ;;  %v9458_v48 = vld [vmem:[#allocation2 + $0xfc4] ss:$16 sps:$4 sm:$0xff]  }
 0x218   :  { %5139 = vmatpush1.bf16.msra.mxu0 %v9366_v29  ;;  %5631 = vmatpush1.bf16.msra.mxu1 %v9369_v51  ;;  %v9461_v29 = vld [vmem:[#allocation2 + $0xfcc] ss:$16 sps:$4 sm:$0xff]   ;;  %v10498_v51 = vld [vmem:[%s10550_s0 + $0x20] sm:$0xff] }
 0x219   :  { %5149 = vmatprep.subr.bf16.mxu0 %v9374_v52  ;;  %5641 = vmatprep.subr.bf16.mxu1 %v9377_v53  ;;  %v9456_v52 = vld [vmem:[#allocation2 + $0xfc0] ss:$16 sps:$4 sm:$0xff]   ;;  %v9459_v53 = vld [vmem:[#allocation2 + $0xfc8] ss:$16 sps:$4 sm:$0xff]  }
 0x21b   :  { %5141 = vmatmul.mubr.bf16.vlgmr.msra.gmra.mrb[0].mxu0 %v242_v54  ;;  %5633 = vmatmul.mubr.bf16.vlgmr.msra.gmra.mrb[0].mxu1 %v242_v54  ;;  %v9467_v54 = vld [vmem:[#allocation2 + $0xfec] ss:$16 sps:$4 sm:$0xff]  }
 0x21c   :  { %5150 = vmatpush1.bf16.msra.mxu0 %v9372_v55  ;;  %5642 = vmatpush1.bf16.msra.mxu1 %v9375_v56  ;;  %v10502_v55 = vrot.slane %v10498_v51, %v10418_v49  ;;  %v9462_v56 = vld [vmem:[#allocation2 + $0xfe0] ss:$16 sps:$4 sm:$0xff]  }
 0x21d   :  { %5151 = vmatprep.subr.bf16.mxu0 %v9380_v37  ;;  %5643 = vmatprep.subr.bf16.mxu1 %v9383_v57  ;;  %v9465_v37 = vld [vmem:[#allocation2 + $0xfe8] ss:$16 sps:$4 sm:$0xff]   ;;  %v9471_v57 = vld [vmem:[#allocation2 + $0x1004] ss:$16 sps:$4 sm:$0xff]  }
 0x21e   :  { %5181 = vmatprep.mubr.bf16.mxu0 %v245_v58  ;;  %5673 = vmatprep.mubr.bf16.mxu1 %v245_v58  ;;  %v9474_v58 = vld [vmem:[#allocation2 + $0x100c] ss:$16 sps:$4 sm:$0xff]  }
 0x220   :  { %5152 = vmatpush1.bf16.msra.mxu0 %v9378_v59  ;;  %5644 = vmatpush1.bf16.msra.mxu1 %v9381_v60  ;;  %v187_v59 = vcombine.high %v10502_v55, %v10502_v55  ;;  %v244_v60 = vpack.c.bf16 %v10489_v50, %v10489_v50  ;;  %v9481_v50 = vld [vmem:[#allocation2 + $0x1040] ss:$16 sps:$4 sm:$0xff]  }
 0x221   :  { %5153 = vmatprep.subr.bf16.mxu0 %v9386_v61  ;;  %5645 = vmatprep.subr.bf16.mxu1 %v9389_v62  ;;  %v9469_v61 = vld [vmem:[#allocation2 + $0x1000] ss:$16 sps:$4 sm:$0xff]   ;;  %v9472_v62 = vld [vmem:[#allocation2 + $0x1008] ss:$16 sps:$4 sm:$0xff]  }
 0x224   :  { %5154 = vmatpush1.bf16.msra.mxu0 %v9384_v42  ;;  %5646 = vmatpush1.bf16.msra.mxu1 %v9387_v63  ;;  %v9477_v42 = vld [vmem:[#allocation2 + $0x1024] ss:$16 sps:$4 sm:$0xff]   ;;  %v9480_v63 = vld [vmem:[#allocation2 + $0x102c] ss:$16 sps:$4 sm:$0xff]  }
 0x225   :  { %5155 = vmatprep.subr.bf16.mxu0 %v9392_v0  ;;  %5647 = vmatprep.subr.bf16.mxu1 %v9395_v1  ;;  %v247_v0 = vpack.c.bf16 %v187_v59, %v187_v59  ;;  %v9475_v1 = vld [vmem:[#allocation2 + $0x1020] ss:$16 sps:$4 sm:$0xff]   ;;  %v9556_v59 = vld [vmem:[#allocation2 + $0x11c8] ss:$16 sps:$4 sm:$0xff]  }
 0x228   :  { %5156 = vmatpush1.bf16.msra.mxu0 %v9390_v2  ;;  %5648 = vmatpush1.bf16.msra.mxu1 %v9393_v3  ;;  %v9478_v2 = vld [vmem:[#allocation2 + $0x1028] ss:$16 sps:$4 sm:$0xff]   ;;  %v9483_v3 = vld [vmem:[#allocation2 + $0x1044] ss:$16 sps:$4 sm:$0xff]  }
 0x229   :  { %5157 = vmatprep.subr.bf16.mxu0 %v9398_v4  ;;  %5649 = vmatprep.subr.bf16.mxu1 %v9401_v5  ;;  %v9486_v4 = vld [vmem:[#allocation2 + $0x104c] ss:$16 sps:$4 sm:$0xff]   ;;  %v9484_v5 = vld [vmem:[#allocation2 + $0x1048] ss:$16 sps:$4 sm:$0xff]  }
 0x22c   :  { %5158 = vmatpush1.bf16.msra.mxu0 %v9396_v6  ;;  %5650 = vmatpush1.bf16.msra.mxu1 %v9399_v7  ;;  %v9489_v6 = vld [vmem:[#allocation2 + $0x1064] ss:$16 sps:$4 sm:$0xff]   ;;  %v9492_v7 = vld [vmem:[#allocation2 + $0x106c] ss:$16 sps:$4 sm:$0xff]  }
 0x22d   :  { %5159 = vmatprep.subr.bf16.mxu0 %v9404_v8  ;;  %5651 = vmatprep.subr.bf16.mxu1 %v9407_v10  ;;  %v9487_v8 = vld [vmem:[#allocation2 + $0x1060] ss:$16 sps:$4 sm:$0xff]   ;;  %v9490_v10 = vld [vmem:[#allocation2 + $0x1068] ss:$16 sps:$4 sm:$0xff]  }
 0x230   :  { %5160 = vmatpush1.bf16.msra.mxu0 %v9402_v11  ;;  %5652 = vmatpush1.bf16.msra.mxu1 %v9405_v12  ;;  %v9495_v11 = vld [vmem:[#allocation2 + $0x1084] ss:$16 sps:$4 sm:$0xff]   ;;  %v9498_v12 = vld [vmem:[#allocation2 + $0x108c] ss:$16 sps:$4 sm:$0xff]  }
 0x231   :  { %5161 = vmatprep.subr.bf16.mxu0 %v9410_v13  ;;  %5653 = vmatprep.subr.bf16.mxu1 %v9413_v14  ;;  %v9493_v13 = vld [vmem:[#allocation2 + $0x1080] ss:$16 sps:$4 sm:$0xff]   ;;  %v9496_v14 = vld [vmem:[#allocation2 + $0x1088] ss:$16 sps:$4 sm:$0xff]  }
 0x234   :  { %5162 = vmatpush1.bf16.msra.mxu0 %v9408_v15  ;;  %5654 = vmatpush1.bf16.msra.mxu1 %v9411_v16  ;;  %v9501_v15 = vld [vmem:[#allocation2 + $0x10a4] ss:$16 sps:$4 sm:$0xff]   ;;  %v9504_v16 = vld [vmem:[#allocation2 + $0x10ac] ss:$16 sps:$4 sm:$0xff]  }
 0x235   :  { %5163 = vmatprep.subr.bf16.mxu0 %v9416_v17  ;;  %5655 = vmatprep.subr.bf16.mxu1 %v9419_v18  ;;  %v9499_v17 = vld [vmem:[#allocation2 + $0x10a0] ss:$16 sps:$4 sm:$0xff]   ;;  %v9502_v18 = vld [vmem:[#allocation2 + $0x10a8] ss:$16 sps:$4 sm:$0xff]  }
 0x238   :  { %5164 = vmatpush1.bf16.msra.mxu0 %v9414_v19  ;;  %5656 = vmatpush1.bf16.msra.mxu1 %v9417_v20  ;;  %v9507_v19 = vld [vmem:[#allocation2 + $0x10c4] ss:$16 sps:$4 sm:$0xff]   ;;  %v9510_v20 = vld [vmem:[#allocation2 + $0x10cc] ss:$16 sps:$4 sm:$0xff]  }
 0x239   :  { %5165 = vmatprep.subr.bf16.mxu0 %v9422_v21  ;;  %5657 = vmatprep.subr.bf16.mxu1 %v9425_v24  ;;  %v9505_v21 = vld [vmem:[#allocation2 + $0x10c0] ss:$16 sps:$4 sm:$0xff]   ;;  %v9508_v24 = vld [vmem:[#allocation2 + $0x10c8] ss:$16 sps:$4 sm:$0xff]  }
 0x23c   :  { %5166 = vmatpush1.bf16.msra.mxu0 %v9420_v9  ;;  %5658 = vmatpush1.bf16.msra.mxu1 %v9423_v27  ;;  %v9513_v9 = vld [vmem:[#allocation2 + $0x10e4] ss:$16 sps:$4 sm:$0xff]   ;;  %v9516_v27 = vld [vmem:[#allocation2 + $0x10ec] ss:$16 sps:$4 sm:$0xff]  }
 0x23d   :  { %5167 = vmatprep.subr.bf16.mxu0 %v9428_v22  ;;  %5659 = vmatprep.subr.bf16.mxu1 %v9431_v28  ;;  %v9511_v22 = vld [vmem:[#allocation2 + $0x10e0] ss:$16 sps:$4 sm:$0xff]   ;;  %v9514_v28 = vld [vmem:[#allocation2 + $0x10e8] ss:$16 sps:$4 sm:$0xff]  }
 0x240   :  { %5168 = vmatpush1.bf16.msra.mxu0 %v9426_v30  ;;  %5660 = vmatpush1.bf16.msra.mxu1 %v9429_v31  ;;  %v9519_v30 = vld [vmem:[#allocation2 + $0x1104] ss:$16 sps:$4 sm:$0xff]   ;;  %v9522_v31 = vld [vmem:[#allocation2 + $0x110c] ss:$16 sps:$4 sm:$0xff]  }
 0x241   :  { %5169 = vmatprep.subr.bf16.mxu0 %v9434_v32  ;;  %5661 = vmatprep.subr.bf16.mxu1 %v9437_v33  ;;  %v9517_v32 = vld [vmem:[#allocation2 + $0x1100] ss:$16 sps:$4 sm:$0xff]   ;;  %v9520_v33 = vld [vmem:[#allocation2 + $0x1108] ss:$16 sps:$4 sm:$0xff]  }
 0x244   :  { %5170 = vmatpush1.bf16.msra.mxu0 %v9432_v34  ;;  %5662 = vmatpush1.bf16.msra.mxu1 %v9435_v35  ;;  %v9525_v34 = vld [vmem:[#allocation2 + $0x1124] ss:$16 sps:$4 sm:$0xff]   ;;  %v9528_v35 = vld [vmem:[#allocation2 + $0x112c] ss:$16 sps:$4 sm:$0xff]  }
 0x245   :  { %5171 = vmatprep.subr.bf16.mxu0 %v9440_v36  ;;  %5663 = vmatprep.subr.bf16.mxu1 %v9443_v25  ;;  %v9523_v36 = vld [vmem:[#allocation2 + $0x1120] ss:$16 sps:$4 sm:$0xff]   ;;  %v9526_v25 = vld [vmem:[#allocation2 + $0x1128] ss:$16 sps:$4 sm:$0xff]  }
 0x248   :  { %5172 = vmatpush1.bf16.msra.mxu0 %v9438_v39  ;;  %5664 = vmatpush1.bf16.msra.mxu1 %v9441_v40  ;;  %v9531_v39 = vld [vmem:[#allocation2 + $0x1144] ss:$16 sps:$4 sm:$0xff]   ;;  %v9534_v40 = vld [vmem:[#allocation2 + $0x114c] ss:$16 sps:$4 sm:$0xff]  }
 0x249   :  { %5173 = vmatprep.subr.bf16.mxu0 %v9446_v26  ;;  %5665 = vmatprep.subr.bf16.mxu1 %v9449_v41  ;;  %v9529_v26 = vld [vmem:[#allocation2 + $0x1140] ss:$16 sps:$4 sm:$0xff]   ;;  %v9532_v41 = vld [vmem:[#allocation2 + $0x1148] ss:$16 sps:$4 sm:$0xff]  }
 0x24c   :  { %5174 = vmatpush1.bf16.msra.mxu0 %v9444_v43  ;;  %5666 = vmatpush1.bf16.msra.mxu1 %v9447_v23  ;;  %v9537_v43 = vld [vmem:[#allocation2 + $0x1164] ss:$16 sps:$4 sm:$0xff]   ;;  %v9540_v23 = vld [vmem:[#allocation2 + $0x116c] ss:$16 sps:$4 sm:$0xff]  }
 0x24d   :  { %5175 = vmatprep.subr.bf16.mxu0 %v9452_v44  ;;  %5667 = vmatprep.subr.bf16.mxu1 %v9455_v45  ;;  %v9535_v44 = vld [vmem:[#allocation2 + $0x1160] ss:$16 sps:$4 sm:$0xff]   ;;  %v9538_v45 = vld [vmem:[#allocation2 + $0x1168] ss:$16 sps:$4 sm:$0xff]  }
 0x250   :  { %5176 = vmatpush1.bf16.msra.mxu0 %v9450_v46  ;;  %5668 = vmatpush1.bf16.msra.mxu1 %v9453_v47  ;;  %v9543_v46 = vld [vmem:[#allocation2 + $0x1184] ss:$16 sps:$4 sm:$0xff]   ;;  %v9546_v47 = vld [vmem:[#allocation2 + $0x118c] ss:$16 sps:$4 sm:$0xff]  }
 0x251   :  { %5177 = vmatprep.subr.bf16.mxu0 %v9458_v48  ;;  %5669 = vmatprep.subr.bf16.mxu1 %v9461_v29  ;;  %v9541_v48 = vld [vmem:[#allocation2 + $0x1180] ss:$16 sps:$4 sm:$0xff]   ;;  %v9544_v29 = vld [vmem:[#allocation2 + $0x1188] ss:$16 sps:$4 sm:$0xff]  }
 0x254   :  { %5178 = vmatpush1.bf16.msra.mxu0 %v9456_v52  ;;  %5670 = vmatpush1.bf16.msra.mxu1 %v9459_v53  ;;  %v9549_v52 = vld [vmem:[#allocation2 + $0x11a4] ss:$16 sps:$4 sm:$0xff]   ;;  %v9552_v53 = vld [vmem:[#allocation2 + $0x11ac] ss:$16 sps:$4 sm:$0xff]  }
 0x255   :  { %5179 = vmatprep.subr.bf16.mxu0 %v9464_v38  ;;  %5671 = vmatprep.subr.bf16.mxu1 %v9467_v54  ;;  %v9547_v38 = vld [vmem:[#allocation2 + $0x11a0] ss:$16 sps:$4 sm:$0xff]   ;;  %v9550_v54 = vld [vmem:[#allocation2 + $0x11a8] ss:$16 sps:$4 sm:$0xff]  }
 0x258   :  { %5180 = vmatpush1.bf16.msra.mxu0 %v9462_v56  ;;  %5672 = vmatpush1.bf16.msra.mxu1 %v9465_v37  ;;  %v9555_v56 = vld [vmem:[#allocation2 + $0x11c4] ss:$16 sps:$4 sm:$0xff]   ;;  %v9558_v37 = vld [vmem:[#allocation2 + $0x11cc] ss:$16 sps:$4 sm:$0xff]  }
 0x259   :  { %5190 = vmatprep.subr.bf16.mxu0 %v9471_v57  ;;  %5682 = vmatprep.subr.bf16.mxu1 %v9474_v58  ;;  %v172_v57 = vcombine.high %v10498_v51, %v10498_v51  ;;  %v9553_v58 = vld [vmem:[#allocation2 + $0x11c0] ss:$16 sps:$4 sm:$0xff]  }
 0x25b   :  { %5182 = vmatmul.mubr.bf16.vlgmr.msra.gmra.mrb[0].mxu0 %v244_v60  ;;  %5674 = vmatmul.mubr.bf16.vlgmr.msra.gmra.mrb[0].mxu1 %v244_v60  ;;  %v9561_v60 = vld [vmem:[#allocation2 + $0x11e4] ss:$16 sps:$4 sm:$0xff]  }
 0x25c   :  { %5191 = vmatpush1.bf16.msra.mxu0 %v9469_v61  ;;  %5683 = vmatpush1.bf16.msra.mxu1 %v9472_v62  ;;  %v9564_v61 = vld [vmem:[#allocation2 + $0x11ec] ss:$16 sps:$4 sm:$0xff]   ;;  %v10511_v62 = vrot.slane %v172_v57, %v10418_v49  ;;  %v9645_v57 = vld [vmem:[#allocation2 + $0x13a4] ss:$16 sps:$4 sm:$0xff]  }
 0x25d   :  { %5192 = vmatprep.subr.bf16.mxu0 %v9477_v42  ;;  %5684 = vmatprep.subr.bf16.mxu1 %v9480_v63  ;;  %v9559_v42 = vld [vmem:[#allocation2 + $0x11e0] ss:$16 sps:$4 sm:$0xff]   ;;  %v9562_v63 = vld [vmem:[#allocation2 + $0x11e8] ss:$16 sps:$4 sm:$0xff]  }
 0x25e   :  { %5222 = vmatprep.mubr.bf16.mxu0 %v247_v0  ;;  %5714 = vmatprep.mubr.bf16.mxu1 %v247_v0  ;;  %v9567_v0 = vld [vmem:[#allocation2 + $0x1204] ss:$16 sps:$4 sm:$0xff]   ;;  %v188_v51 = vcombine.high %v10511_v62, %v10511_v62 }
 0x260   :  { %5193 = vmatpush1.bf16.msra.mxu0 %v9475_v1  ;;  %5685 = vmatpush1.bf16.msra.mxu1 %v9478_v2  ;;  %v9570_v1 = vld [vmem:[#allocation2 + $0x120c] ss:$16 sps:$4 sm:$0xff]   ;;  %v246_v2 = vpack.c.bf16 %v10502_v55, %v10502_v55  ;;  %v9577_v55 = vld [vmem:[#allocation2 + $0x1240] ss:$16 sps:$4 sm:$0xff]  }
 0x261   :  { %5194 = vmatprep.subr.bf16.mxu0 %v9483_v3  ;;  %5686 = vmatprep.subr.bf16.mxu1 %v9486_v4  ;;  %v9565_v3 = vld [vmem:[#allocation2 + $0x1200] ss:$16 sps:$4 sm:$0xff]   ;;  %v9568_v4 = vld [vmem:[#allocation2 + $0x1208] ss:$16 sps:$4 sm:$0xff]  }
 0x264   :  { %5195 = vmatpush1.bf16.msra.mxu0 %v9481_v50  ;;  %5687 = vmatpush1.bf16.msra.mxu1 %v9484_v5  ;;  %v9573_v50 = vld [vmem:[#allocation2 + $0x1224] ss:$16 sps:$4 sm:$0xff]   ;;  %v9576_v5 = vld [vmem:[#allocation2 + $0x122c] ss:$16 sps:$4 sm:$0xff]  }
 0x265   :  { %5196 = vmatprep.subr.bf16.mxu0 %v9489_v6  ;;  %5688 = vmatprep.subr.bf16.mxu1 %v9492_v7  ;;  %v249_v6 = vpack.c.bf16 %v188_v51, %v188_v51  ;;  %v9571_v7 = vld [vmem:[#allocation2 + $0x1220] ss:$16 sps:$4 sm:$0xff]   ;;  %v9657_v51 = vld [vmem:[#allocation2 + $0x13e4] ss:$16 sps:$4 sm:$0xff]  }
 0x268   :  { %5197 = vmatpush1.bf16.msra.mxu0 %v9487_v8  ;;  %5689 = vmatpush1.bf16.msra.mxu1 %v9490_v10  ;;  %v9574_v8 = vld [vmem:[#allocation2 + $0x1228] ss:$16 sps:$4 sm:$0xff]   ;;  %v9579_v10 = vld [vmem:[#allocation2 + $0x1244] ss:$16 sps:$4 sm:$0xff]  }
 0x269   :  { %5198 = vmatprep.subr.bf16.mxu0 %v9495_v11  ;;  %5690 = vmatprep.subr.bf16.mxu1 %v9498_v12  ;;  %v9582_v11 = vld [vmem:[#allocation2 + $0x124c] ss:$16 sps:$4 sm:$0xff]   ;;  %v9580_v12 = vld [vmem:[#allocation2 + $0x1248] ss:$16 sps:$4 sm:$0xff]  }
 0x26c   :  { %5199 = vmatpush1.bf16.msra.mxu0 %v9493_v13  ;;  %5691 = vmatpush1.bf16.msra.mxu1 %v9496_v14  ;;  %v9585_v13 = vld [vmem:[#allocation2 + $0x1264] ss:$16 sps:$4 sm:$0xff]   ;;  %v9588_v14 = vld [vmem:[#allocation2 + $0x126c] ss:$16 sps:$4 sm:$0xff]  }
 0x26d   :  { %5200 = vmatprep.subr.bf16.mxu0 %v9501_v15  ;;  %5692 = vmatprep.subr.bf16.mxu1 %v9504_v16  ;;  %v9583_v15 = vld [vmem:[#allocation2 + $0x1260] ss:$16 sps:$4 sm:$0xff]   ;;  %v9586_v16 = vld [vmem:[#allocation2 + $0x1268] ss:$16 sps:$4 sm:$0xff]  }
 0x270   :  { %5201 = vmatpush1.bf16.msra.mxu0 %v9499_v17  ;;  %5693 = vmatpush1.bf16.msra.mxu1 %v9502_v18  ;;  %v9591_v17 = vld [vmem:[#allocation2 + $0x1284] ss:$16 sps:$4 sm:$0xff]   ;;  %v9594_v18 = vld [vmem:[#allocation2 + $0x128c] ss:$16 sps:$4 sm:$0xff]  }
 0x271   :  { %5202 = vmatprep.subr.bf16.mxu0 %v9507_v19  ;;  %5694 = vmatprep.subr.bf16.mxu1 %v9510_v20  ;;  %v9589_v19 = vld [vmem:[#allocation2 + $0x1280] ss:$16 sps:$4 sm:$0xff]   ;;  %v9592_v20 = vld [vmem:[#allocation2 + $0x1288] ss:$16 sps:$4 sm:$0xff]  }
 0x274   :  { %5203 = vmatpush1.bf16.msra.mxu0 %v9505_v21  ;;  %5695 = vmatpush1.bf16.msra.mxu1 %v9508_v24  ;;  %v9597_v21 = vld [vmem:[#allocation2 + $0x12a4] ss:$16 sps:$4 sm:$0xff]   ;;  %v9600_v24 = vld [vmem:[#allocation2 + $0x12ac] ss:$16 sps:$4 sm:$0xff]  }
 0x275   :  { %5204 = vmatprep.subr.bf16.mxu0 %v9513_v9  ;;  %5696 = vmatprep.subr.bf16.mxu1 %v9516_v27  ;;  %v9595_v9 = vld [vmem:[#allocation2 + $0x12a0] ss:$16 sps:$4 sm:$0xff]   ;;  %v9598_v27 = vld [vmem:[#allocation2 + $0x12a8] ss:$16 sps:$4 sm:$0xff]  }
 0x278   :  { %5205 = vmatpush1.bf16.msra.mxu0 %v9511_v22  ;;  %5697 = vmatpush1.bf16.msra.mxu1 %v9514_v28  ;;  %v9603_v22 = vld [vmem:[#allocation2 + $0x12c4] ss:$16 sps:$4 sm:$0xff]   ;;  %v9606_v28 = vld [vmem:[#allocation2 + $0x12cc] ss:$16 sps:$4 sm:$0xff]  }
 0x279   :  { %5206 = vmatprep.subr.bf16.mxu0 %v9519_v30  ;;  %5698 = vmatprep.subr.bf16.mxu1 %v9522_v31  ;;  %v9601_v30 = vld [vmem:[#allocation2 + $0x12c0] ss:$16 sps:$4 sm:$0xff]   ;;  %v9604_v31 = vld [vmem:[#allocation2 + $0x12c8] ss:$16 sps:$4 sm:$0xff]  }
 0x27c   :  { %5207 = vmatpush1.bf16.msra.mxu0 %v9517_v32  ;;  %5699 = vmatpush1.bf16.msra.mxu1 %v9520_v33  ;;  %v9609_v32 = vld [vmem:[#allocation2 + $0x12e4] ss:$16 sps:$4 sm:$0xff]   ;;  %v9612_v33 = vld [vmem:[#allocation2 + $0x12ec] ss:$16 sps:$4 sm:$0xff]  }
 0x27d   :  { %5208 = vmatprep.subr.bf16.mxu0 %v9525_v34  ;;  %5700 = vmatprep.subr.bf16.mxu1 %v9528_v35  ;;  %v9607_v34 = vld [vmem:[#allocation2 + $0x12e0] ss:$16 sps:$4 sm:$0xff]   ;;  %v9610_v35 = vld [vmem:[#allocation2 + $0x12e8] ss:$16 sps:$4 sm:$0xff]  }
 0x280   :  { %5209 = vmatpush1.bf16.msra.mxu0 %v9523_v36  ;;  %5701 = vmatpush1.bf16.msra.mxu1 %v9526_v25  ;;  %v9615_v36 = vld [vmem:[#allocation2 + $0x1304] ss:$16 sps:$4 sm:$0xff]   ;;  %v9618_v25 = vld [vmem:[#allocation2 + $0x130c] ss:$16 sps:$4 sm:$0xff]  }
 0x281   :  { %5210 = vmatprep.subr.bf16.mxu0 %v9531_v39  ;;  %5702 = vmatprep.subr.bf16.mxu1 %v9534_v40  ;;  %v9613_v39 = vld [vmem:[#allocation2 + $0x1300] ss:$16 sps:$4 sm:$0xff]   ;;  %v9616_v40 = vld [vmem:[#allocation2 + $0x1308] ss:$16 sps:$4 sm:$0xff]  }
 0x284   :  { %5211 = vmatpush1.bf16.msra.mxu0 %v9529_v26  ;;  %5703 = vmatpush1.bf16.msra.mxu1 %v9532_v41  ;;  %v9621_v26 = vld [vmem:[#allocation2 + $0x1324] ss:$16 sps:$4 sm:$0xff]   ;;  %v9624_v41 = vld [vmem:[#allocation2 + $0x132c] ss:$16 sps:$4 sm:$0xff]  }
 0x285   :  { %5212 = vmatprep.subr.bf16.mxu0 %v9537_v43  ;;  %5704 = vmatprep.subr.bf16.mxu1 %v9540_v23  ;;  %v9619_v43 = vld [vmem:[#allocation2 + $0x1320] ss:$16 sps:$4 sm:$0xff]   ;;  %v9622_v23 = vld [vmem:[#allocation2 + $0x1328] ss:$16 sps:$4 sm:$0xff]  }
 0x288   :  { %5213 = vmatpush1.bf16.msra.mxu0 %v9535_v44  ;;  %5705 = vmatpush1.bf16.msra.mxu1 %v9538_v45  ;;  %v9627_v44 = vld [vmem:[#allocation2 + $0x1344] ss:$16 sps:$4 sm:$0xff]   ;;  %v9630_v45 = vld [vmem:[#allocation2 + $0x134c] ss:$16 sps:$4 sm:$0xff]  }
 0x289   :  { %5214 = vmatprep.subr.bf16.mxu0 %v9543_v46  ;;  %5706 = vmatprep.subr.bf16.mxu1 %v9546_v47  ;;  %v9625_v46 = vld [vmem:[#allocation2 + $0x1340] ss:$16 sps:$4 sm:$0xff]   ;;  %v9628_v47 = vld [vmem:[#allocation2 + $0x1348] ss:$16 sps:$4 sm:$0xff]  }
 0x28c   :  { %5215 = vmatpush1.bf16.msra.mxu0 %v9541_v48  ;;  %5707 = vmatpush1.bf16.msra.mxu1 %v9544_v29  ;;  %v9633_v48 = vld [vmem:[#allocation2 + $0x1364] ss:$16 sps:$4 sm:$0xff]   ;;  %v9636_v29 = vld [vmem:[#allocation2 + $0x136c] ss:$16 sps:$4 sm:$0xff]  }
 0x28d   :  { %5216 = vmatprep.subr.bf16.mxu0 %v9549_v52  ;;  %5708 = vmatprep.subr.bf16.mxu1 %v9552_v53  ;;  %v9631_v52 = vld [vmem:[#allocation2 + $0x1360] ss:$16 sps:$4 sm:$0xff]   ;;  %v9634_v53 = vld [vmem:[#allocation2 + $0x1368] ss:$16 sps:$4 sm:$0xff]  }
 0x290   :  { %5217 = vmatpush1.bf16.msra.mxu0 %v9547_v38  ;;  %5709 = vmatpush1.bf16.msra.mxu1 %v9550_v54  ;;  %v9639_v38 = vld [vmem:[#allocation2 + $0x1384] ss:$16 sps:$4 sm:$0xff]   ;;  %v9642_v54 = vld [vmem:[#allocation2 + $0x138c] ss:$16 sps:$4 sm:$0xff]  }
 0x291   :  { %5218 = vmatprep.subr.bf16.mxu0 %v9555_v56  ;;  %5710 = vmatprep.subr.bf16.mxu1 %v9558_v37  ;;  %v9637_v56 = vld [vmem:[#allocation2 + $0x1380] ss:$16 sps:$4 sm:$0xff]   ;;  %v9640_v37 = vld [vmem:[#allocation2 + $0x1388] ss:$16 sps:$4 sm:$0xff]  }
 0x294   :  { %5219 = vmatpush1.bf16.msra.mxu0 %v9553_v58  ;;  %5711 = vmatpush1.bf16.msra.mxu1 %v9556_v59  ;;  %v9648_v58 = vld [vmem:[#allocation2 + $0x13ac] ss:$16 sps:$4 sm:$0xff]   ;;  %v9643_v59 = vld [vmem:[#allocation2 + $0x13a0] ss:$16 sps:$4 sm:$0xff]  }
 0x295   :  { %5220 = vmatprep.subr.bf16.mxu0 %v9561_v60  ;;  %5712 = vmatprep.subr.bf16.mxu1 %v9564_v61  ;;  %v9646_v60 = vld [vmem:[#allocation2 + $0x13a8] ss:$16 sps:$4 sm:$0xff]   ;;  %v9651_v61 = vld [vmem:[#allocation2 + $0x13c4] ss:$16 sps:$4 sm:$0xff]  }
 0x298   :  { %5221 = vmatpush1.bf16.msra.mxu0 %v9559_v42  ;;  %5713 = vmatpush1.bf16.msra.mxu1 %v9562_v63  ;;  %v9654_v42 = vld [vmem:[#allocation2 + $0x13cc] ss:$16 sps:$4 sm:$0xff]  }
 0x299   :  { %5231 = vmatprep.subr.bf16.mxu0 %v9567_v0  ;;  %5723 = vmatprep.subr.bf16.mxu1 %v9570_v1  ;;  %v10520_v63 = vld [vmem:[%s10550_s0 + $0x28] sm:$0xff]  ;;  %v9649_v0 = vld [vmem:[#allocation2 + $0x13c0] ss:$16 sps:$4 sm:$0xff]  }
 0x29a   :  { %v9652_v1 = vld [vmem:[#allocation2 + $0x13c8] ss:$16 sps:$4 sm:$0xff]  }
 0x29b   :  { %5223 = vmatmul.mubr.bf16.vlgmr.msra.gmra.mrb[0].mxu0 %v246_v2  ;;  %5715 = vmatmul.mubr.bf16.vlgmr.msra.gmra.mrb[0].mxu1 %v246_v2  ;;  %v9660_v2 = vld [vmem:[#allocation2 + $0x13ec] ss:$16 sps:$4 sm:$0xff]  }
 0x29c   :  { %5232 = vmatpush1.bf16.msra.mxu0 %v9565_v3  ;;  %5724 = vmatpush1.bf16.msra.mxu1 %v9568_v4  ;;  %v10524_v3 = vrot.slane %v10520_v63, %v10418_v49  ;;  %v9655_v4 = vld [vmem:[#allocation2 + $0x13e0] ss:$16 sps:$4 sm:$0xff]  }
 0x29d   :  { %5233 = vmatprep.subr.bf16.mxu0 %v9573_v50  ;;  %5725 = vmatprep.subr.bf16.mxu1 %v9576_v5  ;;  %v9658_v50 = vld [vmem:[#allocation2 + $0x13e8] ss:$16 sps:$4 sm:$0xff]   ;;  %v9664_v5 = vld [vmem:[#allocation2 + $0x1404] ss:$16 sps:$4 sm:$0xff]  }
 0x29e   :  { %5263 = vmatprep.mubr.bf16.mxu0 %v249_v6  ;;  %5755 = vmatprep.mubr.bf16.mxu1 %v249_v6  ;;  %v9667_v6 = vld [vmem:[#allocation2 + $0x140c] ss:$16 sps:$4 sm:$0xff]  }
 0x2a0   :  { %5234 = vmatpush1.bf16.msra.mxu0 %v9571_v7  ;;  %5726 = vmatpush1.bf16.msra.mxu1 %v9574_v8  ;;  %v204_v7 = vcombine.high %v10524_v3, %v10524_v3  ;;  %v248_v8 = vpack.c.bf16 %v10511_v62, %v10511_v62  ;;  %v9674_v62 = vld [vmem:[#allocation2 + $0x1440] ss:$16 sps:$4 sm:$0xff]  }
 0x2a1   :  { %5235 = vmatprep.subr.bf16.mxu0 %v9579_v10  ;;  %5727 = vmatprep.subr.bf16.mxu1 %v9582_v11  ;;  %v9662_v10 = vld [vmem:[#allocation2 + $0x1400] ss:$16 sps:$4 sm:$0xff]   ;;  %v9665_v11 = vld [vmem:[#allocation2 + $0x1408] ss:$16 sps:$4 sm:$0xff]  }
 0x2a4   :  { %5236 = vmatpush1.bf16.msra.mxu0 %v9577_v55  ;;  %5728 = vmatpush1.bf16.msra.mxu1 %v9580_v12  ;;  %v9670_v55 = vld [vmem:[#allocation2 + $0x1424] ss:$16 sps:$4 sm:$0xff]   ;;  %v9673_v12 = vld [vmem:[#allocation2 + $0x142c] ss:$16 sps:$4 sm:$0xff]  }
 0x2a5   :  { %5237 = vmatprep.subr.bf16.mxu0 %v9585_v13  ;;  %5729 = vmatprep.subr.bf16.mxu1 %v9588_v14  ;;  %v251_v13 = vpack.c.bf16 %v204_v7, %v204_v7  ;;  %v9668_v14 = vld [vmem:[#allocation2 + $0x1420] ss:$16 sps:$4 sm:$0xff]   ;;  %v9749_v7 = vld [vmem:[#allocation2 + $0x15c8] ss:$16 sps:$4 sm:$0xff]  }
 0x2a8   :  { %5238 = vmatpush1.bf16.msra.mxu0 %v9583_v15  ;;  %5730 = vmatpush1.bf16.msra.mxu1 %v9586_v16  ;;  %v9671_v15 = vld [vmem:[#allocation2 + $0x1428] ss:$16 sps:$4 sm:$0xff]   ;;  %v9676_v16 = vld [vmem:[#allocation2 + $0x1444] ss:$16 sps:$4 sm:$0xff]  }
 0x2a9   :  { %5239 = vmatprep.subr.bf16.mxu0 %v9591_v17  ;;  %5731 = vmatprep.subr.bf16.mxu1 %v9594_v18  ;;  %v9679_v17 = vld [vmem:[#allocation2 + $0x144c] ss:$16 sps:$4 sm:$0xff]   ;;  %v9677_v18 = vld [vmem:[#allocation2 + $0x1448] ss:$16 sps:$4 sm:$0xff]  }
 0x2ac   :  { %5240 = vmatpush1.bf16.msra.mxu0 %v9589_v19  ;;  %5732 = vmatpush1.bf16.msra.mxu1 %v9592_v20  ;;  %v9682_v19 = vld [vmem:[#allocation2 + $0x1464] ss:$16 sps:$4 sm:$0xff]   ;;  %v9685_v20 = vld [vmem:[#allocation2 + $0x146c] ss:$16 sps:$4 sm:$0xff]  }
 0x2ad   :  { %5241 = vmatprep.subr.bf16.mxu0 %v9597_v21  ;;  %5733 = vmatprep.subr.bf16.mxu1 %v9600_v24  ;;  %v9680_v21 = vld [vmem:[#allocation2 + $0x1460] ss:$16 sps:$4 sm:$0xff]   ;;  %v9683_v24 = vld [vmem:[#allocation2 + $0x1468] ss:$16 sps:$4 sm:$0xff]  }
 0x2b0   :  { %5242 = vmatpush1.bf16.msra.mxu0 %v9595_v9  ;;  %5734 = vmatpush1.bf16.msra.mxu1 %v9598_v27  ;;  %v9688_v9 = vld [vmem:[#allocation2 + $0x1484] ss:$16 sps:$4 sm:$0xff]   ;;  %v9691_v27 = vld [vmem:[#allocation2 + $0x148c] ss:$16 sps:$4 sm:$0xff]  }
 0x2b1   :  { %5243 = vmatprep.subr.bf16.mxu0 %v9603_v22  ;;  %5735 = vmatprep.subr.bf16.mxu1 %v9606_v28  ;;  %v9686_v22 = vld [vmem:[#allocation2 + $0x1480] ss:$16 sps:$4 sm:$0xff]   ;;  %v9689_v28 = vld [vmem:[#allocation2 + $0x1488] ss:$16 sps:$4 sm:$0xff]  }
 0x2b4   :  { %5244 = vmatpush1.bf16.msra.mxu0 %v9601_v30  ;;  %5736 = vmatpush1.bf16.msra.mxu1 %v9604_v31  ;;  %v9694_v30 = vld [vmem:[#allocation2 + $0x14a4] ss:$16 sps:$4 sm:$0xff]   ;;  %v9697_v31 = vld [vmem:[#allocation2 + $0x14ac] ss:$16 sps:$4 sm:$0xff]  }
 0x2b5   :  { %5245 = vmatprep.subr.bf16.mxu0 %v9609_v32  ;;  %5737 = vmatprep.subr.bf16.mxu1 %v9612_v33  ;;  %v9692_v32 = vld [vmem:[#allocation2 + $0x14a0] ss:$16 sps:$4 sm:$0xff]   ;;  %v9695_v33 = vld [vmem:[#allocation2 + $0x14a8] ss:$16 sps:$4 sm:$0xff]  }
 0x2b8   :  { %5246 = vmatpush1.bf16.msra.mxu0 %v9607_v34  ;;  %5738 = vmatpush1.bf16.msra.mxu1 %v9610_v35  ;;  %v9700_v34 = vld [vmem:[#allocation2 + $0x14c4] ss:$16 sps:$4 sm:$0xff]   ;;  %v9703_v35 = vld [vmem:[#allocation2 + $0x14cc] ss:$16 sps:$4 sm:$0xff]  }
 0x2b9   :  { %5247 = vmatprep.subr.bf16.mxu0 %v9615_v36  ;;  %5739 = vmatprep.subr.bf16.mxu1 %v9618_v25  ;;  %v9698_v36 = vld [vmem:[#allocation2 + $0x14c0] ss:$16 sps:$4 sm:$0xff]   ;;  %v9701_v25 = vld [vmem:[#allocation2 + $0x14c8] ss:$16 sps:$4 sm:$0xff]  }
 0x2bc   :  { %5248 = vmatpush1.bf16.msra.mxu0 %v9613_v39  ;;  %5740 = vmatpush1.bf16.msra.mxu1 %v9616_v40  ;;  %v9706_v39 = vld [vmem:[#allocation2 + $0x14e4] ss:$16 sps:$4 sm:$0xff]   ;;  %v9709_v40 = vld [vmem:[#allocation2 + $0x14ec] ss:$16 sps:$4 sm:$0xff]  }
 0x2bd   :  { %5249 = vmatprep.subr.bf16.mxu0 %v9621_v26  ;;  %5741 = vmatprep.subr.bf16.mxu1 %v9624_v41  ;;  %v9704_v26 = vld [vmem:[#allocation2 + $0x14e0] ss:$16 sps:$4 sm:$0xff]   ;;  %v9707_v41 = vld [vmem:[#allocation2 + $0x14e8] ss:$16 sps:$4 sm:$0xff]  }
 0x2c0   :  { %5250 = vmatpush1.bf16.msra.mxu0 %v9619_v43  ;;  %5742 = vmatpush1.bf16.msra.mxu1 %v9622_v23  ;;  %v9712_v43 = vld [vmem:[#allocation2 + $0x1504] ss:$16 sps:$4 sm:$0xff]   ;;  %v9715_v23 = vld [vmem:[#allocation2 + $0x150c] ss:$16 sps:$4 sm:$0xff]  }
 0x2c1   :  { %5251 = vmatprep.subr.bf16.mxu0 %v9627_v44  ;;  %5743 = vmatprep.subr.bf16.mxu1 %v9630_v45  ;;  %v9710_v44 = vld [vmem:[#allocation2 + $0x1500] ss:$16 sps:$4 sm:$0xff]   ;;  %v9713_v45 = vld [vmem:[#allocation2 + $0x1508] ss:$16 sps:$4 sm:$0xff]  }
 0x2c4   :  { %5252 = vmatpush1.bf16.msra.mxu0 %v9625_v46  ;;  %5744 = vmatpush1.bf16.msra.mxu1 %v9628_v47  ;;  %v9718_v46 = vld [vmem:[#allocation2 + $0x1524] ss:$16 sps:$4 sm:$0xff]   ;;  %v9721_v47 = vld [vmem:[#allocation2 + $0x152c] ss:$16 sps:$4 sm:$0xff]  }
 0x2c5   :  { %5253 = vmatprep.subr.bf16.mxu0 %v9633_v48  ;;  %5745 = vmatprep.subr.bf16.mxu1 %v9636_v29  ;;  %v9716_v48 = vld [vmem:[#allocation2 + $0x1520] ss:$16 sps:$4 sm:$0xff]   ;;  %v9719_v29 = vld [vmem:[#allocation2 + $0x1528] ss:$16 sps:$4 sm:$0xff]  }
 0x2c8   :  { %5254 = vmatpush1.bf16.msra.mxu0 %v9631_v52  ;;  %5746 = vmatpush1.bf16.msra.mxu1 %v9634_v53  ;;  %v9724_v52 = vld [vmem:[#allocation2 + $0x1544] ss:$16 sps:$4 sm:$0xff]   ;;  %v9727_v53 = vld [vmem:[#allocation2 + $0x154c] ss:$16 sps:$4 sm:$0xff]  }
 0x2c9   :  { %5255 = vmatprep.subr.bf16.mxu0 %v9639_v38  ;;  %5747 = vmatprep.subr.bf16.mxu1 %v9642_v54  ;;  %v9722_v38 = vld [vmem:[#allocation2 + $0x1540] ss:$16 sps:$4 sm:$0xff]   ;;  %v9725_v54 = vld [vmem:[#allocation2 + $0x1548] ss:$16 sps:$4 sm:$0xff]  }
 0x2cc   :  { %5256 = vmatpush1.bf16.msra.mxu0 %v9637_v56  ;;  %5748 = vmatpush1.bf16.msra.mxu1 %v9640_v37  ;;  %v9730_v56 = vld [vmem:[#allocation2 + $0x1564] ss:$16 sps:$4 sm:$0xff]   ;;  %v9733_v37 = vld [vmem:[#allocation2 + $0x156c] ss:$16 sps:$4 sm:$0xff]  }
 0x2cd   :  { %5257 = vmatprep.subr.bf16.mxu0 %v9645_v57  ;;  %5749 = vmatprep.subr.bf16.mxu1 %v9648_v58  ;;  %v9728_v57 = vld [vmem:[#allocation2 + $0x1560] ss:$16 sps:$4 sm:$0xff]   ;;  %v9731_v58 = vld [vmem:[#allocation2 + $0x1568] ss:$16 sps:$4 sm:$0xff]  }
 0x2d0   :  { %5258 = vmatpush1.bf16.msra.mxu0 %v9643_v59  ;;  %5750 = vmatpush1.bf16.msra.mxu1 %v9646_v60  ;;  %v9736_v59 = vld [vmem:[#allocation2 + $0x1584] ss:$16 sps:$4 sm:$0xff]   ;;  %v9739_v60 = vld [vmem:[#allocation2 + $0x158c] ss:$16 sps:$4 sm:$0xff]  }
 0x2d1   :  { %5259 = vmatprep.subr.bf16.mxu0 %v9651_v61  ;;  %5751 = vmatprep.subr.bf16.mxu1 %v9654_v42  ;;  %v9734_v61 = vld [vmem:[#allocation2 + $0x1580] ss:$16 sps:$4 sm:$0xff]   ;;  %v9737_v42 = vld [vmem:[#allocation2 + $0x1588] ss:$16 sps:$4 sm:$0xff]  }
 0x2d4   :  { %5260 = vmatpush1.bf16.msra.mxu0 %v9649_v0  ;;  %5752 = vmatpush1.bf16.msra.mxu1 %v9652_v1  ;;  %v9742_v0 = vld [vmem:[#allocation2 + $0x15a4] ss:$16 sps:$4 sm:$0xff]   ;;  %v9745_v1 = vld [vmem:[#allocation2 + $0x15ac] ss:$16 sps:$4 sm:$0xff]  }
 0x2d5   :  { %5261 = vmatprep.subr.bf16.mxu0 %v9657_v51  ;;  %5753 = vmatprep.subr.bf16.mxu1 %v9660_v2  ;;  %v9740_v51 = vld [vmem:[#allocation2 + $0x15a0] ss:$16 sps:$4 sm:$0xff]   ;;  %v9743_v2 = vld [vmem:[#allocation2 + $0x15a8] ss:$16 sps:$4 sm:$0xff]  }
 0x2d8   :  { %5262 = vmatpush1.bf16.msra.mxu0 %v9655_v4  ;;  %5754 = vmatpush1.bf16.msra.mxu1 %v9658_v50  ;;  %v9748_v4 = vld [vmem:[#allocation2 + $0x15c4] ss:$16 sps:$4 sm:$0xff]   ;;  %v9751_v50 = vld [vmem:[#allocation2 + $0x15cc] ss:$16 sps:$4 sm:$0xff]  }
 0x2d9   :  { %5272 = vmatprep.subr.bf16.mxu0 %v9664_v5  ;;  %5764 = vmatprep.subr.bf16.mxu1 %v9667_v6  ;;  %v189_v5 = vcombine.high %v10520_v63, %v10520_v63  ;;  %v9746_v6 = vld [vmem:[#allocation2 + $0x15c0] ss:$16 sps:$4 sm:$0xff]  }
 0x2db   :  { %5264 = vmatmul.mubr.bf16.vlgmr.msra.gmra.mrb[0].mxu0 %v248_v8  ;;  %5756 = vmatmul.mubr.bf16.vlgmr.msra.gmra.mrb[0].mxu1 %v248_v8  ;;  %v9754_v8 = vld [vmem:[#allocation2 + $0x15e4] ss:$16 sps:$4 sm:$0xff]  }
 0x2dc   :  { %5273 = vmatpush1.bf16.msra.mxu0 %v9662_v10  ;;  %5765 = vmatpush1.bf16.msra.mxu1 %v9665_v11  ;;  %v9757_v10 = vld [vmem:[#allocation2 + $0x15ec] ss:$16 sps:$4 sm:$0xff]   ;;  %v10533_v11 = vrot.slane %v189_v5, %v10418_v49  ;;  %v9766_v49 = vld [vmem:[#allocation2 + $0x1624] ss:$16 sps:$4 sm:$0xff]  }
 0x2dd   :  { %5274 = vmatprep.subr.bf16.mxu0 %v9670_v55  ;;  %5766 = vmatprep.subr.bf16.mxu1 %v9673_v12  ;;  %v9752_v55 = vld [vmem:[#allocation2 + $0x15e0] ss:$16 sps:$4 sm:$0xff]   ;;  %v9755_v12 = vld [vmem:[#allocation2 + $0x15e8] ss:$16 sps:$4 sm:$0xff]   ;;  %v9841_v5 = vld [vmem:[#allocation2 + $0x17ac] ss:$16 sps:$4 sm:$0xff]  }
 0x2de   :  { %5304 = vmatprep.mubr.bf16.mxu0 %v251_v13  ;;  %5796 = vmatprep.mubr.bf16.mxu1 %v251_v13  ;;  %v9760_v13 = vld [vmem:[#allocation2 + $0x1604] ss:$16 sps:$4 sm:$0xff]   ;;  %v205_v63 = vcombine.high %v10533_v11, %v10533_v11 }
 0x2e0   :  { %5275 = vmatpush1.bf16.msra.mxu0 %v9668_v14  ;;  %5767 = vmatpush1.bf16.msra.mxu1 %v9671_v15  ;;  %v9763_v14 = vld [vmem:[#allocation2 + $0x160c] ss:$16 sps:$4 sm:$0xff]   ;;  %v250_v15 = vpack.c.bf16 %v10524_v3, %v10524_v3  ;;  %v9770_v3 = vld [vmem:[#allocation2 + $0x1640] ss:$16 sps:$4 sm:$0xff]  }
 0x2e1   :  { %5276 = vmatprep.subr.bf16.mxu0 %v9676_v16  ;;  %5768 = vmatprep.subr.bf16.mxu1 %v9679_v17  ;;  %v9758_v16 = vld [vmem:[#allocation2 + $0x1600] ss:$16 sps:$4 sm:$0xff]   ;;  %v9761_v17 = vld [vmem:[#allocation2 + $0x1608] ss:$16 sps:$4 sm:$0xff]  }
 0x2e4   :  { %5277 = vmatpush1.bf16.msra.mxu0 %v9674_v62  ;;  %5769 = vmatpush1.bf16.msra.mxu1 %v9677_v18  ;;  %v9769_v62 = vld [vmem:[#allocation2 + $0x162c] ss:$16 sps:$4 sm:$0xff]   ;;  %v253_v18 = vpack.c.bf16 %v205_v63, %v205_v63  ;;  %v9848_v63 = vld [vmem:[#allocation2 + $0x17e0] ss:$16 sps:$4 sm:$0xff]  }
 0x2e5   :  { %5278 = vmatprep.subr.bf16.mxu0 %v9682_v19  ;;  %5770 = vmatprep.subr.bf16.mxu1 %v9685_v20  ;;  %v9764_v19 = vld [vmem:[#allocation2 + $0x1620] ss:$16 sps:$4 sm:$0xff]   ;;  %v9767_v20 = vld [vmem:[#allocation2 + $0x1628] ss:$16 sps:$4 sm:$0xff]  }
 0x2e8   :  { %5279 = vmatpush1.bf16.msra.mxu0 %v9680_v21  ;;  %5771 = vmatpush1.bf16.msra.mxu1 %v9683_v24  ;;  %v9772_v21 = vld [vmem:[#allocation2 + $0x1644] ss:$16 sps:$4 sm:$0xff]   ;;  %v9775_v24 = vld [vmem:[#allocation2 + $0x164c] ss:$16 sps:$4 sm:$0xff]  }
 0x2e9   :  { %5280 = vmatprep.subr.bf16.mxu0 %v9688_v9  ;;  %5772 = vmatprep.subr.bf16.mxu1 %v9691_v27  ;;  %v9773_v9 = vld [vmem:[#allocation2 + $0x1648] ss:$16 sps:$4 sm:$0xff]   ;;  %v9778_v27 = vld [vmem:[#allocation2 + $0x1664] ss:$16 sps:$4 sm:$0xff]  }
 0x2ec   :  { %5281 = vmatpush1.bf16.msra.mxu0 %v9686_v22  ;;  %5773 = vmatpush1.bf16.msra.mxu1 %v9689_v28  ;;  %v9781_v22 = vld [vmem:[#allocation2 + $0x166c] ss:$16 sps:$4 sm:$0xff]   ;;  %v9776_v28 = vld [vmem:[#allocation2 + $0x1660] ss:$16 sps:$4 sm:$0xff]  }
 0x2ed   :  { %5282 = vmatprep.subr.bf16.mxu0 %v9694_v30  ;;  %5774 = vmatprep.subr.bf16.mxu1 %v9697_v31  ;;  %v9779_v30 = vld [vmem:[#allocation2 + $0x1668] ss:$16 sps:$4 sm:$0xff]   ;;  %v9784_v31 = vld [vmem:[#allocation2 + $0x1684] ss:$16 sps:$4 sm:$0xff]  }
 0x2f0   :  { %5283 = vmatpush1.bf16.msra.mxu0 %v9692_v32  ;;  %5775 = vmatpush1.bf16.msra.mxu1 %v9695_v33  ;;  %v9787_v32 = vld [vmem:[#allocation2 + $0x168c] ss:$16 sps:$4 sm:$0xff]   ;;  %v9782_v33 = vld [vmem:[#allocation2 + $0x1680] ss:$16 sps:$4 sm:$0xff]  }
 0x2f1   :  { %5284 = vmatprep.subr.bf16.mxu0 %v9700_v34  ;;  %5776 = vmatprep.subr.bf16.mxu1 %v9703_v35  ;;  %v9785_v34 = vld [vmem:[#allocation2 + $0x1688] ss:$16 sps:$4 sm:$0xff]   ;;  %v9790_v35 = vld [vmem:[#allocation2 + $0x16a4] ss:$16 sps:$4 sm:$0xff]  }
 0x2f4   :  { %5285 = vmatpush1.bf16.msra.mxu0 %v9698_v36  ;;  %5777 = vmatpush1.bf16.msra.mxu1 %v9701_v25  ;;  %v9793_v36 = vld [vmem:[#allocation2 + $0x16ac] ss:$16 sps:$4 sm:$0xff]   ;;  %v9788_v25 = vld [vmem:[#allocation2 + $0x16a0] ss:$16 sps:$4 sm:$0xff]  }
 0x2f5   :  { %5286 = vmatprep.subr.bf16.mxu0 %v9706_v39  ;;  %5778 = vmatprep.subr.bf16.mxu1 %v9709_v40  ;;  %v9791_v39 = vld [vmem:[#allocation2 + $0x16a8] ss:$16 sps:$4 sm:$0xff]   ;;  %v9796_v40 = vld [vmem:[#allocation2 + $0x16c4] ss:$16 sps:$4 sm:$0xff]  }
 0x2f8   :  { %5287 = vmatpush1.bf16.msra.mxu0 %v9704_v26  ;;  %5779 = vmatpush1.bf16.msra.mxu1 %v9707_v41  ;;  %v9799_v26 = vld [vmem:[#allocation2 + $0x16cc] ss:$16 sps:$4 sm:$0xff]   ;;  %v9794_v41 = vld [vmem:[#allocation2 + $0x16c0] ss:$16 sps:$4 sm:$0xff]  }
 0x2f9   :  { %5288 = vmatprep.subr.bf16.mxu0 %v9712_v43  ;;  %5780 = vmatprep.subr.bf16.mxu1 %v9715_v23  ;;  %v9797_v43 = vld [vmem:[#allocation2 + $0x16c8] ss:$16 sps:$4 sm:$0xff]   ;;  %v9802_v23 = vld [vmem:[#allocation2 + $0x16e4] ss:$16 sps:$4 sm:$0xff]  }
 0x2fc   :  { %5289 = vmatpush1.bf16.msra.mxu0 %v9710_v44  ;;  %5781 = vmatpush1.bf16.msra.mxu1 %v9713_v45  ;;  %v9805_v44 = vld [vmem:[#allocation2 + $0x16ec] ss:$16 sps:$4 sm:$0xff]   ;;  %v9800_v45 = vld [vmem:[#allocation2 + $0x16e0] ss:$16 sps:$4 sm:$0xff]  }
 0x2fd   :  { %5290 = vmatprep.subr.bf16.mxu0 %v9718_v46  ;;  %5782 = vmatprep.subr.bf16.mxu1 %v9721_v47  ;;  %v9803_v46 = vld [vmem:[#allocation2 + $0x16e8] ss:$16 sps:$4 sm:$0xff]   ;;  %v9808_v47 = vld [vmem:[#allocation2 + $0x1704] ss:$16 sps:$4 sm:$0xff]  }
 0x300   :  { %5291 = vmatpush1.bf16.msra.mxu0 %v9716_v48  ;;  %5783 = vmatpush1.bf16.msra.mxu1 %v9719_v29  ;;  %v9811_v48 = vld [vmem:[#allocation2 + $0x170c] ss:$16 sps:$4 sm:$0xff]   ;;  %v9806_v29 = vld [vmem:[#allocation2 + $0x1700] ss:$16 sps:$4 sm:$0xff]  }
 0x301   :  { %5292 = vmatprep.subr.bf16.mxu0 %v9724_v52  ;;  %5784 = vmatprep.subr.bf16.mxu1 %v9727_v53  ;;  %v9809_v52 = vld [vmem:[#allocation2 + $0x1708] ss:$16 sps:$4 sm:$0xff]   ;;  %v9814_v53 = vld [vmem:[#allocation2 + $0x1724] ss:$16 sps:$4 sm:$0xff]  }
 0x304   :  { %5293 = vmatpush1.bf16.msra.mxu0 %v9722_v38  ;;  %5785 = vmatpush1.bf16.msra.mxu1 %v9725_v54  ;;  %v9817_v38 = vld [vmem:[#allocation2 + $0x172c] ss:$16 sps:$4 sm:$0xff]   ;;  %v9812_v54 = vld [vmem:[#allocation2 + $0x1720] ss:$16 sps:$4 sm:$0xff]  }
 0x305   :  { %5294 = vmatprep.subr.bf16.mxu0 %v9730_v56  ;;  %5786 = vmatprep.subr.bf16.mxu1 %v9733_v37  ;;  %v9815_v56 = vld [vmem:[#allocation2 + $0x1728] ss:$16 sps:$4 sm:$0xff]   ;;  %v9820_v37 = vld [vmem:[#allocation2 + $0x1744] ss:$16 sps:$4 sm:$0xff]  }
 0x308   :  { %5295 = vmatpush1.bf16.msra.mxu0 %v9728_v57  ;;  %5787 = vmatpush1.bf16.msra.mxu1 %v9731_v58  ;;  %v9823_v57 = vld [vmem:[#allocation2 + $0x174c] ss:$16 sps:$4 sm:$0xff]   ;;  %v9818_v58 = vld [vmem:[#allocation2 + $0x1740] ss:$16 sps:$4 sm:$0xff]  }
 0x309   :  { %5296 = vmatprep.subr.bf16.mxu0 %v9736_v59  ;;  %5788 = vmatprep.subr.bf16.mxu1 %v9739_v60  ;;  %v9821_v59 = vld [vmem:[#allocation2 + $0x1748] ss:$16 sps:$4 sm:$0xff]   ;;  %v9826_v60 = vld [vmem:[#allocation2 + $0x1764] ss:$16 sps:$4 sm:$0xff]  }
 0x30c   :  { %5297 = vmatpush1.bf16.msra.mxu0 %v9734_v61  ;;  %5789 = vmatpush1.bf16.msra.mxu1 %v9737_v42  ;;  %v9829_v61 = vld [vmem:[#allocation2 + $0x176c] ss:$16 sps:$4 sm:$0xff]   ;;  %v9824_v42 = vld [vmem:[#allocation2 + $0x1760] ss:$16 sps:$4 sm:$0xff]  }
 0x30d   :  { %5298 = vmatprep.subr.bf16.mxu0 %v9742_v0  ;;  %5790 = vmatprep.subr.bf16.mxu1 %v9745_v1  ;;  %v9827_v0 = vld [vmem:[#allocation2 + $0x1768] ss:$16 sps:$4 sm:$0xff]   ;;  %v9832_v1 = vld [vmem:[#allocation2 + $0x1784] ss:$16 sps:$4 sm:$0xff]  }
 0x310   :  { %5299 = vmatpush1.bf16.msra.mxu0 %v9740_v51  ;;  %5791 = vmatpush1.bf16.msra.mxu1 %v9743_v2  ;;  %v9835_v51 = vld [vmem:[#allocation2 + $0x178c] ss:$16 sps:$4 sm:$0xff]   ;;  %v9830_v2 = vld [vmem:[#allocation2 + $0x1780] ss:$16 sps:$4 sm:$0xff]  }
 0x311   :  { %5300 = vmatprep.subr.bf16.mxu0 %v9748_v4  ;;  %5792 = vmatprep.subr.bf16.mxu1 %v9751_v50  ;;  %v9833_v4 = vld [vmem:[#allocation2 + $0x1788] ss:$16 sps:$4 sm:$0xff]   ;;  %v9838_v50 = vld [vmem:[#allocation2 + $0x17a4] ss:$16 sps:$4 sm:$0xff]  }
 0x314   :  { %5301 = vmatpush1.bf16.msra.mxu0 %v9746_v6  ;;  %5793 = vmatpush1.bf16.msra.mxu1 %v9749_v7  ;;  %v9836_v6 = vld [vmem:[#allocation2 + $0x17a0] ss:$16 sps:$4 sm:$0xff]   ;;  %v9839_v7 = vld [vmem:[#allocation2 + $0x17a8] ss:$16 sps:$4 sm:$0xff]  }
 0x315   :  { %5302 = vmatprep.subr.bf16.mxu0 %v9754_v8  ;;  %5794 = vmatprep.subr.bf16.mxu1 %v9757_v10  ;;  %v9844_v8 = vld [vmem:[#allocation2 + $0x17c4] ss:$16 sps:$4 sm:$0xff]   ;;  %v9847_v10 = vld [vmem:[#allocation2 + $0x17cc] ss:$16 sps:$4 sm:$0xff]  }
 0x318   :  { %5303 = vmatpush1.bf16.msra.mxu0 %v9752_v55  ;;  %5795 = vmatpush1.bf16.msra.mxu1 %v9755_v12  ;;  %v9842_v55 = vld [vmem:[#allocation2 + $0x17c0] ss:$16 sps:$4 sm:$0xff]   ;;  %v9845_v12 = vld [vmem:[#allocation2 + $0x17c8] ss:$16 sps:$4 sm:$0xff]  }
 0x319   :  { %5313 = vmatprep.subr.bf16.mxu0 %v9760_v13  ;;  %5805 = vmatprep.subr.bf16.mxu1 %v9763_v14  ;;  %v9850_v13 = vld [vmem:[#allocation2 + $0x17e4] ss:$16 sps:$4 sm:$0xff]   ;;  %v9853_v14 = vld [vmem:[#allocation2 + $0x17ec] ss:$16 sps:$4 sm:$0xff]  }
 0x31b   :  { %5305 = vmatmul.mubr.bf16.vlgmr.msra.gmra.mrb[0].mxu0 %v250_v15  ;;  %5797 = vmatmul.mubr.bf16.vlgmr.msra.gmra.mrb[0].mxu1 %v250_v15  ;;  %v9851_v15 = vld [vmem:[#allocation2 + $0x17e8] ss:$16 sps:$4 sm:$0xff]  }
 0x31c   :  { %5314 = vmatpush1.bf16.msra.mxu0 %v9758_v16  ;;  %5806 = vmatpush1.bf16.msra.mxu1 %v9761_v17  ;;  %v9857_v16 = vld [vmem:[#allocation4 + $0x4] ss:$16 sps:$4 sm:$0xff]   ;;  %v9860_v17 = vld [vmem:[#allocation4 + $0xc] ss:$16 sps:$4 sm:$0xff]  }
 0x31d   :  { %5315 = vmatprep.subr.bf16.mxu0 %v9766_v49  ;;  %5807 = vmatprep.subr.bf16.mxu1 %v9769_v62  ;;  %v252_v49 = vpack.c.bf16 %v10533_v11, %v10533_v11  ;;  %v9855_v62 = vld [vmem:[#allocation4] ss:$16 sps:$4 sm:$0xff]  }
 0x31e   :  { %5345 = vmatprep.mubr.bf16.mxu0 %v253_v18  ;;  %5837 = vmatprep.mubr.bf16.mxu1 %v253_v18  ;;  %v9858_v18 = vld [vmem:[#allocation4 + $0x8] ss:$16 sps:$4 sm:$0xff]   ;;  %v9867_v11 = vld [vmem:[#allocation4 + $0x40] ss:$16 sps:$4 sm:$0xff]  }
 0x320   :  { %5316 = vmatpush1.bf16.msra.mxu0 %v9764_v19  ;;  %5808 = vmatpush1.bf16.msra.mxu1 %v9767_v20  ;;  %v9863_v19 = vld [vmem:[#allocation4 + $0x24] ss:$16 sps:$4 sm:$0xff]   ;;  %v9866_v20 = vld [vmem:[#allocation4 + $0x2c] ss:$16 sps:$4 sm:$0xff]  }
 0x321   :  { %5317 = vmatprep.subr.bf16.mxu0 %v9772_v21  ;;  %5809 = vmatprep.subr.bf16.mxu1 %v9775_v24  ;;  %v9861_v21 = vld [vmem:[#allocation4 + $0x20] ss:$16 sps:$4 sm:$0xff]   ;;  %v9864_v24 = vld [vmem:[#allocation4 + $0x28] ss:$16 sps:$4 sm:$0xff]  }
 0x324   :  { %5318 = vmatpush1.bf16.msra.mxu0 %v9770_v3  ;;  %5810 = vmatpush1.bf16.msra.mxu1 %v9773_v9  ;;  %v9869_v3 = vld [vmem:[#allocation4 + $0x44] ss:$16 sps:$4 sm:$0xff]   ;;  %v9872_v9 = vld [vmem:[#allocation4 + $0x4c] ss:$16 sps:$4 sm:$0xff]  }
 0x325   :  { %5319 = vmatprep.subr.bf16.mxu0 %v9778_v27  ;;  %5811 = vmatprep.subr.bf16.mxu1 %v9781_v22  ;;  %v9870_v27 = vld [vmem:[#allocation4 + $0x48] ss:$16 sps:$4 sm:$0xff]   ;;  %v9875_v22 = vld [vmem:[#allocation4 + $0x64] ss:$16 sps:$4 sm:$0xff]  }
 0x328   :  { %5320 = vmatpush1.bf16.msra.mxu0 %v9776_v28  ;;  %5812 = vmatpush1.bf16.msra.mxu1 %v9779_v30  ;;  %v9878_v28 = vld [vmem:[#allocation4 + $0x6c] ss:$16 sps:$4 sm:$0xff]   ;;  %v9873_v30 = vld [vmem:[#allocation4 + $0x60] ss:$16 sps:$4 sm:$0xff]  }
 0x329   :  { %5321 = vmatprep.subr.bf16.mxu0 %v9784_v31  ;;  %5813 = vmatprep.subr.bf16.mxu1 %v9787_v32  ;;  %v9876_v31 = vld [vmem:[#allocation4 + $0x68] ss:$16 sps:$4 sm:$0xff]   ;;  %v9881_v32 = vld [vmem:[#allocation4 + $0x84] ss:$16 sps:$4 sm:$0xff]  }
 0x32c   :  { %5322 = vmatpush1.bf16.msra.mxu0 %v9782_v33  ;;  %5814 = vmatpush1.bf16.msra.mxu1 %v9785_v34  ;;  %v9884_v33 = vld [vmem:[#allocation4 + $0x8c] ss:$16 sps:$4 sm:$0xff]   ;;  %v9879_v34 = vld [vmem:[#allocation4 + $0x80] ss:$16 sps:$4 sm:$0xff]  }
 0x32d   :  { %5323 = vmatprep.subr.bf16.mxu0 %v9790_v35  ;;  %5815 = vmatprep.subr.bf16.mxu1 %v9793_v36  ;;  %v9882_v35 = vld [vmem:[#allocation4 + $0x88] ss:$16 sps:$4 sm:$0xff]   ;;  %v9887_v36 = vld [vmem:[#allocation4 + $0xa4] ss:$16 sps:$4 sm:$0xff]  }
 0x330   :  { %5324 = vmatpush1.bf16.msra.mxu0 %v9788_v25  ;;  %5816 = vmatpush1.bf16.msra.mxu1 %v9791_v39  ;;  %v9890_v25 = vld [vmem:[#allocation4 + $0xac] ss:$16 sps:$4 sm:$0xff]   ;;  %v9885_v39 = vld [vmem:[#allocation4 + $0xa0] ss:$16 sps:$4 sm:$0xff]  }
 0x331   :  { %5325 = vmatprep.subr.bf16.mxu0 %v9796_v40  ;;  %5817 = vmatprep.subr.bf16.mxu1 %v9799_v26  ;;  %v9888_v40 = vld [vmem:[#allocation4 + $0xa8] ss:$16 sps:$4 sm:$0xff]   ;;  %v9893_v26 = vld [vmem:[#allocation4 + $0xc4] ss:$16 sps:$4 sm:$0xff]  }
 0x334   :  { %5326 = vmatpush1.bf16.msra.mxu0 %v9794_v41  ;;  %5818 = vmatpush1.bf16.msra.mxu1 %v9797_v43  ;;  %v9896_v41 = vld [vmem:[#allocation4 + $0xcc] ss:$16 sps:$4 sm:$0xff]   ;;  %v9891_v43 = vld [vmem:[#allocation4 + $0xc0] ss:$16 sps:$4 sm:$0xff]  }
 0x335   :  { %5327 = vmatprep.subr.bf16.mxu0 %v9802_v23  ;;  %5819 = vmatprep.subr.bf16.mxu1 %v9805_v44  ;;  %v9894_v23 = vld [vmem:[#allocation4 + $0xc8] ss:$16 sps:$4 sm:$0xff]   ;;  %v9899_v44 = vld [vmem:[#allocation4 + $0xe4] ss:$16 sps:$4 sm:$0xff]  }
 0x338   :  { %5328 = vmatpush1.bf16.msra.mxu0 %v9800_v45  ;;  %5820 = vmatpush1.bf16.msra.mxu1 %v9803_v46  ;;  %v9902_v45 = vld [vmem:[#allocation4 + $0xec] ss:$16 sps:$4 sm:$0xff]   ;;  %v9897_v46 = vld [vmem:[#allocation4 + $0xe0] ss:$16 sps:$4 sm:$0xff]  }
 0x339   :  { %5329 = vmatprep.subr.bf16.mxu0 %v9808_v47  ;;  %5821 = vmatprep.subr.bf16.mxu1 %v9811_v48  ;;  %v9900_v47 = vld [vmem:[#allocation4 + $0xe8] ss:$16 sps:$4 sm:$0xff]   ;;  %v9905_v48 = vld [vmem:[#allocation4 + $0x104] ss:$16 sps:$4 sm:$0xff]  }
 0x33c   :  { %5330 = vmatpush1.bf16.msra.mxu0 %v9806_v29  ;;  %5822 = vmatpush1.bf16.msra.mxu1 %v9809_v52  ;;  %v9908_v29 = vld [vmem:[#allocation4 + $0x10c] ss:$16 sps:$4 sm:$0xff]   ;;  %v9903_v52 = vld [vmem:[#allocation4 + $0x100] ss:$16 sps:$4 sm:$0xff]  }
 0x33d   :  { %5331 = vmatprep.subr.bf16.mxu0 %v9814_v53  ;;  %5823 = vmatprep.subr.bf16.mxu1 %v9817_v38  ;;  %v9906_v53 = vld [vmem:[#allocation4 + $0x108] ss:$16 sps:$4 sm:$0xff]   ;;  %v9911_v38 = vld [vmem:[#allocation4 + $0x124] ss:$16 sps:$4 sm:$0xff]  }
 0x340   :  { %5332 = vmatpush1.bf16.msra.mxu0 %v9812_v54  ;;  %5824 = vmatpush1.bf16.msra.mxu1 %v9815_v56  ;;  %v9914_v54 = vld [vmem:[#allocation4 + $0x12c] ss:$16 sps:$4 sm:$0xff]   ;;  %v9909_v56 = vld [vmem:[#allocation4 + $0x120] ss:$16 sps:$4 sm:$0xff]  }
 0x341   :  { %5333 = vmatprep.subr.bf16.mxu0 %v9820_v37  ;;  %5825 = vmatprep.subr.bf16.mxu1 %v9823_v57  ;;  %v9912_v37 = vld [vmem:[#allocation4 + $0x128] ss:$16 sps:$4 sm:$0xff]   ;;  %v9917_v57 = vld [vmem:[#allocation4 + $0x144] ss:$16 sps:$4 sm:$0xff]  }
 0x344   :  { %5334 = vmatpush1.bf16.msra.mxu0 %v9818_v58  ;;  %5826 = vmatpush1.bf16.msra.mxu1 %v9821_v59  ;;  %v9920_v58 = vld [vmem:[#allocation4 + $0x14c] ss:$16 sps:$4 sm:$0xff]   ;;  %v9915_v59 = vld [vmem:[#allocation4 + $0x140] ss:$16 sps:$4 sm:$0xff]  }
 0x345   :  { %5335 = vmatprep.subr.bf16.mxu0 %v9826_v60  ;;  %5827 = vmatprep.subr.bf16.mxu1 %v9829_v61  ;;  %v9918_v60 = vld [vmem:[#allocation4 + $0x148] ss:$16 sps:$4 sm:$0xff]   ;;  %v9923_v61 = vld [vmem:[#allocation4 + $0x164] ss:$16 sps:$4 sm:$0xff]  }
 0x348   :  { %5336 = vmatpush1.bf16.msra.mxu0 %v9824_v42  ;;  %5828 = vmatpush1.bf16.msra.mxu1 %v9827_v0  ;;  %v9926_v42 = vld [vmem:[#allocation4 + $0x16c] ss:$16 sps:$4 sm:$0xff]   ;;  %v9921_v0 = vld [vmem:[#allocation4 + $0x160] ss:$16 sps:$4 sm:$0xff]  }
 0x349   :  { %5337 = vmatprep.subr.bf16.mxu0 %v9832_v1  ;;  %5829 = vmatprep.subr.bf16.mxu1 %v9835_v51  ;;  %v9924_v1 = vld [vmem:[#allocation4 + $0x168] ss:$16 sps:$4 sm:$0xff]   ;;  %v9929_v51 = vld [vmem:[#allocation4 + $0x184] ss:$16 sps:$4 sm:$0xff]  }
 0x34c   :  { %5338 = vmatpush1.bf16.msra.mxu0 %v9830_v2  ;;  %5830 = vmatpush1.bf16.msra.mxu1 %v9833_v4  ;;  %v9932_v2 = vld [vmem:[#allocation4 + $0x18c] ss:$16 sps:$4 sm:$0xff]   ;;  %v9927_v4 = vld [vmem:[#allocation4 + $0x180] ss:$16 sps:$4 sm:$0xff]  }
 0x34d   :  { %5339 = vmatprep.subr.bf16.mxu0 %v9838_v50  ;;  %5831 = vmatprep.subr.bf16.mxu1 %v9841_v5  ;;  %v9930_v50 = vld [vmem:[#allocation4 + $0x188] ss:$16 sps:$4 sm:$0xff]   ;;  %v9935_v5 = vld [vmem:[#allocation4 + $0x1a4] ss:$16 sps:$4 sm:$0xff]  }
 0x350   :  { %5340 = vmatpush1.bf16.msra.mxu0 %v9836_v6  ;;  %5832 = vmatpush1.bf16.msra.mxu1 %v9839_v7  ;;  %v9938_v6 = vld [vmem:[#allocation4 + $0x1ac] ss:$16 sps:$4 sm:$0xff]   ;;  %v9933_v7 = vld [vmem:[#allocation4 + $0x1a0] ss:$16 sps:$4 sm:$0xff]  }
 0x351   :  { %5341 = vmatprep.subr.bf16.mxu0 %v9844_v8  ;;  %5833 = vmatprep.subr.bf16.mxu1 %v9847_v10  ;;  %v9936_v8 = vld [vmem:[#allocation4 + $0x1a8] ss:$16 sps:$4 sm:$0xff]   ;;  %v9941_v10 = vld [vmem:[#allocation4 + $0x1c4] ss:$16 sps:$4 sm:$0xff]  }
 0x354   :  { %5342 = vmatpush1.bf16.msra.mxu0 %v9842_v55  ;;  %5834 = vmatpush1.bf16.msra.mxu1 %v9845_v12  ;;  %v9944_v55 = vld [vmem:[#allocation4 + $0x1cc] ss:$16 sps:$4 sm:$0xff]   ;;  %v9939_v12 = vld [vmem:[#allocation4 + $0x1c0] ss:$16 sps:$4 sm:$0xff]  }
 0x355   :  { %5343 = vmatprep.subr.bf16.mxu0 %v9850_v13  ;;  %5835 = vmatprep.subr.bf16.mxu1 %v9853_v14  ;;  %v9942_v13 = vld [vmem:[#allocation4 + $0x1c8] ss:$16 sps:$4 sm:$0xff]   ;;  %v9947_v14 = vld [vmem:[#allocation4 + $0x1e4] ss:$16 sps:$4 sm:$0xff]  }
 0x358   :  { %5344 = vmatpush1.bf16.msra.mxu0 %v9848_v63  ;;  %5836 = vmatpush1.bf16.msra.mxu1 %v9851_v15  ;;  %v9950_v63 = vld [vmem:[#allocation4 + $0x1ec] ss:$16 sps:$4 sm:$0xff]   ;;  %v9945_v15 = vld [vmem:[#allocation4 + $0x1e0] ss:$16 sps:$4 sm:$0xff]  }
 0x359   :  { %6622 = vmatprep.subr.bf16.mxu0 %v9857_v16  ;;  %6704 = vmatprep.subr.bf16.mxu1 %v9860_v17  ;;  %v9948_v16 = vld [vmem:[#allocation4 + $0x1e8] ss:$16 sps:$4 sm:$0xff]   ;;  %v9953_v17 = vld [vmem:[#allocation4 + $0x204] ss:$16 sps:$4 sm:$0xff]  }
 0x35b   :  { %5346 = vmatmul.mubr.bf16.vlgmr.msra.gmra.mrb[0].mxu0 %v252_v49  ;;  %5838 = vmatmul.mubr.bf16.vlgmr.msra.gmra.mrb[0].mxu1 %v252_v49  ;;  %v9956_v49 = vld [vmem:[#allocation4 + $0x20c] ss:$16 sps:$4 sm:$0xff]  }
 0x35c   :  { %6623 = vmatpush1.bf16.msra.mxu0 %v9855_v62  ;;  %6705 = vmatpush1.bf16.msra.mxu1 %v9858_v18 }
 0x35d   :  { %6624 = vmatprep.subr.bf16.mxu0 %v9863_v19  ;;  %6706 = vmatprep.subr.bf16.mxu1 %v9866_v20 }
 0x360   :  { %6625 = vmatpush1.bf16.msra.mxu0 %v9861_v21  ;;  %6707 = vmatpush1.bf16.msra.mxu1 %v9864_v24 }
 0x361   :  { %6626 = vmatprep.subr.bf16.mxu0 %v9869_v3  ;;  %6708 = vmatprep.subr.bf16.mxu1 %v9872_v9 }
 0x364   :  { %6627 = vmatpush1.bf16.msra.mxu0 %v9867_v11  ;;  %6709 = vmatpush1.bf16.msra.mxu1 %v9870_v27 }
 0x365   :  { %6628 = vmatprep.subr.bf16.mxu0 %v9875_v22  ;;  %6710 = vmatprep.subr.bf16.mxu1 %v9878_v28 }
 0x368   :  { %6629 = vmatpush1.bf16.msra.mxu0 %v9873_v30  ;;  %6711 = vmatpush1.bf16.msra.mxu1 %v9876_v31  ;;  %v9951_v30 = vld [vmem:[#allocation4 + $0x200] ss:$16 sps:$4 sm:$0xff]   ;;  %v9954_v31 = vld [vmem:[#allocation4 + $0x208] ss:$16 sps:$4 sm:$0xff]  }
 0x369   :  { %6630 = vmatprep.subr.bf16.mxu0 %v9881_v32  ;;  %6712 = vmatprep.subr.bf16.mxu1 %v9884_v33  ;;  %v9959_v33 = vld [vmem:[#allocation4 + $0x224] ss:$16 sps:$4 sm:$0xff]  }
 0x36c   :  { %6631 = vmatpush1.bf16.msra.mxu0 %v9879_v34  ;;  %6713 = vmatpush1.bf16.msra.mxu1 %v9882_v35  ;;  %v9962_v34 = vld [vmem:[#allocation4 + $0x22c] ss:$16 sps:$4 sm:$0xff]  }
 0x36d   :  { %6632 = vmatprep.subr.bf16.mxu0 %v9887_v36  ;;  %6714 = vmatprep.subr.bf16.mxu1 %v9890_v25  ;;  %v9957_v36 = vld [vmem:[#allocation4 + $0x220] ss:$16 sps:$4 sm:$0xff]   ;;  %v9960_v25 = vld [vmem:[#allocation4 + $0x228] ss:$16 sps:$4 sm:$0xff]  }
 0x370   :  { %6633 = vmatpush1.bf16.msra.mxu0 %v9885_v39  ;;  %6715 = vmatpush1.bf16.msra.mxu1 %v9888_v40  ;;  %v9965_v39 = vld [vmem:[#allocation4 + $0x244] ss:$16 sps:$4 sm:$0xff]   ;;  %v9968_v40 = vld [vmem:[#allocation4 + $0x24c] ss:$16 sps:$4 sm:$0xff]  }
 0x371   :  { %6634 = vmatprep.subr.bf16.mxu0 %v9893_v26  ;;  %6716 = vmatprep.subr.bf16.mxu1 %v9896_v41  ;;  %v9963_v26 = vld [vmem:[#allocation4 + $0x240] ss:$16 sps:$4 sm:$0xff]   ;;  %v9966_v41 = vld [vmem:[#allocation4 + $0x248] ss:$16 sps:$4 sm:$0xff]  }
 0x374   :  { %6635 = vmatpush1.bf16.msra.mxu0 %v9891_v43  ;;  %6717 = vmatpush1.bf16.msra.mxu1 %v9894_v23  ;;  %v9971_v43 = vld [vmem:[#allocation4 + $0x264] ss:$16 sps:$4 sm:$0xff]   ;;  %v9974_v23 = vld [vmem:[#allocation4 + $0x26c] ss:$16 sps:$4 sm:$0xff]  }
 0x375   :  { %6636 = vmatprep.subr.bf16.mxu0 %v9899_v44  ;;  %6718 = vmatprep.subr.bf16.mxu1 %v9902_v45  ;;  %v9969_v44 = vld [vmem:[#allocation4 + $0x260] ss:$16 sps:$4 sm:$0xff]   ;;  %v9972_v45 = vld [vmem:[#allocation4 + $0x268] ss:$16 sps:$4 sm:$0xff]  }
 0x378   :  { %6637 = vmatpush1.bf16.msra.mxu0 %v9897_v46  ;;  %6719 = vmatpush1.bf16.msra.mxu1 %v9900_v47  ;;  %v9977_v46 = vld [vmem:[#allocation4 + $0x284] ss:$16 sps:$4 sm:$0xff]   ;;  %v9980_v47 = vld [vmem:[#allocation4 + $0x28c] ss:$16 sps:$4 sm:$0xff]  }
 0x379   :  { %6638 = vmatprep.subr.bf16.mxu0 %v9905_v48  ;;  %6720 = vmatprep.subr.bf16.mxu1 %v9908_v29  ;;  %v9975_v48 = vld [vmem:[#allocation4 + $0x280] ss:$16 sps:$4 sm:$0xff]   ;;  %v9978_v29 = vld [vmem:[#allocation4 + $0x288] ss:$16 sps:$4 sm:$0xff]  }
 0x37c   :  { %6639 = vmatpush1.bf16.msra.mxu0 %v9903_v52  ;;  %6721 = vmatpush1.bf16.msra.mxu1 %v9906_v53  ;;  %v9983_v52 = vld [vmem:[#allocation4 + $0x2a4] ss:$16 sps:$4 sm:$0xff]   ;;  %v9986_v53 = vld [vmem:[#allocation4 + $0x2ac] ss:$16 sps:$4 sm:$0xff]  }
 0x37d   :  { %6640 = vmatprep.subr.bf16.mxu0 %v9911_v38  ;;  %6722 = vmatprep.subr.bf16.mxu1 %v9914_v54  ;;  %v9981_v38 = vld [vmem:[#allocation4 + $0x2a0] ss:$16 sps:$4 sm:$0xff]   ;;  %v9984_v54 = vld [vmem:[#allocation4 + $0x2a8] ss:$16 sps:$4 sm:$0xff]  }
 0x380   :  { %6641 = vmatpush1.bf16.msra.mxu0 %v9909_v56  ;;  %6723 = vmatpush1.bf16.msra.mxu1 %v9912_v37  ;;  %v9989_v56 = vld [vmem:[#allocation4 + $0x2c4] ss:$16 sps:$4 sm:$0xff]   ;;  %v9992_v37 = vld [vmem:[#allocation4 + $0x2cc] ss:$16 sps:$4 sm:$0xff]  }
 0x381   :  { %6642 = vmatprep.subr.bf16.mxu0 %v9917_v57  ;;  %6724 = vmatprep.subr.bf16.mxu1 %v9920_v58  ;;  %v9987_v57 = vld [vmem:[#allocation4 + $0x2c0] ss:$16 sps:$4 sm:$0xff]   ;;  %v9990_v58 = vld [vmem:[#allocation4 + $0x2c8] ss:$16 sps:$4 sm:$0xff]  }
 0x384   :  { %6643 = vmatpush1.bf16.msra.mxu0 %v9915_v59  ;;  %6725 = vmatpush1.bf16.msra.mxu1 %v9918_v60  ;;  %v9995_v59 = vld [vmem:[#allocation4 + $0x2e4] ss:$16 sps:$4 sm:$0xff]   ;;  %v9998_v60 = vld [vmem:[#allocation4 + $0x2ec] ss:$16 sps:$4 sm:$0xff]  }
 0x385   :  { %6644 = vmatprep.subr.bf16.mxu0 %v9923_v61  ;;  %6726 = vmatprep.subr.bf16.mxu1 %v9926_v42  ;;  %v9993_v61 = vld [vmem:[#allocation4 + $0x2e0] ss:$16 sps:$4 sm:$0xff]   ;;  %v9996_v42 = vld [vmem:[#allocation4 + $0x2e8] ss:$16 sps:$4 sm:$0xff]  }
 0x388   :  { %6645 = vmatpush1.bf16.msra.mxu0 %v9921_v0  ;;  %6727 = vmatpush1.bf16.msra.mxu1 %v9924_v1  ;;  %v10001_v0 = vld [vmem:[#allocation4 + $0x304] ss:$16 sps:$4 sm:$0xff]   ;;  %v10004_v1 = vld [vmem:[#allocation4 + $0x30c] ss:$16 sps:$4 sm:$0xff]  }
 0x389   :  { %6646 = vmatprep.subr.bf16.mxu0 %v9929_v51  ;;  %6728 = vmatprep.subr.bf16.mxu1 %v9932_v2  ;;  %v9999_v51 = vld [vmem:[#allocation4 + $0x300] ss:$16 sps:$4 sm:$0xff]   ;;  %v10002_v2 = vld [vmem:[#allocation4 + $0x308] ss:$16 sps:$4 sm:$0xff]  }
 0x38c   :  { %6647 = vmatpush1.bf16.msra.mxu0 %v9927_v4  ;;  %6729 = vmatpush1.bf16.msra.mxu1 %v9930_v50  ;;  %v10007_v4 = vld [vmem:[#allocation4 + $0x324] ss:$16 sps:$4 sm:$0xff]   ;;  %v10010_v50 = vld [vmem:[#allocation4 + $0x32c] ss:$16 sps:$4 sm:$0xff]  }
 0x38d   :  { %6648 = vmatprep.subr.bf16.mxu0 %v9935_v5  ;;  %6730 = vmatprep.subr.bf16.mxu1 %v9938_v6  ;;  %v10005_v5 = vld [vmem:[#allocation4 + $0x320] ss:$16 sps:$4 sm:$0xff]   ;;  %v10008_v6 = vld [vmem:[#allocation4 + $0x328] ss:$16 sps:$4 sm:$0xff]  }
 0x390   :  { %6649 = vmatpush1.bf16.msra.mxu0 %v9933_v7  ;;  %6731 = vmatpush1.bf16.msra.mxu1 %v9936_v8  ;;  %v10013_v7 = vld [vmem:[#allocation4 + $0x344] ss:$16 sps:$4 sm:$0xff]   ;;  %v10016_v8 = vld [vmem:[#allocation4 + $0x34c] ss:$16 sps:$4 sm:$0xff]  }
 0x391   :  { %6650 = vmatprep.subr.bf16.mxu0 %v9941_v10  ;;  %6732 = vmatprep.subr.bf16.mxu1 %v9944_v55  ;;  %v10011_v10 = vld [vmem:[#allocation4 + $0x340] ss:$16 sps:$4 sm:$0xff]   ;;  %v10014_v55 = vld [vmem:[#allocation4 + $0x348] ss:$16 sps:$4 sm:$0xff]  }
 0x394   :  { %6651 = vmatpush1.bf16.msra.mxu0 %v9939_v12  ;;  %6733 = vmatpush1.bf16.msra.mxu1 %v9942_v13  ;;  %v10019_v12 = vld [vmem:[#allocation4 + $0x364] ss:$16 sps:$4 sm:$0xff]   ;;  %v10022_v13 = vld [vmem:[#allocation4 + $0x36c] ss:$16 sps:$4 sm:$0xff]  }
 0x395   :  { %6652 = vmatprep.subr.bf16.mxu0 %v9947_v14  ;;  %6734 = vmatprep.subr.bf16.mxu1 %v9950_v63  ;;  %v10017_v14 = vld [vmem:[#allocation4 + $0x360] ss:$16 sps:$4 sm:$0xff]   ;;  %v10020_v63 = vld [vmem:[#allocation4 + $0x368] ss:$16 sps:$4 sm:$0xff]  }
 0x398   :  { %6653 = vmatpush1.bf16.msra.mxu0 %v9945_v15  ;;  %6735 = vmatpush1.bf16.msra.mxu1 %v9948_v16  ;;  %v10025_v15 = vld [vmem:[#allocation4 + $0x384] ss:$16 sps:$4 sm:$0xff]   ;;  %v10028_v16 = vld [vmem:[#allocation4 + $0x38c] ss:$16 sps:$4 sm:$0xff]  }
 0x399   :  { %6663 = vmatprep.subr.bf16.mxu0 %v9953_v17  ;;  %6745 = vmatprep.subr.bf16.mxu1 %v9956_v49  ;;  %v10023_v17 = vld [vmem:[#allocation4 + $0x380] ss:$16 sps:$4 sm:$0xff]   ;;  %v10026_v49 = vld [vmem:[#allocation4 + $0x388] ss:$16 sps:$4 sm:$0xff]  }
 0x42e   :  { %v5347_v62 = vpop.f32.mrb[0].mxu0  ;;  %v10541_v18 = vpop.f32.mrb[0].mxu1 }
 0x42f   :  { %v5846_v19 = vmax.f32 %v5347_v62, 0.0  ;;  %v5349_v20 = vpop.f32.mrb[1].mxu0  ;;  %v5841_v21 = vpop.f32.mrb[1].mxu1  ;;  %v10031_v62 = vld [vmem:[#allocation4 + $0x3a4] ss:$16 sps:$4 sm:$0xff]  }
 0x430   :  { %v5847_v24 = vmax.f32 %v5349_v20, 0.0  ;;  %v5351_v3 = vpop.f32.mrb[2].mxu0  ;;  %v5843_v9 = vpop.f32.mrb[2].mxu1  ;;  %v5849_v11 = vmax.f32 %v5841_v21, 0.0  ;;  %v10029_v20 = vld [vmem:[#allocation4 + $0x3a0] ss:$16 sps:$4 sm:$0xff]  }
 0x431   :  { %v5352_v27 = vpop.f32.mrb[3].mxu0  ;;  %v5844_v22 = vpop.f32.mrb[3].mxu1  ;;  %v5850_v32 = vpack.c.bf16 %v5846_v19, %v5846_v19  ;;  %v10034_v19 = vld [vmem:[#allocation4 + $0x3ac] ss:$16 sps:$4 sm:$0xff]   ;;  %v10032_v21 = vld [vmem:[#allocation4 + $0x3a8] ss:$16 sps:$4 sm:$0xff]  }
 0x432   :  { %v5851_v28 = vpack.c.bf16 %v5847_v24, %v5847_v24  ;;  %v5853_v35 = vpack.c.bf16 %v5849_v11, %v5849_v11  ;;  %v10037_v24 = vld [vmem:[#allocation4 + $0x3c4] ss:$16 sps:$4 sm:$0xff]   ;;  %v10040_v3 = vld [vmem:[#allocation4 + $0x3cc] ss:$16 sps:$4 sm:$0xff]   ;;  %v10035_v9 = vld [vmem:[#allocation4 + $0x3c0] ss:$16 sps:$4 sm:$0xff]  }
 0x433   :  { %v10038_v11 = vld [vmem:[#allocation4 + $0x3c8] ss:$16 sps:$4 sm:$0xff]   ;;  %v10043_v27 = vld [vmem:[#allocation4 + $0x3e4] ss:$16 sps:$4 sm:$0xff]   ;;  %v10046_v22 = vld [vmem:[#allocation4 + $0x3ec] ss:$16 sps:$4 sm:$0xff]  }
 0x434   :  { %6654 = vmatprep.mubr.bf16.mxu0 %v5851_v28  ;;  %6736 = vmatprep.mubr.bf16.mxu1 %v5851_v28  ;;  %v10041_v28 = vld [vmem:[#allocation4 + $0x3e0] ss:$16 sps:$4 sm:$0xff]  }
 0x435   :  { %6655 = vmatmul.mubr.bf16.vlgmr.msra.gmra.mrb[4].mxu0 %v5850_v32  ;;  %6737 = vmatmul.mubr.bf16.vlgmr.msra.gmra.mrb[4].mxu1 %v5850_v32  ;;  %v10049_v32 = vld [vmem:[#allocation6 + $0x4] ss:$8 sps:$4 sm:$0xff]  }
 0x436   :  { %6664 = vmatpush1.bf16.msra.mxu0 %v9951_v30  ;;  %6746 = vmatpush1.bf16.msra.mxu1 %v9954_v31  ;;  %v10044_v30 = vld [vmem:[#allocation4 + $0x3e8] ss:$16 sps:$4 sm:$0xff]   ;;  %v5848_v31 = vmax.f32 %v10541_v18, 0.0 }
 0x437   :  { %6695 = vmatprep.mubr.bf16.mxu0 %v5853_v35  ;;  %6777 = vmatprep.mubr.bf16.mxu1 %v5853_v35  ;;  %v10052_v35 = vld [vmem:[#allocation6 + $0x14] ss:$8 sps:$4 sm:$0xff]   ;;  %v10056_v18 = vld [vmem:[#allocation6 + $0x30] ss:$8 sps:$4 sm:$0xff]  }
 0x438   :  { %6665 = vmatprep.subr.bf16.mxu0 %v9959_v33  ;;  %6747 = vmatprep.subr.bf16.mxu1 %v9962_v34  ;;  %v10047_v33 = vld [vmem:[#allocation6] ss:$8 sps:$4 sm:$0xff]   ;;  %v5852_v34 = vpack.c.bf16 %v5848_v31, %v5848_v31  ;;  %v10098_v31 = vld [vmem:[#allocation6 + $0x110] ss:$8 sps:$4 sm:$0xff]  }
 0x43a   :  { %6666 = vmatpush1.bf16.msra.mxu0 %v9957_v36  ;;  %6748 = vmatpush1.bf16.msra.mxu1 %v9960_v25  ;;  %v10050_v36 = vld [vmem:[#allocation6 + $0x10] ss:$8 sps:$4 sm:$0xff]   ;;  %v10055_v25 = vld [vmem:[#allocation6 + $0x24] ss:$8 sps:$4 sm:$0xff]  }
 0x43b   :  { %6667 = vmatprep.subr.bf16.mxu0 %v9965_v39  ;;  %6749 = vmatprep.subr.bf16.mxu1 %v9968_v40  ;;  %v10053_v39 = vld [vmem:[#allocation6 + $0x20] ss:$8 sps:$4 sm:$0xff]   ;;  %v10058_v40 = vld [vmem:[#allocation6 + $0x34] ss:$8 sps:$4 sm:$0xff]  }
 0x43e   :  { %6668 = vmatpush1.bf16.msra.mxu0 %v9963_v26  ;;  %6750 = vmatpush1.bf16.msra.mxu1 %v9966_v41  ;;  %v10061_v26 = vld [vmem:[#allocation6 + $0x44] ss:$8 sps:$4 sm:$0xff]   ;;  %v10059_v41 = vld [vmem:[#allocation6 + $0x40] ss:$8 sps:$4 sm:$0xff]  }
 0x43f   :  { %6669 = vmatprep.subr.bf16.mxu0 %v9971_v43  ;;  %6751 = vmatprep.subr.bf16.mxu1 %v9974_v23  ;;  %v10064_v43 = vld [vmem:[#allocation6 + $0x54] ss:$8 sps:$4 sm:$0xff]   ;;  %v10062_v23 = vld [vmem:[#allocation6 + $0x50] ss:$8 sps:$4 sm:$0xff]  }
 0x442   :  { %6670 = vmatpush1.bf16.msra.mxu0 %v9969_v44  ;;  %6752 = vmatpush1.bf16.msra.mxu1 %v9972_v45  ;;  %v10067_v44 = vld [vmem:[#allocation6 + $0x64] ss:$8 sps:$4 sm:$0xff]   ;;  %v10065_v45 = vld [vmem:[#allocation6 + $0x60] ss:$8 sps:$4 sm:$0xff]  }
 0x443   :  { %6671 = vmatprep.subr.bf16.mxu0 %v9977_v46  ;;  %6753 = vmatprep.subr.bf16.mxu1 %v9980_v47  ;;  %v10070_v46 = vld [vmem:[#allocation6 + $0x74] ss:$8 sps:$4 sm:$0xff]   ;;  %v10068_v47 = vld [vmem:[#allocation6 + $0x70] ss:$8 sps:$4 sm:$0xff]  }
 0x446   :  { %6672 = vmatpush1.bf16.msra.mxu0 %v9975_v48  ;;  %6754 = vmatpush1.bf16.msra.mxu1 %v9978_v29  ;;  %v10073_v48 = vld [vmem:[#allocation6 + $0x84] ss:$8 sps:$4 sm:$0xff]   ;;  %v10071_v29 = vld [vmem:[#allocation6 + $0x80] ss:$8 sps:$4 sm:$0xff]  }
 0x447   :  { %6673 = vmatprep.subr.bf16.mxu0 %v9983_v52  ;;  %6755 = vmatprep.subr.bf16.mxu1 %v9986_v53  ;;  %v10076_v52 = vld [vmem:[#allocation6 + $0x94] ss:$8 sps:$4 sm:$0xff]   ;;  %v10074_v53 = vld [vmem:[#allocation6 + $0x90] ss:$8 sps:$4 sm:$0xff]  }
 0x44a   :  { %6674 = vmatpush1.bf16.msra.mxu0 %v9981_v38  ;;  %6756 = vmatpush1.bf16.msra.mxu1 %v9984_v54  ;;  %v10079_v38 = vld [vmem:[#allocation6 + $0xa4] ss:$8 sps:$4 sm:$0xff]   ;;  %v10077_v54 = vld [vmem:[#allocation6 + $0xa0] ss:$8 sps:$4 sm:$0xff]  }
 0x44b   :  { %6675 = vmatprep.subr.bf16.mxu0 %v9989_v56  ;;  %6757 = vmatprep.subr.bf16.mxu1 %v9992_v37  ;;  %v10082_v56 = vld [vmem:[#allocation6 + $0xb4] ss:$8 sps:$4 sm:$0xff]   ;;  %v10080_v37 = vld [vmem:[#allocation6 + $0xb0] ss:$8 sps:$4 sm:$0xff]  }
 0x44e   :  { %6676 = vmatpush1.bf16.msra.mxu0 %v9987_v57  ;;  %6758 = vmatpush1.bf16.msra.mxu1 %v9990_v58  ;;  %v10085_v57 = vld [vmem:[#allocation6 + $0xc4] ss:$8 sps:$4 sm:$0xff]   ;;  %v10083_v58 = vld [vmem:[#allocation6 + $0xc0] ss:$8 sps:$4 sm:$0xff]  }
 0x44f   :  { %6677 = vmatprep.subr.bf16.mxu0 %v9995_v59  ;;  %6759 = vmatprep.subr.bf16.mxu1 %v9998_v60  ;;  %v10088_v59 = vld [vmem:[#allocation6 + $0xd4] ss:$8 sps:$4 sm:$0xff]   ;;  %v10086_v60 = vld [vmem:[#allocation6 + $0xd0] ss:$8 sps:$4 sm:$0xff]  }
 0x452   :  { %6678 = vmatpush1.bf16.msra.mxu0 %v9993_v61  ;;  %6760 = vmatpush1.bf16.msra.mxu1 %v9996_v42  ;;  %v10091_v61 = vld [vmem:[#allocation6 + $0xe4] ss:$8 sps:$4 sm:$0xff]   ;;  %v10089_v42 = vld [vmem:[#allocation6 + $0xe0] ss:$8 sps:$4 sm:$0xff]  }
 0x453   :  { %6679 = vmatprep.subr.bf16.mxu0 %v10001_v0  ;;  %6761 = vmatprep.subr.bf16.mxu1 %v10004_v1  ;;  %v10094_v0 = vld [vmem:[#allocation6 + $0xf4] ss:$8 sps:$4 sm:$0xff]   ;;  %v10092_v1 = vld [vmem:[#allocation6 + $0xf0] ss:$8 sps:$4 sm:$0xff]  }
 0x456   :  { %6680 = vmatpush1.bf16.msra.mxu0 %v9999_v51  ;;  %6762 = vmatpush1.bf16.msra.mxu1 %v10002_v2  ;;  %v10097_v51 = vld [vmem:[#allocation6 + $0x104] ss:$8 sps:$4 sm:$0xff]  }
 0x457   :  { %6681 = vmatprep.subr.bf16.mxu0 %v10007_v4  ;;  %6763 = vmatprep.subr.bf16.mxu1 %v10010_v50  ;;  %v10143_v2 = vld [vmem:[#allocation7 + $0x40] sm:$0xff]   ;;  %v10145_v50 = vld [vmem:[#allocation7 + $0x48] sm:$0xff]  }
 0x458   :  { %v10144_v4 = vld [vmem:[#allocation7] sm:$0xff]  }
 0x45a   :  { %6682 = vmatpush1.bf16.msra.mxu0 %v10005_v5  ;;  %6764 = vmatpush1.bf16.msra.mxu1 %v10008_v6  ;;  %v10146_v5 = vld [vmem:[#allocation7 + $0x8] sm:$0xff]   ;;  %v10147_v6 = vld [vmem:[#allocation7 + $0x50] sm:$0xff]  }
 0x45b   :  { %6683 = vmatprep.subr.bf16.mxu0 %v10013_v7  ;;  %6765 = vmatprep.subr.bf16.mxu1 %v10016_v8  ;;  %v10148_v7 = vld [vmem:[#allocation7 + $0x10] sm:$0xff]   ;;  %v10149_v8 = vld [vmem:[#allocation7 + $0x58] sm:$0xff]  }
 0x45e   :  { %6684 = vmatpush1.bf16.msra.mxu0 %v10011_v10  ;;  %6766 = vmatpush1.bf16.msra.mxu1 %v10014_v55  ;;  %v10150_v10 = vld [vmem:[#allocation7 + $0x18] sm:$0xff]   ;;  %v10151_v55 = vld [vmem:[#allocation7 + $0x60] sm:$0xff]  }
 0x45f   :  { %6685 = vmatprep.subr.bf16.mxu0 %v10019_v12  ;;  %6767 = vmatprep.subr.bf16.mxu1 %v10022_v13  ;;  %v10152_v12 = vld [vmem:[#allocation7 + $0x20] sm:$0xff]   ;;  %v10153_v13 = vld [vmem:[#allocation7 + $0x68] sm:$0xff]  }
 0x462   :  { %6686 = vmatpush1.bf16.msra.mxu0 %v10017_v14  ;;  %6768 = vmatpush1.bf16.msra.mxu1 %v10020_v63  ;;  %v10154_v14 = vld [vmem:[#allocation7 + $0x28] sm:$0xff]   ;;  %v10155_v63 = vld [vmem:[#allocation7 + $0x70] sm:$0xff]  }
 0x463   :  { %6687 = vmatprep.subr.bf16.mxu0 %v10025_v15  ;;  %6769 = vmatprep.subr.bf16.mxu1 %v10028_v16 }
 0x466   :  { %6688 = vmatpush1.bf16.msra.mxu0 %v10023_v17  ;;  %6770 = vmatpush1.bf16.msra.mxu1 %v10026_v49 }
 0x467   :  { %6689 = vmatprep.subr.bf16.mxu0 %v10031_v62  ;;  %6771 = vmatprep.subr.bf16.mxu1 %v10034_v19 }
 0x46a   :  { %6690 = vmatpush1.bf16.msra.mxu0 %v10029_v20  ;;  %6772 = vmatpush1.bf16.msra.mxu1 %v10032_v21 }
 0x46b   :  { %6691 = vmatprep.subr.bf16.mxu0 %v10037_v24  ;;  %6773 = vmatprep.subr.bf16.mxu1 %v10040_v3 }
 0x46e   :  { %6692 = vmatpush1.bf16.msra.mxu0 %v10035_v9  ;;  %6774 = vmatpush1.bf16.msra.mxu1 %v10038_v11 }
 0x46f   :  { %6693 = vmatprep.subr.bf16.mxu0 %v10043_v27  ;;  %6775 = vmatprep.subr.bf16.mxu1 %v10046_v22  ;;  %v10095_v27 = vld [vmem:[#allocation6 + $0x100] ss:$8 sps:$4 sm:$0xff]  }
 0x472   :  { %6694 = vmatpush1.bf16.msra.mxu0 %v10041_v28  ;;  %6776 = vmatpush1.bf16.msra.mxu1 %v10044_v30  ;;  %v10100_v28 = vld [vmem:[#allocation6 + $0x114] ss:$8 sps:$4 sm:$0xff]  }
 0x473   :  { %7178 = vmatprep.subr.bf16.mxu0 %v10049_v32  ;;  %8532 = vmatprep.subr.bf16.mxu1 %v10143_v2  ;;  %v10103_v32 = vld [vmem:[#allocation6 + $0x124] ss:$8 sps:$4 sm:$0xff]  }
 0x475   :  { %6696 = vmatmul.mubr.bf16.vlgmr.msra.gmra.mrb[4].mxu0 %v5852_v34  ;;  %6778 = vmatmul.mubr.bf16.vlgmr.msra.gmra.mrb[4].mxu1 %v5852_v34  ;;  %v10106_v34 = vld [vmem:[#allocation6 + $0x134] ss:$8 sps:$4 sm:$0xff]  }
 0x476   :  { %7179 = vmatpush1.bf16.msra.mxu0 %v10047_v33  ;;  %8533 = vmatpush3.bf16.msra.mxu1 %v10144_v4  ;;  %v10101_v33 = vld [vmem:[#allocation6 + $0x120] ss:$8 sps:$4 sm:$0xff]  }
 0x477   :  { %7180 = vmatprep.subr.bf16.mxu0 %v10052_v35  ;;  %8534 = vmatprep.subr.bf16.mxu1 %v10145_v50  ;;  %v10104_v35 = vld [vmem:[#allocation6 + $0x130] ss:$8 sps:$4 sm:$0xff]  }
 0x47a   :  { %7181 = vmatpush1.bf16.msra.mxu0 %v10050_v36  ;;  %8535 = vmatpush3.bf16.msra.mxu1 %v10146_v5  ;;  %v10109_v36 = vld [vmem:[#allocation6 + $0x144] ss:$8 sps:$4 sm:$0xff]  }
 0x47b   :  { %7182 = vmatprep.subr.bf16.mxu0 %v10055_v25  ;;  %8536 = vmatprep.subr.bf16.mxu1 %v10147_v6  ;;  %v10107_v25 = vld [vmem:[#allocation6 + $0x140] ss:$8 sps:$4 sm:$0xff]  }
 0x47e   :  { %7183 = vmatpush1.bf16.msra.mxu0 %v10053_v39  ;;  %8537 = vmatpush3.bf16.msra.mxu1 %v10148_v7  ;;  %v10112_v39 = vld [vmem:[#allocation6 + $0x154] ss:$8 sps:$4 sm:$0xff]  }
 0x47f   :  { %7184 = vmatprep.subr.bf16.mxu0 %v10058_v40  ;;  %8538 = vmatprep.subr.bf16.mxu1 %v10149_v8  ;;  %v10110_v40 = vld [vmem:[#allocation6 + $0x150] ss:$8 sps:$4 sm:$0xff]  }
 0x482   :  { %7185 = vmatpush1.bf16.msra.mxu0 %v10056_v18  ;;  %8539 = vmatpush3.bf16.msra.mxu1 %v10150_v10  ;;  %v10115_v18 = vld [vmem:[#allocation6 + $0x164] ss:$8 sps:$4 sm:$0xff]  }
 0x483   :  { %7186 = vmatprep.subr.bf16.mxu0 %v10061_v26  ;;  %8540 = vmatprep.subr.bf16.mxu1 %v10151_v55  ;;  %v10113_v26 = vld [vmem:[#allocation6 + $0x160] ss:$8 sps:$4 sm:$0xff]  }
 0x484   :  { %v10159_v10 = vld [vmem:[#allocation9] sm:$0xff]  }
 0x486   :  { %7187 = vmatpush1.bf16.msra.mxu0 %v10059_v41  ;;  %8541 = vmatpush3.bf16.msra.mxu1 %v10152_v12  ;;  %v10118_v41 = vld [vmem:[#allocation6 + $0x174] ss:$8 sps:$4 sm:$0xff]   ;;  %v10160_v12 = vld [vmem:[#allocation9 + $0x8] sm:$0xff]  }
 0x487   :  { %7188 = vmatprep.subr.bf16.mxu0 %v10064_v43  ;;  %8542 = vmatprep.subr.bf16.mxu1 %v10153_v13  ;;  %v10116_v43 = vld [vmem:[#allocation6 + $0x170] ss:$8 sps:$4 sm:$0xff]  }
 0x488   :  { %v10161_v13 = vld [vmem:[#allocation9 + $0x10] sm:$0xff]  }
 0x48a   :  { %7189 = vmatpush1.bf16.msra.mxu0 %v10062_v23  ;;  %8543 = vmatpush3.bf16.msra.mxu1 %v10154_v14  ;;  %v10121_v23 = vld [vmem:[#allocation6 + $0x184] ss:$8 sps:$4 sm:$0xff]   ;;  %v10162_v14 = vld [vmem:[#allocation9 + $0x18] sm:$0xff]  }
 0x48b   :  { %7190 = vmatprep.subr.bf16.mxu0 %v10067_v44  ;;  %8544 = vmatprep.subr.bf16.mxu1 %v10155_v63  ;;  %v10119_v44 = vld [vmem:[#allocation6 + $0x180] ss:$8 sps:$4 sm:$0xff]  }
 0x48c   :  { %v10163_v63 = vld [vmem:[#allocation9 + $0x20] sm:$0xff]  }
 0x48e   :  { %7191 = vmatpush1.bf16.msra.mxu0 %v10065_v45  ;;  %v10124_v45 = vld [vmem:[#allocation6 + $0x194] ss:$8 sps:$4 sm:$0xff]  }
 0x48f   :  { %7192 = vmatprep.subr.bf16.mxu0 %v10070_v46  ;;  %v10122_v46 = vld [vmem:[#allocation6 + $0x190] ss:$8 sps:$4 sm:$0xff]  }
 0x492   :  { %7193 = vmatpush1.bf16.msra.mxu0 %v10068_v47  ;;  %v10127_v47 = vld [vmem:[#allocation6 + $0x1a4] ss:$8 sps:$4 sm:$0xff]  }
 0x493   :  { %7194 = vmatprep.subr.bf16.mxu0 %v10073_v48  ;;  %v10125_v48 = vld [vmem:[#allocation6 + $0x1a0] ss:$8 sps:$4 sm:$0xff]  }
 0x496   :  { %7195 = vmatpush1.bf16.msra.mxu0 %v10071_v29  ;;  %v10130_v29 = vld [vmem:[#allocation6 + $0x1b4] ss:$8 sps:$4 sm:$0xff]  }
 0x497   :  { %7196 = vmatprep.subr.bf16.mxu0 %v10076_v52  ;;  %v10128_v52 = vld [vmem:[#allocation6 + $0x1b0] ss:$8 sps:$4 sm:$0xff]  }
 0x49a   :  { %7197 = vmatpush1.bf16.msra.mxu0 %v10074_v53  ;;  %v10133_v53 = vld [vmem:[#allocation6 + $0x1c4] ss:$8 sps:$4 sm:$0xff]  }
 0x49b   :  { %7198 = vmatprep.subr.bf16.mxu0 %v10079_v38  ;;  %v10131_v38 = vld [vmem:[#allocation6 + $0x1c0] ss:$8 sps:$4 sm:$0xff]  }
 0x49e   :  { %7199 = vmatpush1.bf16.msra.mxu0 %v10077_v54  ;;  %v10136_v54 = vld [vmem:[#allocation6 + $0x1d4] ss:$8 sps:$4 sm:$0xff]  }
 0x49f   :  { %7200 = vmatprep.subr.bf16.mxu0 %v10082_v56  ;;  %v10134_v56 = vld [vmem:[#allocation6 + $0x1d0] ss:$8 sps:$4 sm:$0xff]  }
 0x4a2   :  { %7201 = vmatpush1.bf16.msra.mxu0 %v10080_v37  ;;  %v10139_v37 = vld [vmem:[#allocation6 + $0x1e4] ss:$8 sps:$4 sm:$0xff]  }
 0x4a3   :  { %7202 = vmatprep.subr.bf16.mxu0 %v10085_v57  ;;  %v10137_v57 = vld [vmem:[#allocation6 + $0x1e0] ss:$8 sps:$4 sm:$0xff]  }
 0x4a6   :  { %7203 = vmatpush1.bf16.msra.mxu0 %v10083_v58  ;;  %v10142_v58 = vld [vmem:[#allocation6 + $0x1f4] ss:$8 sps:$4 sm:$0xff]  }
 0x4a7   :  { %7204 = vmatprep.subr.bf16.mxu0 %v10088_v59  ;;  %v10140_v59 = vld [vmem:[#allocation6 + $0x1f0] ss:$8 sps:$4 sm:$0xff]  }
 0x4aa   :  { %7205 = vmatpush1.bf16.msra.mxu0 %v10086_v60 }
 0x4ab   :  { %7206 = vmatprep.subr.bf16.mxu0 %v10091_v61 }
 0x4ae   :  { %7207 = vmatpush1.bf16.msra.mxu0 %v10089_v42  ;;  %v10156_v42 = vld [vmem:[#allocation7 + $0x30] sm:$0xff]  }
 0x4af   :  { %7208 = vmatprep.subr.bf16.mxu0 %v10094_v0  ;;  %8545 = vmatpush3.bf16.msra.mxu1 %v10156_v42  ;;  %v10157_v0 = vld [vmem:[#allocation7 + $0x78] sm:$0xff]  }
 0x4b0   :  { %8546 = vmatprep.subr.bf16.mxu1 %v10157_v0 }
 0x4b2   :  { %7209 = vmatpush1.bf16.msra.mxu0 %v10092_v1  ;;  %v10158_v1 = vld [vmem:[#allocation7 + $0x38] sm:$0xff]  }
 0x4b3   :  { %7219 = vmatprep.subr.bf16.mxu0 %v10097_v51  ;;  %8547 = vmatpush3.bf16.msra.mxu1 %v10158_v1  ;;  %v10295_v51 = vmov 0.0  }
 0x4b4   :  { %8563 = vmatprep.subr.bf16.mxu1 %v10295_v51 }
 0x548   :  { %v6697_v15 = vpop.f32.mrb[4].mxu0  ;;  %v10544_v16 = vpop.f32.mrb[4].mxu1 }
 0x549   :  { %v6786_v17 = vmax.f32 %v6697_v15, 0.0  ;;  %v6699_v49 = vpop.f32.mrb[5].mxu0  ;;  %v6781_v62 = vpop.f32.mrb[5].mxu1  ;;  %v6788_v60 = vmax.f32 %v10544_v16, 0.0  ;;  %v10164_v15 = vld [vmem:[#allocation9 + $0x28] sm:$0xff]   ;;  %v10165_v16 = vld [vmem:[#allocation9 + $0x30] sm:$0xff]  }
 0x54a   :  { %v6787_v19 = vmax.f32 %v6699_v49, 0.0  ;;  %v6789_v20 = vmax.f32 %v6781_v62, 0.0  ;;  %v6701_v21 = vpop.f32.mrb[6].mxu0  ;;  %v6783_v24 = vpop.f32.mrb[6].mxu1 }
 0x54b   :  { %v6702_v3 = vpop.f32.mrb[7].mxu0  ;;  %v6784_v9 = vpop.f32.mrb[7].mxu1  ;;  %v6790_v22 = vpack.c.bf16 %v6786_v17, %v6786_v17  ;;  %v6792_v61 = vpack.c.bf16 %v6788_v60, %v6788_v60  ;;  %v10166_v17 = vld [vmem:[#allocation9 + $0x38] sm:$0xff]  }
 0x54c   :  { %v6791_v11 = vpack.c.bf16 %v6787_v19, %v6787_v19  ;;  %v6793_v30 = vpack.c.bf16 %v6789_v20, %v6789_v20 }
 0x54e   :  { %7210 = vmatprep.mubr.bf16.mxu0 %v6791_v11 }
 0x54f   :  { %7211 = vmatmul.mubr.bf16.vlgmr.msra.gmra.mrb[8].mxu0 %v6790_v22 }
 0x550   :  { %7220 = vmatpush1.bf16.msra.mxu0 %v10095_v27  ;;  %7251 = vmatprep.mubr.bf16.mxu0 %v6793_v30 }
 0x551   :  { %7221 = vmatprep.subr.bf16.mxu0 %v10100_v28 }
 0x554   :  { %7222 = vmatpush1.bf16.msra.mxu0 %v10098_v31 }
 0x555   :  { %7223 = vmatprep.subr.bf16.mxu0 %v10103_v32 }
 0x558   :  { %7224 = vmatpush1.bf16.msra.mxu0 %v10101_v33 }
 0x559   :  { %7225 = vmatprep.subr.bf16.mxu0 %v10106_v34 }
 0x55c   :  { %7226 = vmatpush1.bf16.msra.mxu0 %v10104_v35 }
 0x55d   :  { %7227 = vmatprep.subr.bf16.mxu0 %v10109_v36 }
 0x560   :  { %7228 = vmatpush1.bf16.msra.mxu0 %v10107_v25 }
 0x561   :  { %7229 = vmatprep.subr.bf16.mxu0 %v10112_v39 }
 0x564   :  { %7230 = vmatpush1.bf16.msra.mxu0 %v10110_v40 }
 0x565   :  { %7231 = vmatprep.subr.bf16.mxu0 %v10115_v18 }
 0x568   :  { %7232 = vmatpush1.bf16.msra.mxu0 %v10113_v26 }
 0x569   :  { %7233 = vmatprep.subr.bf16.mxu0 %v10118_v41 }
 0x56c   :  { %7234 = vmatpush1.bf16.msra.mxu0 %v10116_v43 }
 0x56d   :  { %7235 = vmatprep.subr.bf16.mxu0 %v10121_v23 }
 0x570   :  { %7236 = vmatpush1.bf16.msra.mxu0 %v10119_v44 }
 0x571   :  { %7237 = vmatprep.subr.bf16.mxu0 %v10124_v45 }
 0x574   :  { %7238 = vmatpush1.bf16.msra.mxu0 %v10122_v46 }
 0x575   :  { %7239 = vmatprep.subr.bf16.mxu0 %v10127_v47 }
 0x578   :  { %7240 = vmatpush1.bf16.msra.mxu0 %v10125_v48 }
 0x579   :  { %7241 = vmatprep.subr.bf16.mxu0 %v10130_v29 }
 0x57c   :  { %7242 = vmatpush1.bf16.msra.mxu0 %v10128_v52 }
 0x57d   :  { %7243 = vmatprep.subr.bf16.mxu0 %v10133_v53 }
 0x580   :  { %7244 = vmatpush1.bf16.msra.mxu0 %v10131_v38 }
 0x581   :  { %7245 = vmatprep.subr.bf16.mxu0 %v10136_v54 }
 0x584   :  { %7246 = vmatpush1.bf16.msra.mxu0 %v10134_v56 }
 0x585   :  { %7247 = vmatprep.subr.bf16.mxu0 %v10139_v37 }
 0x588   :  { %7248 = vmatpush1.bf16.msra.mxu0 %v10137_v57 }
 0x589   :  { %7249 = vmatprep.subr.bf16.mxu0 %v10142_v58 }
 0x58c   :  { %7250 = vmatpush1.bf16.msra.mxu0 %v10140_v59 }
 0x58f   :  { %7252 = vmatmul.mubr.bf16.vlgmr.msra.gmra.mrb[8].mxu0 %v6792_v61 }
 0x662   :  { %v7253_v2 = vpop.f32.mrb[8].mxu0 }
 0x663   :  { %v7260_v4 = vmax.f32 %v7253_v2, 0.0  ;;  %v7255_v50 = vpop.f32.mrb[9].mxu0 }
 0x664   :  { %v7261_v5 = vmax.f32 %v7255_v50, 0.0  ;;  %v7257_v6 = vpop.f32.mrb[10].mxu0 }
 0x665   :  { %v7258_v7 = vpop.f32.mrb[11].mxu0  ;;  %v7262_v55 = vpack.c.bf16 %v7260_v4, %v7260_v4 }
 0x666   :  { %v7263_v8 = vpack.c.bf16 %v7261_v5, %v7261_v5 }
 0x668   :  { %7424 = vmatprep.mubr.bf16.mxu1 %v7263_v8 }
 0x669   :  { %7425 = vmatmul.mubr.bf16.vlgmr.msra.gmra.mrb[8].mxu1 %v7262_v55 }
 0x66a   :  { %8564 = vmatpush3.bf16.msra.mxu1 %v10159_v10  ;;  %8579 = vmatprep.mubr.msk.bf16.mxu1 %vm10296_vm0, %v10295_v51 }
 0x66b   :  { %8565 = vmatprep.subr.bf16.mxu1 %v10295_v51 }
 0x66e   :  { %8566 = vmatpush3.bf16.msra.mxu1 %v10160_v12 }
 0x66f   :  { %8567 = vmatprep.subr.bf16.mxu1 %v10295_v51 }
 0x672   :  { %8568 = vmatpush3.bf16.msra.mxu1 %v10161_v13 }
 0x673   :  { %8569 = vmatprep.subr.bf16.mxu1 %v10295_v51 }
 0x676   :  { %8570 = vmatpush3.bf16.msra.mxu1 %v10162_v14 }
 0x677   :  { %8571 = vmatprep.subr.bf16.mxu1 %v10295_v51 }
 0x67a   :  { %8572 = vmatpush3.bf16.msra.mxu1 %v10163_v63 }
 0x67b   :  { %8573 = vmatprep.subr.bf16.mxu1 %v10295_v51 }
 0x67e   :  { %8574 = vmatpush3.bf16.msra.mxu1 %v10164_v15 }
 0x67f   :  { %8575 = vmatprep.subr.bf16.mxu1 %v10295_v51 }
 0x682   :  { %8576 = vmatpush3.bf16.msra.mxu1 %v10165_v16 }
 0x683   :  { %8577 = vmatprep.subr.bf16.mxu1 %v10295_v51 }
 0x686   :  { %8578 = vmatpush3.bf16.msra.mxu1 %v10166_v17 }
 0x73c   :  { %v8548_v49 = vpop.f32.mrb[8].mxu1 }
 0x73d   :  { %v8549_v62 = vpop.f32.mrb[9].mxu1 }
 0x73e   :  { %v8550_v19 = vadd.f32 %v8549_v62, %v8548_v49  ;;  %v8551_v20 = vpop.f32.mrb[10].mxu1 }
 0x73f   :  { %v8552_v21 = vpop.f32.mrb[11].mxu1 }
 0x740   :  { %v7432_v24 = vmax.f32 %v8550_v19, 0.0 }
 0x742   :  { %v7433_v3 = vpack.c.bf16 %v7432_v24, %v7432_v24 }
 0x744   :  { %8580 = vmatmul.mubr.bf16.vlgmr.msra.gmra.mrb[12].mxu1 %v7433_v3 }
 0x817   :  { %v7532_v9 = vpop.f32.mrb[12].mxu1 }
 0x818   :  { %v7538_v11 = vmax.f32 %v7532_v9, 0.0  ;;  %v8581_v27 = vpop.f32.mrb[13].mxu1 }
 0x819   :  { %v7535_v22 = vpop.f32.mrb[14].mxu1 }
 0x81a   :  { %v7539_v28 = vpack.c.bf16 %v7538_v11, %v7538_v11  ;;  %v8582_v30 = vpop.f32.mrb[15].mxu1 }
 0x81c   :  { %7540 = vst [vmem:[%s10556_s6] sm:$0x1] %v7539_v28 }
 0x81d   :  { %7545 = vsyncpa [#allocation3], 1 }
 0x81e   :  { %7546 = vsyncpa [#allocation5], 1 }
 0x81f   :  { %7547 = vsyncpa [#allocation8], 1 }

</bundles_post_ra>
